<compile_context>
chip_gen: v7x
topology: tpu7x:2x2x1
jax: 0.10.0
libtpu: 0.0.40
codegen_flags: <defaults>
</compile_context>

<pallas_src>
import jax
import jax.numpy as jnp
from jax import lax
from jax.experimental import pallas as pl
from jax.experimental.pallas import tpu as pltpu

TEXT_DIM = 768
IMG_DIM = 512
FUSION_OUT = 512
FUSION_IN_PROD = 2 * TEXT_DIM + IMG_DIM    # 2048
FUSION_IN_QUERY = 3 * TEXT_DIM + IMG_DIM   # 2816
LN_EPS = 1e-5


def _round_up(n, m):
    return ((n + m - 1) // m) * m


def _fused_two_head_kernel(q_ref, t_ref, d_ref, i_ref, wq_ref, wp_ref,
                           bq_ref, bp_ref, g_ref, beta_ref, oq_ref, op_ref):
    """One batch tile: both fusion heads + shared LayerNorm.

    q/t/d_ref : (tile_b, 768)  tower embeddings (any float dtype; cast to bf16)
    i_ref     : (tile_b, 512)
    wq_ref    : (2816, 512) bf16  -- query-head weight, stored (in, out)
    wp_ref    : (2048, 512) bf16  -- prod-head weight, stored (in, out)
    bq/bp/g/beta : (1, 512) f32
    oq/op     : (tile_b, 512)
    """
    # bf16 casts are cheap VPU work hidden under the MXU stream (no-op if the
    # towers already emit bf16).
    q = q_ref[...].astype(jnp.bfloat16)
    t = t_ref[...].astype(jnp.bfloat16)
    d = d_ref[...].astype(jnp.bfloat16)
    im = i_ref[...].astype(jnp.bfloat16)

    f32 = jnp.float32

    # Query head: concat(q,t,d,i) @ Wq as a K-split over static, aligned ref
    # slices of the resident weight (768 = 6*128; offsets are multiples of 16).
    yq = jnp.dot(q, wq_ref[0:TEXT_DIM, :], preferred_element_type=f32)
    yq = yq + jnp.dot(t, wq_ref[TEXT_DIM:2 * TEXT_DIM, :],
                      preferred_element_type=f32)
    yq = yq + jnp.dot(d, wq_ref[2 * TEXT_DIM:3 * TEXT_DIM, :],
                      preferred_element_type=f32)
    yq = yq + jnp.dot(im, wq_ref[3 * TEXT_DIM:FUSION_IN_QUERY, :],
                      preferred_element_type=f32)
    yq = yq + bq_ref[...]

    # Prod head: concat(t,d,i) @ Wp -- re-uses the same t/d/i loads.
    yp = jnp.dot(t, wp_ref[0:TEXT_DIM, :], preferred_element_type=f32)
    yp = yp + jnp.dot(d, wp_ref[TEXT_DIM:2 * TEXT_DIM, :],
                      preferred_element_type=f32)
    yp = yp + jnp.dot(im, wp_ref[2 * TEXT_DIM:FUSION_IN_PROD, :],
                      preferred_element_type=f32)
    yp = yp + bp_ref[...]

    gamma = g_ref[...]
    beta = beta_ref[...]
    inv_n = jnp.float32(1.0 / FUSION_OUT)

    def layer_norm(y):
        # Single-pass moments: one XLU sweep each for sum(y) and sum(y*y);
        # rsqrt lands on the EUP.  f32 with O(1) activations keeps the
        # E[y^2] - mean^2 cancellation benign.
        mean = jnp.sum(y, axis=-1, keepdims=True) * inv_n
        mean_sq = jnp.sum(y * y, axis=-1, keepdims=True) * inv_n
        var = mean_sq - mean * mean
        return (y - mean) * lax.rsqrt(var + LN_EPS)

    oq_ref[...] = (layer_norm(yq) * gamma + beta).astype(oq_ref.dtype)
    op_ref[...] = (layer_norm(yp) * gamma + beta).astype(op_ref.dtype)


def _resident_spec(shape):
    """BlockSpec for a grid-invariant (weight/bias/LN) operand: single-buffered."""
    return pl.BlockSpec(shape, lambda i: (0,) * len(shape),
                        pipeline_mode=pl.Buffered(1))


def _batch_spec(tile, dim):
    # If input DMA shows up exposed at large tiles, sweep pipeline_mode=
    # pl.Buffered(3) here (leave the resident specs at Buffered(1)).
    return pl.BlockSpec((tile, dim), lambda i: (i, 0))


def fused_two_head_linear_layernorm(q_emb, t_emb, d_emb, i_emb,
                                    w_query_t, w_prod_t, b_query, b_prod,
                                    gamma, beta, *, tile_b=256,
                                    out_dtype=jnp.float32):
    """Four tower embeddings -> (query_norm, prod_norm), each (B, 512).

    No host-side concat / cast / pad of a 2816-wide matrix: the tower
    embeddings go straight to the kernel, which reconstructs both concats via
    K-split matmuls against the resident weights.
    """
    B = q_emb.shape[0]
    assert q_emb.shape == (B, TEXT_DIM)
    assert t_emb.shape == (B, TEXT_DIM)
    assert d_emb.shape == (B, TEXT_DIM)
    assert i_emb.shape == (B, IMG_DIM)

    # Batch tiling: small batches use a single full-batch block (block dims
    # equal to the array dims are always legal); larger batches are padded to
    # a tile that keeps >=2 parallel grid steps so both v7x TensorCores get
    # work, capped at 512 rows (v6e MXU fill vs. VMEM / vreg pressure).
    if B <= 128:
        tile, b_pad = B, B
    else:
        half = _round_up((B + 1) // 2, 16)
        tile = max(16, min(_round_up(tile_b, 16), half, 512))
        b_pad = _round_up(B, tile)

    if b_pad != B:
        pad = ((0, b_pad - B), (0, 0))
        q_emb = jnp.pad(q_emb, pad)
        t_emb = jnp.pad(t_emb, pad)
        d_emb = jnp.pad(d_emb, pad)
        i_emb = jnp.pad(i_emb, pad)

    bq2 = b_query.reshape(1, FUSION_OUT).astype(jnp.float32)
    bp2 = b_prod.reshape(1, FUSION_OUT).astype(jnp.float32)
    g2 = gamma.reshape(1, FUSION_OUT).astype(jnp.float32)
    be2 = beta.reshape(1, FUSION_OUT).astype(jnp.float32)

    grid = (b_pad // tile,)
    q_norm, p_norm = pl.pallas_call(
        _fused_two_head_kernel,
        out_shape=(jax.ShapeDtypeStruct((b_pad, FUSION_OUT), out_dtype),
                   jax.ShapeDtypeStruct((b_pad, FUSION_OUT), out_dtype)),
        grid_spec=pltpu.PrefetchScalarGridSpec(
            num_scalar_prefetch=0,
            grid=grid,
            in_specs=[
                _batch_spec(tile, TEXT_DIM),   # query
                _batch_spec(tile, TEXT_DIM),   # title
                _batch_spec(tile, TEXT_DIM),   # desc
                _batch_spec(tile, IMG_DIM),    # image
                _resident_spec((FUSION_IN_QUERY, FUSION_OUT)),
                _resident_spec((FUSION_IN_PROD, FUSION_OUT)),
                _resident_spec((1, FUSION_OUT)),
                _resident_spec((1, FUSION_OUT)),
                _resident_spec((1, FUSION_OUT)),
                _resident_spec((1, FUSION_OUT)),
            ],
            out_specs=[
                _batch_spec(tile, FUSION_OUT),
                _batch_spec(tile, FUSION_OUT),
            ],
        ),
        compiler_params=pltpu.CompilerParams(
            dimension_semantics=("parallel",),
            # Resident weights ~4.75 MiB + double-buffered input/output tiles;
            # stays well under 48 MiB even at tile=512 (v7x: 64 MiB VMEM/TC).
            vmem_limit_bytes=48 * 1024 * 1024,
        ),
    )(q_emb, t_emb, d_emb, i_emb, w_query_t, w_prod_t, bq2, bp2, g2, be2)

    if b_pad != B:
        q_norm = q_norm[:B]
        p_norm = p_norm[:B]
    return q_norm, p_norm


def init_fusion_params(key):
    """Deterministic init matching FourTowerModel's fusion head shapes."""
    k1, k2, k3, k4 = jax.random.split(key, 4)
    # nn.Linear weights are (out, in); stored transposed (in, out), bf16.
    w_prod_t = (jax.random.normal(k1, (FUSION_IN_PROD, FUSION_OUT), jnp.float32)
                * 0.02).astype(jnp.bfloat16)
    b_prod = jax.random.normal(k2, (FUSION_OUT,), jnp.float32) * 0.02
    w_query_t = (jax.random.normal(k3, (FUSION_IN_QUERY, FUSION_OUT), jnp.float32)
                 * 0.02).astype(jnp.bfloat16)
    b_query = jax.random.normal(k4, (FUSION_OUT,), jnp.float32) * 0.02
    # LayerNorm default init (kept in f32).
    gamma = jnp.ones((FUSION_OUT,), jnp.float32)
    beta = jnp.zeros((FUSION_OUT,), jnp.float32)
    return dict(w_prod_t=w_prod_t, b_prod=b_prod,
                w_query_t=w_query_t, b_query=b_query,
                gamma=gamma, beta=beta)


def four_tower_forward(params, q_emb, t_emb, d_emb, i_emb, *, tile_b=256,
                       out_dtype=jnp.float32):
    """Mirrors FourTowerModel.forward given the four tower embeddings.

    Returns (query_norm, prod_norm), each (B, 512).
    """
    return fused_two_head_linear_layernorm(
        q_emb, t_emb, d_emb, i_emb,
        params["w_query_t"], params["w_prod_t"],
        params["b_query"], params["b_prod"],
        params["gamma"], params["beta"],
        tile_b=tile_b, out_dtype=out_dtype)


def _reference(params, q_emb, t_emb, d_emb, i_emb):
    """Plain-JAX reference with the same bf16 input/weight rounding."""
    qb = q_emb.astype(jnp.bfloat16)
    tb = t_emb.astype(jnp.bfloat16)
    db = d_emb.astype(jnp.bfloat16)
    ib = i_emb.astype(jnp.bfloat16)
    xq = jnp.concatenate([qb, tb, db, ib], axis=1)
    xp = jnp.concatenate([tb, db, ib], axis=1)

    def lin_ln(x, w_t, b):
        y = jnp.dot(x, w_t, preferred_element_type=jnp.float32) + b
        mean = jnp.mean(y, axis=-1, keepdims=True)
        var = jnp.mean((y - mean) ** 2, axis=-1, keepdims=True)
        yn = (y - mean) / jnp.sqrt(var + LN_EPS)
        return yn * params["gamma"] + params["beta"]

    return (lin_ln(xq, params["w_query_t"], params["b_query"]),
            lin_ln(xp, params["w_prod_t"], params["b_prod"]))


if __name__ == "__main__":
    key = jax.random.PRNGKey(0)
    kp, kq, kt, kd, ki = jax.random.split(key, 5)

    B = 8  # small demo batch; production uses B >= 256 with tile_b=256-512
    params = init_fusion_params(kp)

    # Synthetic tower outputs (BiBERT CLS = 768-d, CLIP image = 512-d).  The
    # towers emit bf16 ("cast at the tower output"), so no wrapper-side astype
    # pass is needed before the kernel.
    q_emb = jax.random.normal(kq, (B, TEXT_DIM), jnp.float32).astype(jnp.bfloat16)
    t_emb = jax.random.normal(kt, (B, TEXT_DIM), jnp.float32).astype(jnp.bfloat16)
    d_emb = jax.random.normal(kd, (B, TEXT_DIM), jnp.float32).astype(jnp.bfloat16)
    i_emb = jax.random.normal(ki, (B, IMG_DIM), jnp.float32).astype(jnp.bfloat16)

    query_norm, prod_norm = jax.jit(four_tower_forward)(
        params, q_emb, t_emb, d_emb, i_emb)
    jax.block_until_ready((query_norm, prod_norm))

    # Correctness against a plain-JAX reference with identical bf16 rounding.
    ref_q, ref_p = _reference(params, q_emb, t_emb, d_emb, i_emb)
    assert query_norm.shape == (B, FUSION_OUT)
    assert prod_norm.shape == (B, FUSION_OUT)
    assert jnp.allclose(query_norm, ref_q, atol=2e-3, rtol=2e-3), (
        float(jnp.max(jnp.abs(query_norm - ref_q))))
    assert jnp.allclose(prod_norm, ref_p, atol=2e-3, rtol=2e-3), (
        float(jnp.max(jnp.abs(prod_norm - ref_p))))

    print("KERNEL_OK")
</pallas_src>

<mosaic_0001>
module attributes {stable_mosaic.version = 11 : i64} {
  func.func @_fused_two_head_kernel(%arg0: i32, %arg1: memref<8x768xbf16, #tpu.memory_space<vmem>>, %arg2: memref<8x768xbf16, #tpu.memory_space<vmem>>, %arg3: memref<8x768xbf16, #tpu.memory_space<vmem>>, %arg4: memref<8x512xbf16, #tpu.memory_space<vmem>>, %arg5: memref<2816x512xbf16, #tpu.memory_space<vmem>>, %arg6: memref<2048x512xbf16, #tpu.memory_space<vmem>>, %arg7: memref<1x512xf32, #tpu.memory_space<vmem>>, %arg8: memref<1x512xf32, #tpu.memory_space<vmem>>, %arg9: memref<1x512xf32, #tpu.memory_space<vmem>>, %arg10: memref<1x512xf32, #tpu.memory_space<vmem>>, %arg11: memref<8x512xf32, #tpu.memory_space<vmem>>, %arg12: memref<8x512xf32, #tpu.memory_space<vmem>>) attributes {dimension_semantics = [#tpu.dimension_semantics<parallel>], iteration_bounds = array<i64: 1>, scalar_prefetch = 0 : i64, scratch_operands = 0 : i64, tpu.core_type = #tpu.core_type<tc>, window_params = [{transform_indices = @transform_0, window_bounds = array<i64: 8, 768>}, {transform_indices = @transform_1, window_bounds = array<i64: 8, 768>}, {transform_indices = @transform_2, window_bounds = array<i64: 8, 768>}, {transform_indices = @transform_3, window_bounds = array<i64: 8, 512>}, {pipeline_mode = #tpu.pipeline_mode<synchronous>, transform_indices = @transform_4, window_bounds = array<i64: 2816, 512>}, {pipeline_mode = #tpu.pipeline_mode<synchronous>, transform_indices = @transform_5, window_bounds = array<i64: 2048, 512>}, {pipeline_mode = #tpu.pipeline_mode<synchronous>, transform_indices = @transform_6, window_bounds = array<i64: 1, 512>}, {pipeline_mode = #tpu.pipeline_mode<synchronous>, transform_indices = @transform_7, window_bounds = array<i64: 1, 512>}, {pipeline_mode = #tpu.pipeline_mode<synchronous>, transform_indices = @transform_8, window_bounds = array<i64: 1, 512>}, {pipeline_mode = #tpu.pipeline_mode<synchronous>, transform_indices = @transform_9, window_bounds = array<i64: 1, 512>}, {transform_indices = @transform_10, window_bounds = array<i64: 8, 512>}, {transform_indices = @transform_11, window_bounds = array<i64: 8, 512>}]} {
    %c0 = arith.constant 0 : index
    %c0_0 = arith.constant 0 : index
    %0 = vector.load %arg1[%c0, %c0_0] : memref<8x768xbf16, #tpu.memory_space<vmem>>, vector<8x768xbf16>
    %c0_1 = arith.constant 0 : index
    %c0_2 = arith.constant 0 : index
    %1 = vector.load %arg2[%c0_1, %c0_2] : memref<8x768xbf16, #tpu.memory_space<vmem>>, vector<8x768xbf16>
    %c0_3 = arith.constant 0 : index
    %c0_4 = arith.constant 0 : index
    %2 = vector.load %arg3[%c0_3, %c0_4] : memref<8x768xbf16, #tpu.memory_space<vmem>>, vector<8x768xbf16>
    %c0_5 = arith.constant 0 : index
    %c0_6 = arith.constant 0 : index
    %3 = vector.load %arg4[%c0_5, %c0_6] : memref<8x512xbf16, #tpu.memory_space<vmem>>, vector<8x512xbf16>
    %c0_7 = arith.constant 0 : index
    %c0_8 = arith.constant 0 : index
    %4 = vector.load %arg5[%c0_7, %c0_8] : memref<2816x512xbf16, #tpu.memory_space<vmem>>, vector<768x512xbf16>
    %cst = arith.constant dense<0.000000e+00> : vector<8x512xf32>
    %5 = tpu.matmul %0, %4, %cst {dimension_numbers = #tpu.dot_dimension_numbers<[1], [0], [0], [1], [0, 0, 1, 1], [], []>} : vector<8x768xbf16>, vector<768x512xbf16>, vector<8x512xf32> -> vector<8x512xf32>
    %c768 = arith.constant 768 : index
    %c0_9 = arith.constant 0 : index
    %6 = vector.load %arg5[%c768, %c0_9] : memref<2816x512xbf16, #tpu.memory_space<vmem>>, vector<768x512xbf16>
    %cst_10 = arith.constant dense<0.000000e+00> : vector<8x512xf32>
    %7 = tpu.matmul %1, %6, %cst_10 {dimension_numbers = #tpu.dot_dimension_numbers<[1], [0], [0], [1], [0, 0, 1, 1], [], []>} : vector<8x768xbf16>, vector<768x512xbf16>, vector<8x512xf32> -> vector<8x512xf32>
    %8 = arith.addf %5, %7 : vector<8x512xf32>
    %c1536 = arith.constant 1536 : index
    %c0_11 = arith.constant 0 : index
    %9 = vector.load %arg5[%c1536, %c0_11] : memref<2816x512xbf16, #tpu.memory_space<vmem>>, vector<768x512xbf16>
    %cst_12 = arith.constant dense<0.000000e+00> : vector<8x512xf32>
    %10 = tpu.matmul %2, %9, %cst_12 {dimension_numbers = #tpu.dot_dimension_numbers<[1], [0], [0], [1], [0, 0, 1, 1], [], []>} : vector<8x768xbf16>, vector<768x512xbf16>, vector<8x512xf32> -> vector<8x512xf32>
    %11 = arith.addf %8, %10 : vector<8x512xf32>
    %c2304 = arith.constant 2304 : index
    %c0_13 = arith.constant 0 : index
    %12 = vector.load %arg5[%c2304, %c0_13] : memref<2816x512xbf16, #tpu.memory_space<vmem>>, vector<512x512xbf16>
    %cst_14 = arith.constant dense<0.000000e+00> : vector<8x512xf32>
    %13 = tpu.matmul %3, %12, %cst_14 {dimension_numbers = #tpu.dot_dimension_numbers<[1], [0], [0], [1], [0, 0, 1, 1], [], []>} : vector<8x512xbf16>, vector<512x512xbf16>, vector<8x512xf32> -> vector<8x512xf32>
    %14 = arith.addf %11, %13 : vector<8x512xf32>
    %c0_15 = arith.constant 0 : index
    %c0_16 = arith.constant 0 : index
    %15 = vector.load %arg7[%c0_15, %c0_16] : memref<1x512xf32, #tpu.memory_space<vmem>>, vector<1x512xf32>
    %16 = vector.broadcast %15 : vector<1x512xf32> to vector<8x512xf32>
    %17 = arith.addf %14, %16 : vector<8x512xf32>
    %c0_17 = arith.constant 0 : index
    %c0_18 = arith.constant 0 : index
    %18 = vector.load %arg6[%c0_17, %c0_18] : memref<2048x512xbf16, #tpu.memory_space<vmem>>, vector<768x512xbf16>
    %cst_19 = arith.constant dense<0.000000e+00> : vector<8x512xf32>
    %19 = tpu.matmul %1, %18, %cst_19 {dimension_numbers = #tpu.dot_dimension_numbers<[1], [0], [0], [1], [0, 0, 1, 1], [], []>} : vector<8x768xbf16>, vector<768x512xbf16>, vector<8x512xf32> -> vector<8x512xf32>
    %c768_20 = arith.constant 768 : index
    %c0_21 = arith.constant 0 : index
    %20 = vector.load %arg6[%c768_20, %c0_21] : memref<2048x512xbf16, #tpu.memory_space<vmem>>, vector<768x512xbf16>
    %cst_22 = arith.constant dense<0.000000e+00> : vector<8x512xf32>
    %21 = tpu.matmul %2, %20, %cst_22 {dimension_numbers = #tpu.dot_dimension_numbers<[1], [0], [0], [1], [0, 0, 1, 1], [], []>} : vector<8x768xbf16>, vector<768x512xbf16>, vector<8x512xf32> -> vector<8x512xf32>
    %22 = arith.addf %19, %21 : vector<8x512xf32>
    %c1536_23 = arith.constant 1536 : index
    %c0_24 = arith.constant 0 : index
    %23 = vector.load %arg6[%c1536_23, %c0_24] : memref<2048x512xbf16, #tpu.memory_space<vmem>>, vector<512x512xbf16>
    %cst_25 = arith.constant dense<0.000000e+00> : vector<8x512xf32>
    %24 = tpu.matmul %3, %23, %cst_25 {dimension_numbers = #tpu.dot_dimension_numbers<[1], [0], [0], [1], [0, 0, 1, 1], [], []>} : vector<8x512xbf16>, vector<512x512xbf16>, vector<8x512xf32> -> vector<8x512xf32>
    %25 = arith.addf %22, %24 : vector<8x512xf32>
    %c0_26 = arith.constant 0 : index
    %c0_27 = arith.constant 0 : index
    %26 = vector.load %arg8[%c0_26, %c0_27] : memref<1x512xf32, #tpu.memory_space<vmem>>, vector<1x512xf32>
    %27 = vector.broadcast %26 : vector<1x512xf32> to vector<8x512xf32>
    %28 = arith.addf %25, %27 : vector<8x512xf32>
    %c0_28 = arith.constant 0 : index
    %c0_29 = arith.constant 0 : index
    %29 = vector.load %arg9[%c0_28, %c0_29] : memref<1x512xf32, #tpu.memory_space<vmem>>, vector<1x512xf32>
    %c0_30 = arith.constant 0 : index
    %c0_31 = arith.constant 0 : index
    %30 = vector.load %arg10[%c0_30, %c0_31] : memref<1x512xf32, #tpu.memory_space<vmem>>, vector<1x512xf32>
    %cst_32 = arith.constant dense<0.000000e+00> : vector<8xf32>
    %31 = vector.multi_reduction <add>, %17, %cst_32 [1] : vector<8x512xf32> to vector<8xf32>
    %32 = vector.shape_cast %31 : vector<8xf32> to vector<8x1xf32>
    %cst_33 = arith.constant 0.001953125 : f32
    %33 = vector.broadcast %cst_33 : f32 to vector<8x1xf32>
    %34 = arith.mulf %32, %33 : vector<8x1xf32>
    %35 = arith.mulf %17, %17 : vector<8x512xf32>
    %cst_34 = arith.constant dense<0.000000e+00> : vector<8xf32>
    %36 = vector.multi_reduction <add>, %35, %cst_34 [1] : vector<8x512xf32> to vector<8xf32>
    %37 = vector.shape_cast %36 : vector<8xf32> to vector<8x1xf32>
    %cst_35 = arith.constant 0.001953125 : f32
    %38 = vector.broadcast %cst_35 : f32 to vector<8x1xf32>
    %39 = arith.mulf %37, %38 : vector<8x1xf32>
    %40 = arith.mulf %34, %34 : vector<8x1xf32>
    %41 = arith.subf %39, %40 : vector<8x1xf32>
    %42 = vector.broadcast %34 : vector<8x1xf32> to vector<8x512xf32>
    %43 = arith.subf %17, %42 : vector<8x512xf32>
    %cst_36 = arith.constant 9.99999974E-6 : f32
    %44 = vector.broadcast %cst_36 : f32 to vector<8x1xf32>
    %45 = arith.addf %41, %44 : vector<8x1xf32>
    %46 = math.rsqrt %45 : vector<8x1xf32>
    %47 = vector.broadcast %46 : vector<8x1xf32> to vector<8x512xf32>
    %48 = arith.mulf %43, %47 : vector<8x512xf32>
    %49 = vector.broadcast %29 : vector<1x512xf32> to vector<8x512xf32>
    %50 = arith.mulf %48, %49 : vector<8x512xf32>
    %51 = vector.broadcast %30 : vector<1x512xf32> to vector<8x512xf32>
    %52 = arith.addf %50, %51 : vector<8x512xf32>
    %c0_37 = arith.constant 0 : index
    %c0_38 = arith.constant 0 : index
    %53 = vector.load %arg11[%c0_37, %c0_38] : memref<8x512xf32, #tpu.memory_space<vmem>>, vector<8x512xf32>
    tpu.vector_store %arg11[%c0_37, %c0_38], %52 {strides = array<i32>} : memref<8x512xf32, #tpu.memory_space<vmem>>, vector<8x512xf32>,
    %cst_39 = arith.constant dense<0.000000e+00> : vector<8xf32>
    %54 = vector.multi_reduction <add>, %28, %cst_39 [1] : vector<8x512xf32> to vector<8xf32>
    %55 = vector.shape_cast %54 : vector<8xf32> to vector<8x1xf32>
    %cst_40 = arith.constant 0.001953125 : f32
    %56 = vector.broadcast %cst_40 : f32 to vector<8x1xf32>
    %57 = arith.mulf %55, %56 : vector<8x1xf32>
    %58 = arith.mulf %28, %28 : vector<8x512xf32>
    %cst_41 = arith.constant dense<0.000000e+00> : vector<8xf32>
    %59 = vector.multi_reduction <add>, %58, %cst_41 [1] : vector<8x512xf32> to vector<8xf32>
    %60 = vector.shape_cast %59 : vector<8xf32> to vector<8x1xf32>
    %cst_42 = arith.constant 0.001953125 : f32
    %61 = vector.broadcast %cst_42 : f32 to vector<8x1xf32>
    %62 = arith.mulf %60, %61 : vector<8x1xf32>
    %63 = arith.mulf %57, %57 : vector<8x1xf32>
    %64 = arith.subf %62, %63 : vector<8x1xf32>
    %65 = vector.broadcast %57 : vector<8x1xf32> to vector<8x512xf32>
    %66 = arith.subf %28, %65 : vector<8x512xf32>
    %cst_43 = arith.constant 9.99999974E-6 : f32
    %67 = vector.broadcast %cst_43 : f32 to vector<8x1xf32>
    %68 = arith.addf %64, %67 : vector<8x1xf32>
    %69 = math.rsqrt %68 : vector<8x1xf32>
    %70 = vector.broadcast %69 : vector<8x1xf32> to vector<8x512xf32>
    %71 = arith.mulf %66, %70 : vector<8x512xf32>
    %72 = vector.broadcast %29 : vector<1x512xf32> to vector<8x512xf32>
    %73 = arith.mulf %71, %72 : vector<8x512xf32>
    %74 = vector.broadcast %30 : vector<1x512xf32> to vector<8x512xf32>
    %75 = arith.addf %73, %74 : vector<8x512xf32>
    %c0_44 = arith.constant 0 : index
    %c0_45 = arith.constant 0 : index
    %76 = vector.load %arg12[%c0_44, %c0_45] : memref<8x512xf32, #tpu.memory_space<vmem>>, vector<8x512xf32>
    tpu.vector_store %arg12[%c0_44, %c0_45], %75 {strides = array<i32>} : memref<8x512xf32, #tpu.memory_space<vmem>>, vector<8x512xf32>,
    return
  }
  func.func @transform_0(%arg0: i32) -> (i32, i32) {
    %c0_i32 = arith.constant 0 : i32
    %c0_i32_0 = arith.constant 0 : i32
    return %arg0, %c0_i32 : i32, i32
  }
  func.func @transform_1(%arg0: i32) -> (i32, i32) {
    %c0_i32 = arith.constant 0 : i32
    %c0_i32_0 = arith.constant 0 : i32
    return %arg0, %c0_i32 : i32, i32
  }
  func.func @transform_2(%arg0: i32) -> (i32, i32) {
    %c0_i32 = arith.constant 0 : i32
    %c0_i32_0 = arith.constant 0 : i32
    return %arg0, %c0_i32 : i32, i32
  }
  func.func @transform_3(%arg0: i32) -> (i32, i32) {
    %c0_i32 = arith.constant 0 : i32
    %c0_i32_0 = arith.constant 0 : i32
    return %arg0, %c0_i32 : i32, i32
  }
  func.func @transform_4(%arg0: i32) -> (i32, i32) {
    %c0_i32 = arith.constant 0 : i32
    %c0_i32_0 = arith.constant 0 : i32
    %c0_i32_1 = arith.constant 0 : i32
    return %c0_i32, %c0_i32_0 : i32, i32
  }
  func.func @transform_5(%arg0: i32) -> (i32, i32) {
    %c0_i32 = arith.constant 0 : i32
    %c0_i32_0 = arith.constant 0 : i32
    %c0_i32_1 = arith.constant 0 : i32
    return %c0_i32, %c0_i32_0 : i32, i32
  }
  func.func @transform_6(%arg0: i32) -> (i32, i32) {
    %c0_i32 = arith.constant 0 : i32
    %c0_i32_0 = arith.constant 0 : i32
    %c0_i32_1 = arith.constant 0 : i32
    return %c0_i32, %c0_i32_0 : i32, i32
  }
  func.func @transform_7(%arg0: i32) -> (i32, i32) {
    %c0_i32 = arith.constant 0 : i32
    %c0_i32_0 = arith.constant 0 : i32
    %c0_i32_1 = arith.constant 0 : i32
    return %c0_i32, %c0_i32_0 : i32, i32
  }
  func.func @transform_8(%arg0: i32) -> (i32, i32) {
    %c0_i32 = arith.constant 0 : i32
    %c0_i32_0 = arith.constant 0 : i32
    %c0_i32_1 = arith.constant 0 : i32
    return %c0_i32, %c0_i32_0 : i32, i32
  }
  func.func @transform_9(%arg0: i32) -> (i32, i32) {
    %c0_i32 = arith.constant 0 : i32
    %c0_i32_0 = arith.constant 0 : i32
    %c0_i32_1 = arith.constant 0 : i32
    return %c0_i32, %c0_i32_0 : i32, i32
  }
  func.func @transform_10(%arg0: i32) -> (i32, i32) {
    %c0_i32 = arith.constant 0 : i32
    %c0_i32_0 = arith.constant 0 : i32
    return %arg0, %c0_i32 : i32, i32
  }
  func.func @transform_11(%arg0: i32) -> (i32, i32) {
    %c0_i32 = arith.constant 0 : i32
    %c0_i32_0 = arith.constant 0 : i32
    return %arg0, %c0_i32 : i32, i32
  }
}

</mosaic_0001>

<bundles_post_ra>
// kernel: four_tower_forward.1
= control target key start
LH: loop header
LB: loop body
LE: loop exit
PB: predicated region body
PF: predicated region fallthrough
CT: control target
= control target key end

     0   :  { %17 = vsyncpa [#allocation3], 0  ;;  %s13299_s0 = inlined_call_operand.hbm [shape: bf16[8,768], index: 0, kind: input, shape index: {}]   ;;  %s13300_s1 = inlined_call_operand.hbm [shape: bf16[8,768], index: 1, kind: input, shape index: {}]   ;;  %s13301_s2 = inlined_call_operand.hbm [shape: bf16[8,768], index: 2, kind: input, shape index: {}]   ;;  %s13302_s3 = inlined_call_operand.hbm [shape: bf16[8,512], index: 3, kind: input, shape index: {}]   ;;  %s13303_s4 = inlined_call_operand.hbm [shape: bf16[2816,512], index: 4, kind: input, shape index: {}]   ;;  %s13304_s5 = inlined_call_operand.hbm [shape: bf16[2048,512], index: 5, kind: input, shape index: {}]   ;;  %s13305_s6 = inlined_call_operand.hbm [shape: f32[1,512], index: 6, kind: input, shape index: {}]   ;;  %s13306_s7 = inlined_call_operand.hbm [shape: f32[1,512], index: 7, kind: input, shape index: {}]   ;;  %s13307_s8 = inlined_call_operand.hbm [shape: f32[1,512], index: 8, kind: input, shape index: {}]   ;;  %s13308_s9 = inlined_call_operand.hbm [shape: f32[1,512], index: 9, kind: input, shape index: {}]   ;;  %s13309_s10 = inlined_call_operand.hbm [shape: f32[8,512], index: 10, kind: output, shape index: {0}]   ;;  %s13310_s11 = inlined_call_operand.hbm [shape: f32[8,512], index: 11, kind: output, shape index: {1}]  }
   0x1   :  { %18 = vsyncpa [#allocation6], 0 }
   0x2   :  { %19 = vsyncpa [#allocation9], 0 }
   0x3   :  { %20 = vsyncpa [#allocation12], 0 }
   0x4   :  { %21 = vsyncpa [#allocation15], 0 }
   0x5   :  { %22 = vsyncpa [#allocation18], 0 }
   0x6   :  { %23 = vsyncpa [#allocation4], 0 }
   0x7   :  { %24 = vsyncpa [#allocation21], 0  ;;  %s12705_s17 = smov [#allocation5]   ;;  %s12706_s19 = smov [#allocation8]  }
   0x8   :  { %s41_s18 = sshll.u32 %s12705_s17, 4  ;;  %s61_s20 = sshll.u32 %s12706_s19, 4  ;;  %s42_s18 = int_to_ptr.vmem [resolvable:$true] %s41_s18  ;;  %s62_s20 = int_to_ptr.vmem [resolvable:$true] %s61_s20 }
   0x9   :  { %s12425_s23 = scalar_lea.hbm %s13300_s1, 384 }
   0xa   :  { %p12426_p0 = scmp.ne.s32.totalorder %s13300_s1, %s12425_s23  ;;  %p12429_p1 = scmp.lt.u32.totalorder %s12425_s23, %s13300_s1 }
   0xc   :  { %p12431_p2 = pnand %p12429_p1, %p12426_p0 }
   0xe   :  { %12434 = shalt.err (!%p12431_p2)
}
   0xf   :  { %s12435_s28 = scalar_lea.vmem %s42_s18, 384  ;;  %p12440_p4 = scmp.lt.s32.totalorder %s42_s18, %s42_s18 }
  0x10   :  { %p12436_p3 = scmp.ne.s32.totalorder %s42_s18, %s12435_s28  ;;  %p12441_p5 = scmp.lt.s32.totalorder %s12435_s28, %s12435_s28 }
  0x12   :  { %p12442_p6 = por %p12441_p5, %p12440_p4 }
  0x14   :  { %p12443_p7 = pnand %p12442_p6, %p12436_p3 }
  0x16   :  { %12446 = shalt.err (!%p12443_p7)
}
  0x17   :  { %44 = dma.hbm_to_vmem [thread:$0]  %s13300_s1, 384, %s42_s18, [#allocation6]  }
  0x18   :  { %s12447_s14 = scalar_lea.hbm %s13302_s3, 256 }
  0x19   :  { %p12448_p8 = scmp.ne.s32.totalorder %s13302_s3, %s12447_s14  ;;  %p12451_p9 = scmp.lt.u32.totalorder %s12447_s14, %s13302_s3 }
  0x1b   :  { %p12453_p10 = pnand %p12451_p9, %p12448_p8 }
  0x1d   :  { %12456 = shalt.err (!%p12453_p10)
}
  0x1e   :  { %s12457_s21 = scalar_lea.vmem %s62_s20, 256  ;;  %p12462_p12 = scmp.lt.s32.totalorder %s62_s20, %s62_s20 }
  0x1f   :  { %p12458_p11 = scmp.ne.s32.totalorder %s62_s20, %s12457_s21  ;;  %p12463_p13 = scmp.lt.s32.totalorder %s12457_s21, %s12457_s21 }
  0x21   :  { %p12464_p0 = por %p12463_p13, %p12462_p12 }
  0x23   :  { %p12465_p1 = pnand %p12464_p0, %p12458_p11 }
  0x25   :  { %12468 = shalt.err (!%p12465_p1)
}
  0x26   :  { %64 = dma.hbm_to_vmem [thread:$0]  %s13302_s3, 256, %s62_s20, [#allocation9]  }
  0x27   :  { %s12707_s22 = smov [#allocation11]   ;;  %s12708_s24 = smov [#allocation14]  }
  0x28   :  { %s82_s23 = sshll.u32 %s12707_s22, 4  ;;  %s105_s25 = sshll.u32 %s12708_s24, 4  ;;  %s83_s23 = int_to_ptr.vmem [resolvable:$true] %s82_s23  ;;  %s106_s25 = int_to_ptr.vmem [resolvable:$true] %s105_s25 }
  0x29   :  { %s12469_s28 = scalar_lea.hbm %s13304_s5, 65536 }
  0x2a   :  { %p12470_p2 = scmp.ne.s32.totalorder %s13304_s5, %s12469_s28  ;;  %p12473_p3 = scmp.lt.u32.totalorder %s12469_s28, %s13304_s5 }
  0x2c   :  { %p12475_p4 = pnand %p12473_p3, %p12470_p2 }
  0x2e   :  { %12478 = shalt.err (!%p12475_p4)
}
  0x2f   :  { %s12479_s3 = scalar_lea.vmem %s83_s23, 65536  ;;  %p12484_p6 = scmp.lt.s32.totalorder %s83_s23, %s83_s23 }
  0x30   :  { %p12480_p5 = scmp.ne.s32.totalorder %s83_s23, %s12479_s3  ;;  %p12485_p7 = scmp.lt.s32.totalorder %s12479_s3, %s12479_s3 }
  0x32   :  { %p12486_p8 = por %p12485_p7, %p12484_p6 }
  0x34   :  { %p12487_p9 = pnand %p12486_p8, %p12480_p5 }
  0x36   :  { %12490 = shalt.err (!%p12487_p9)
}
  0x37   :  { %s12709_s20 = smov 256   ;;  %s12710_s14 = smov 16  }
  0x38   :  { %88 = dma.hbm_to_vmem [thread:$0]  %s13304_s5, 65536, %s83_s23, [#allocation12], %s12709_s20, %s12709_s20, %s12710_s14  }
  0x39   :  { %s12491_s21 = scalar_lea.hbm %s13306_s7, 64 }
  0x3a   :  { %p12492_p10 = scmp.ne.s32.totalorder %s13306_s7, %s12491_s21  ;;  %p12495_p11 = scmp.lt.u32.totalorder %s12491_s21, %s13306_s7 }
  0x3c   :  { %p12497_p12 = pnand %p12495_p11, %p12492_p10 }
  0x3e   :  { %12500 = shalt.err (!%p12497_p12)
}
  0x3f   :  { %s12501_s26 = scalar_lea.vmem %s106_s25, 64  ;;  %p12506_p0 = scmp.lt.s32.totalorder %s106_s25, %s106_s25 }
  0x40   :  { %p12502_p13 = scmp.ne.s32.totalorder %s106_s25, %s12501_s26  ;;  %p12507_p1 = scmp.lt.s32.totalorder %s12501_s26, %s12501_s26 }
  0x42   :  { %p12508_p2 = por %p12507_p1, %p12506_p0 }
  0x44   :  { %p12509_p3 = pnand %p12508_p2, %p12502_p13 }
  0x46   :  { %12512 = shalt.err (!%p12509_p3)
}
  0x47   :  { %108 = dma.hbm_to_vmem [thread:$0]  %s13306_s7, 64, %s106_s25, [#allocation15]  }
  0x48   :  { %s12711_s27 = smov [#allocation2]   ;;  %s12712_s29 = smov [#allocation7]  }
  0x49   :  { %s31_s28 = sshll.u32 %s12711_s27, 4  ;;  %s51_s30 = sshll.u32 %s12712_s29, 4  ;;  %s32_s28 = int_to_ptr.vmem [resolvable:$true] %s31_s28  ;;  %s52_s30 = int_to_ptr.vmem [resolvable:$true] %s51_s30 }
  0x4a   :  { %s12513_s3 = scalar_lea.hbm %s13299_s0, 384 }
  0x4b   :  { %p12514_p4 = scmp.ne.s32.totalorder %s13299_s0, %s12513_s3  ;;  %p12517_p5 = scmp.lt.u32.totalorder %s12513_s3, %s13299_s0 }
  0x4d   :  { %p12519_p6 = pnand %p12517_p5, %p12514_p4 }
  0x4f   :  { %12522 = shalt.err (!%p12519_p6)
}
  0x50   :  { %s12523_s7 = scalar_lea.vmem %s32_s28, 384  ;;  %p12528_p8 = scmp.lt.s32.totalorder %s32_s28, %s32_s28 }
  0x51   :  { %p12524_p7 = scmp.ne.s32.totalorder %s32_s28, %s12523_s7  ;;  %p12529_p9 = scmp.lt.s32.totalorder %s12523_s7, %s12523_s7 }
  0x53   :  { %p12530_p10 = por %p12529_p9, %p12528_p8 }
  0x55   :  { %p12531_p11 = pnand %p12530_p10, %p12524_p7 }
  0x57   :  { %12534 = shalt.err (!%p12531_p11)
}
  0x58   :  { %34 = dma.hbm_to_vmem [thread:$0]  %s13299_s0, 384, %s32_s28, [#allocation3]  }
  0x59   :  { %s12535_s22 = scalar_lea.hbm %s13301_s2, 384 }
  0x5a   :  { %p12536_p12 = scmp.ne.s32.totalorder %s13301_s2, %s12535_s22  ;;  %p12539_p13 = scmp.lt.u32.totalorder %s12535_s22, %s13301_s2 }
  0x5c   :  { %p12541_p0 = pnand %p12539_p13, %p12536_p12 }
  0x5e   :  { %12544 = shalt.err (!%p12541_p0)
}
  0x5f   :  { %s12545_s27 = scalar_lea.vmem %s52_s30, 384  ;;  %p12550_p2 = scmp.lt.s32.totalorder %s52_s30, %s52_s30 }
  0x60   :  { %p12546_p1 = scmp.ne.s32.totalorder %s52_s30, %s12545_s27  ;;  %p12551_p3 = scmp.lt.s32.totalorder %s12545_s27, %s12545_s27 }
  0x62   :  { %p12552_p4 = por %p12551_p3, %p12550_p2 }
  0x64   :  { %p12553_p5 = pnand %p12552_p4, %p12546_p1 }
  0x66   :  { %12556 = shalt.err (!%p12553_p5)
}
  0x67   :  { %54 = dma.hbm_to_vmem [thread:$0]  %s13301_s2, 384, %s52_s30, [#allocation6]  }
  0x68   :  { %s12713_s29 = smov [#allocation10]   ;;  %s12714_s13 = smov [#allocation13]  }
  0x69   :  { %s70_s12 = sshll.u32 %s12713_s29, 4  ;;  %s95_s3 = sshll.u32 %s12714_s13, 4  ;;  %s71_s12 = int_to_ptr.vmem [resolvable:$true] %s70_s12  ;;  %s96_s3 = int_to_ptr.vmem [resolvable:$true] %s95_s3 }
  0x6a   :  { %s12557_s17 = scalar_lea.hbm %s13303_s4, 90112 }
  0x6b   :  { %p12558_p6 = scmp.ne.s32.totalorder %s13303_s4, %s12557_s17  ;;  %p12561_p7 = scmp.lt.u32.totalorder %s12557_s17, %s13303_s4 }
  0x6d   :  { %p12563_p8 = pnand %p12561_p7, %p12558_p6 }
  0x6f   :  { %12566 = shalt.err (!%p12563_p8)
}
  0x70   :  { %s12567_s2 = scalar_lea.vmem %s71_s12, 90112  ;;  %p12572_p10 = scmp.lt.s32.totalorder %s71_s12, %s71_s12 }
  0x71   :  { %p12568_p9 = scmp.ne.s32.totalorder %s71_s12, %s12567_s2  ;;  %p12573_p11 = scmp.lt.s32.totalorder %s12567_s2, %s12567_s2 }
  0x73   :  { %p12574_p12 = por %p12573_p11, %p12572_p10 }
  0x75   :  { %p12575_p13 = pnand %p12574_p12, %p12568_p9 }
  0x77   :  { %12578 = shalt.err (!%p12575_p13)
}
  0x78   :  { %76 = dma.hbm_to_vmem [thread:$0]  %s13303_s4, 90112, %s71_s12, [#allocation9], %s12709_s20, %s12709_s20, %s12710_s14  }
  0x79   :  { %s12579_s24 = scalar_lea.hbm %s13305_s6, 64 }
  0x7a   :  { %p12580_p0 = scmp.ne.s32.totalorder %s13305_s6, %s12579_s24  ;;  %p12583_p1 = scmp.lt.u32.totalorder %s12579_s24, %s13305_s6 }
  0x7c   :  { %p12585_p2 = pnand %p12583_p1, %p12580_p0 }
  0x7e   :  { %12588 = shalt.err (!%p12585_p2)
}
  0x7f   :  { %s12589_s0 = scalar_lea.vmem %s96_s3, 64  ;;  %p12594_p4 = scmp.lt.s32.totalorder %s96_s3, %s96_s3 }
  0x80   :  { %p12590_p3 = scmp.ne.s32.totalorder %s96_s3, %s12589_s0  ;;  %p12595_p5 = scmp.lt.s32.totalorder %s12589_s0, %s12589_s0 }
  0x82   :  { %p12596_p6 = por %p12595_p5, %p12594_p4 }
  0x84   :  { %p12597_p7 = pnand %p12596_p6, %p12590_p3 }
  0x86   :  { %12600 = shalt.err (!%p12597_p7)
}
  0x87   :  { %98 = dma.hbm_to_vmem [thread:$0]  %s13305_s6, 64, %s96_s3, [#allocation12]  }
  0x88   :  { %s12715_s14 = smov [#allocation16]   ;;  %s12716_s29 = smov [#allocation17]  }
  0x89   :  { %s115_s28 = sshll.u32 %s12715_s14, 4  ;;  %s125_s12 = sshll.u32 %s12716_s29, 4  ;;  %s116_s28 = int_to_ptr.vmem [resolvable:$true] %s115_s28  ;;  %s126_s12 = int_to_ptr.vmem [resolvable:$true] %s125_s12 }
  0x8a   :  { %s12601_s16 = scalar_lea.hbm %s13307_s8, 64 }
  0x8b   :  { %p12602_p8 = scmp.ne.s32.totalorder %s13307_s8, %s12601_s16  ;;  %p12605_p9 = scmp.lt.u32.totalorder %s12601_s16, %s13307_s8 }
  0x8d   :  { %p12607_p10 = pnand %p12605_p9, %p12602_p8 }
  0x8f   :  { %12610 = shalt.err (!%p12607_p10)
}
  0x90   :  { %s12611_s6 = scalar_lea.vmem %s116_s28, 64  ;;  %p12616_p12 = scmp.lt.s32.totalorder %s116_s28, %s116_s28 }
  0x91   :  { %p12612_p11 = scmp.ne.s32.totalorder %s116_s28, %s12611_s6  ;;  %p12617_p13 = scmp.lt.s32.totalorder %s12611_s6, %s12611_s6 }
  0x93   :  { %p12618_p0 = por %p12617_p13, %p12616_p12 }
  0x95   :  { %p12619_p1 = pnand %p12618_p0, %p12612_p11 }
  0x97   :  { %12622 = shalt.err (!%p12619_p1)
}
  0x98   :  { %118 = dma.hbm_to_vmem [thread:$0]  %s13307_s8, 64, %s116_s28, [#allocation15]  }
  0x99   :  { %s12623_s1 = scalar_lea.hbm %s13308_s9, 64 }
  0x9a   :  { %p12624_p2 = scmp.ne.s32.totalorder %s13308_s9, %s12623_s1  ;;  %p12627_p3 = scmp.lt.u32.totalorder %s12623_s1, %s13308_s9 }
  0x9c   :  { %p12629_p4 = pnand %p12627_p3, %p12624_p2 }
  0x9e   :  { %12632 = shalt.err (!%p12629_p4)
}
  0x9f   :  { %s12633_s5 = scalar_lea.vmem %s126_s12, 64  ;;  %p12638_p6 = scmp.lt.s32.totalorder %s126_s12, %s126_s12 }
  0xa0   :  { %p12634_p5 = scmp.ne.s32.totalorder %s126_s12, %s12633_s5  ;;  %p12639_p7 = scmp.lt.s32.totalorder %s12633_s5, %s12633_s5 }
  0xa2   :  { %p12640_p8 = por %p12639_p7, %p12638_p6 }
  0xa4   :  { %p12641_p9 = pnand %p12640_p8, %p12634_p5 }
  0xa6   :  { %12644 = shalt.err (!%p12641_p9)
}
  0xa7   :  { %128 = dma.hbm_to_vmem [thread:$0]  %s13308_s9, 64, %s126_s12, [#allocation18]  }
  0xa8   :  { %12689 = dma.done.wait [#allocation3], 384  }
  0xa9   :  { %12690 = vsyncadd [#allocation3], 4294966912 }
  0xaa   :  { %12691 = dma.done.wait [#allocation6], 768  }
  0xab   :  { %12692 = vsyncadd [#allocation6], 4294966528 }
  0xac   :  { %12693 = dma.done.wait [#allocation9], 90368  }
  0xad   :  { %12694 = vsyncadd [#allocation9], 4294876928 }
  0xae   :  { %12695 = dma.done.wait [#allocation12], 65600  }
  0xaf   :  { %12696 = vsyncadd [#allocation12], 4294901696 }
  0xb0   :  { %12697 = dma.done.wait [#allocation15], 128  }
  0xb1   :  { %12698 = vsyncadd [#allocation15], 4294967168 }
  0xb2   :  { %12699 = dma.done.wait [#allocation18], 64  }
  0xb3   :  { %12700 = vsyncadd [#allocation18], 4294967232  ;;  %v10575_v0 = vld [vmem:[#allocation10 + $0x604] ss:$16 sps:$4 sm:$0xff]   ;;  %v10579_v2 = vld [vmem:[#allocation10 + $0x600] ss:$16 sps:$4 sm:$0xff]  }
  0xb4   :  { %v10577_v1 = vld [vmem:[#allocation10 + $0x804] ss:$16 sps:$4 sm:$0xff]   ;;  %1535 = vmatprep.subr.bf16.mxu0 %v10575_v0  ;;  %v10580_v3 = vld [vmem:[#allocation10 + $0x800] ss:$16 sps:$4 sm:$0xff]   ;;  %v163_v48 = vld [vmem:[#allocation5 + $0x8] sm:$0xff]  ;;  %s12717_s9 = smov [#allocation19]  }
  0xb5   :  { %1576 = vmatprep.subr.bf16.mxu1 %v10577_v1  ;;  %v10581_v4 = vld [vmem:[#allocation10 + $0x624] ss:$16 sps:$4 sm:$0xff]   ;;  %1536 = vmatpush1.bf16.msra.mxu0 %v10579_v2  ;;  %v10585_v6 = vld [vmem:[#allocation10 + $0x620] ss:$16 sps:$4 sm:$0xff]   ;;  %v12907_v51 = vcombine.high %v163_v48, %v163_v48  ;;  %s9295_s27 = sshll.u32 %s12717_s9, 4  ;;  %s9296_s27 = int_to_ptr.vmem [resolvable:$true] %s9295_s27 }
  0xb6   :  { %1577 = vmatpush1.bf16.msra.mxu1 %v10580_v3  ;;  %v10583_v5 = vld [vmem:[#allocation10 + $0x824] ss:$16 sps:$4 sm:$0xff]   ;;  %1537 = vmatprep.subr.bf16.mxu0 %v10581_v4  ;;  %v10586_v7 = vld [vmem:[#allocation10 + $0x820] ss:$16 sps:$4 sm:$0xff]   ;;  %s12645_s0 = scalar_lea.vmem %s9296_s27, 512  ;;  %p12650_p11 = scmp.lt.s32.totalorder %s9296_s27, %s9296_s27 }
  0xb7   :  { %1578 = vmatprep.subr.bf16.mxu1 %v10583_v5  ;;  %v10587_v8 = vld [vmem:[#allocation10 + $0x644] ss:$16 sps:$4 sm:$0xff]   ;;  %v10591_v10 = vld [vmem:[#allocation10 + $0x640] ss:$16 sps:$4 sm:$0xff]   ;;  %1608 = vmatprep.mubr.bf16.mxu1 %v12907_v51  ;;  %v10680_v5 = vld [vmem:[#allocation10 + $0x60c] ss:$16 sps:$4 sm:$0xff]   ;;  %p12646_p10 = scmp.ne.s32.totalorder %s9296_s27, %s12645_s0  ;;  %p12651_p12 = scmp.lt.s32.totalorder %s12645_s0, %s12645_s0 }
  0xb8   :  { %v10589_v9 = vld [vmem:[#allocation10 + $0x844] ss:$16 sps:$4 sm:$0xff]   ;;  %v10592_v11 = vld [vmem:[#allocation10 + $0x840] ss:$16 sps:$4 sm:$0xff]  }
  0xb9   :  { %1538 = vmatpush1.bf16.msra.mxu0 %v10585_v6  ;;  %v10593_v12 = vld [vmem:[#allocation10 + $0x664] ss:$16 sps:$4 sm:$0xff]   ;;  %v10597_v14 = vld [vmem:[#allocation10 + $0x660] ss:$16 sps:$4 sm:$0xff]   ;;  %p12652_p13 = por %p12651_p12, %p12650_p11 }
  0xba   :  { %1579 = vmatpush1.bf16.msra.mxu1 %v10586_v7  ;;  %1539 = vmatprep.subr.bf16.mxu0 %v10587_v8  ;;  %v10595_v13 = vld [vmem:[#allocation10 + $0x864] ss:$16 sps:$4 sm:$0xff]   ;;  %v10598_v15 = vld [vmem:[#allocation10 + $0x860] ss:$16 sps:$4 sm:$0xff]   ;;  %v12913_v7 = vcombine.low %v163_v48, %v163_v48  ;;  %v10732_v48 = vld [vmem:[#allocation10 + $0x728] ss:$16 sps:$4 sm:$0xff]  }
  0xbb   :  { %1580 = vmatprep.subr.bf16.mxu1 %v10589_v9  ;;  %v10599_v16 = vld [vmem:[#allocation10 + $0x684] ss:$16 sps:$4 sm:$0xff]   ;;  %v10603_v18 = vld [vmem:[#allocation10 + $0x680] ss:$16 sps:$4 sm:$0xff]   ;;  %v10678_v9 = vld [vmem:[#allocation10 + $0x608] ss:$16 sps:$4 sm:$0xff]   ;;  %p12653_p0 = pnand %p12652_p13, %p12646_p10 }
  0xbc   :  { %v10601_v17 = vld [vmem:[#allocation10 + $0x884] ss:$16 sps:$4 sm:$0xff]   ;;  %v10604_v19 = vld [vmem:[#allocation10 + $0x880] ss:$16 sps:$4 sm:$0xff]  }
  0xbd   :  { %1540 = vmatpush1.bf16.msra.mxu0 %v10591_v10  ;;  %v10605_v20 = vld [vmem:[#allocation10 + $0x6a4] ss:$16 sps:$4 sm:$0xff]   ;;  %v10609_v22 = vld [vmem:[#allocation10 + $0x6a0] ss:$16 sps:$4 sm:$0xff]  }
  0xbe   :  { %1581 = vmatpush1.bf16.msra.mxu1 %v10592_v11  ;;  %1541 = vmatprep.subr.bf16.mxu0 %v10593_v12  ;;  %v10607_v21 = vld [vmem:[#allocation10 + $0x8a4] ss:$16 sps:$4 sm:$0xff]   ;;  %v10610_v23 = vld [vmem:[#allocation10 + $0x8a0] ss:$16 sps:$4 sm:$0xff]   ;;  %v10686_v11 = vld [vmem:[#allocation10 + $0x62c] ss:$16 sps:$4 sm:$0xff]  }
  0xbf   :  { %1582 = vmatprep.subr.bf16.mxu1 %v10595_v13  ;;  %v10611_v24 = vld [vmem:[#allocation10 + $0x6c4] ss:$16 sps:$4 sm:$0xff]   ;;  %v10615_v26 = vld [vmem:[#allocation10 + $0x6c0] ss:$16 sps:$4 sm:$0xff]   ;;  %v10684_v13 = vld [vmem:[#allocation10 + $0x628] ss:$16 sps:$4 sm:$0xff]  }
  0xc0   :  { %v10613_v25 = vld [vmem:[#allocation10 + $0x8c4] ss:$16 sps:$4 sm:$0xff]   ;;  %v10616_v27 = vld [vmem:[#allocation10 + $0x8c0] ss:$16 sps:$4 sm:$0xff]  }
  0xc1   :  { %1542 = vmatpush1.bf16.msra.mxu0 %v10597_v14  ;;  %v10617_v28 = vld [vmem:[#allocation10 + $0x6e4] ss:$16 sps:$4 sm:$0xff]   ;;  %v10621_v30 = vld [vmem:[#allocation10 + $0x6e0] ss:$16 sps:$4 sm:$0xff]  }
  0xc2   :  { %1583 = vmatpush1.bf16.msra.mxu1 %v10598_v15  ;;  %1543 = vmatprep.subr.bf16.mxu0 %v10599_v16  ;;  %v10619_v29 = vld [vmem:[#allocation10 + $0x8e4] ss:$16 sps:$4 sm:$0xff]   ;;  %v10622_v31 = vld [vmem:[#allocation10 + $0x8e0] ss:$16 sps:$4 sm:$0xff]   ;;  %v10692_v15 = vld [vmem:[#allocation10 + $0x64c] ss:$16 sps:$4 sm:$0xff]  }
  0xc3   :  { %1584 = vmatprep.subr.bf16.mxu1 %v10601_v17  ;;  %v10623_v32 = vld [vmem:[#allocation10 + $0x704] ss:$16 sps:$4 sm:$0xff]   ;;  %v10627_v34 = vld [vmem:[#allocation10 + $0x700] ss:$16 sps:$4 sm:$0xff]   ;;  %v10690_v17 = vld [vmem:[#allocation10 + $0x648] ss:$16 sps:$4 sm:$0xff]  }
  0xc4   :  { %v10625_v33 = vld [vmem:[#allocation10 + $0x904] ss:$16 sps:$4 sm:$0xff]   ;;  %v10628_v35 = vld [vmem:[#allocation10 + $0x900] ss:$16 sps:$4 sm:$0xff]  }
  0xc5   :  { %1544 = vmatpush1.bf16.msra.mxu0 %v10603_v18  ;;  %v10629_v36 = vld [vmem:[#allocation10 + $0x724] ss:$16 sps:$4 sm:$0xff]   ;;  %v10633_v38 = vld [vmem:[#allocation10 + $0x720] ss:$16 sps:$4 sm:$0xff]  }
  0xc6   :  { %1585 = vmatpush1.bf16.msra.mxu1 %v10604_v19  ;;  %1545 = vmatprep.subr.bf16.mxu0 %v10605_v20  ;;  %v10631_v37 = vld [vmem:[#allocation10 + $0x924] ss:$16 sps:$4 sm:$0xff]   ;;  %v10634_v39 = vld [vmem:[#allocation10 + $0x920] ss:$16 sps:$4 sm:$0xff]   ;;  %v10698_v19 = vld [vmem:[#allocation10 + $0x66c] ss:$16 sps:$4 sm:$0xff]  }
  0xc7   :  { %1586 = vmatprep.subr.bf16.mxu1 %v10607_v21  ;;  %v10635_v40 = vld [vmem:[#allocation10 + $0x744] ss:$16 sps:$4 sm:$0xff]   ;;  %v10639_v42 = vld [vmem:[#allocation10 + $0x740] ss:$16 sps:$4 sm:$0xff]   ;;  %v10696_v21 = vld [vmem:[#allocation10 + $0x668] ss:$16 sps:$4 sm:$0xff]  }
  0xc8   :  { %v10637_v41 = vld [vmem:[#allocation10 + $0x944] ss:$16 sps:$4 sm:$0xff]   ;;  %v10640_v43 = vld [vmem:[#allocation10 + $0x940] ss:$16 sps:$4 sm:$0xff]  }
  0xc9   :  { %1546 = vmatpush1.bf16.msra.mxu0 %v10609_v22  ;;  %v10641_v44 = vld [vmem:[#allocation10 + $0x764] ss:$16 sps:$4 sm:$0xff]   ;;  %v10645_v49 = vld [vmem:[#allocation10 + $0x760] ss:$16 sps:$4 sm:$0xff]  }
  0xca   :  { %1587 = vmatpush1.bf16.msra.mxu1 %v10610_v23  ;;  %1547 = vmatprep.subr.bf16.mxu0 %v10611_v24  ;;  %v10643_v45 = vld [vmem:[#allocation10 + $0x964] ss:$16 sps:$4 sm:$0xff]   ;;  %v10646_v50 = vld [vmem:[#allocation10 + $0x960] ss:$16 sps:$4 sm:$0xff]   ;;  %v10704_v23 = vld [vmem:[#allocation10 + $0x68c] ss:$16 sps:$4 sm:$0xff]  }
  0xcb   :  { %1588 = vmatprep.subr.bf16.mxu1 %v10613_v25  ;;  %v162_v46 = vld [vmem:[#allocation5] sm:$0xff]  ;;  %v10702_v25 = vld [vmem:[#allocation10 + $0x688] ss:$16 sps:$4 sm:$0xff]  }
  0xcc   :  { %v12905_v47 = vcombine.high %v162_v46, %v162_v46  ;;  %v10647_v52 = vld [vmem:[#allocation10 + $0x784] ss:$16 sps:$4 sm:$0xff]   ;;  %v10651_v54 = vld [vmem:[#allocation10 + $0x780] ss:$16 sps:$4 sm:$0xff]   ;;  %v12911_v6 = vcombine.low %v162_v46, %v162_v46 }
  0xcd   :  { %1548 = vmatpush1.bf16.msra.mxu0 %v10615_v26  ;;  %v10649_v53 = vld [vmem:[#allocation10 + $0x984] ss:$16 sps:$4 sm:$0xff]   ;;  %v10652_v55 = vld [vmem:[#allocation10 + $0x980] ss:$16 sps:$4 sm:$0xff]  }
  0xce   :  { %1589 = vmatpush1.bf16.msra.mxu1 %v10616_v27  ;;  %1549 = vmatprep.subr.bf16.mxu0 %v10617_v28  ;;  %v10653_v56 = vld [vmem:[#allocation10 + $0x7a4] ss:$16 sps:$4 sm:$0xff]   ;;  %v10657_v58 = vld [vmem:[#allocation10 + $0x7a0] ss:$16 sps:$4 sm:$0xff]   ;;  %v10710_v27 = vld [vmem:[#allocation10 + $0x6ac] ss:$16 sps:$4 sm:$0xff]  }
  0xcf   :  { %1590 = vmatprep.subr.bf16.mxu1 %v10619_v29  ;;  %1567 = vmatprep.mubr.bf16.mxu0 %v12905_v47  ;;  %v10655_v57 = vld [vmem:[#allocation10 + $0x9a4] ss:$16 sps:$4 sm:$0xff]   ;;  %v10658_v59 = vld [vmem:[#allocation10 + $0x9a0] ss:$16 sps:$4 sm:$0xff]   ;;  %v10708_v29 = vld [vmem:[#allocation10 + $0x6a8] ss:$16 sps:$4 sm:$0xff]  }
  0xd0   :  { %v10659_v60 = vld [vmem:[#allocation10 + $0x7c4] ss:$16 sps:$4 sm:$0xff]   ;;  %v10663_v62 = vld [vmem:[#allocation10 + $0x7c0] ss:$16 sps:$4 sm:$0xff]  }
  0xd1   :  { %1550 = vmatpush1.bf16.msra.mxu0 %v10621_v30  ;;  %v10661_v61 = vld [vmem:[#allocation10 + $0x9c4] ss:$16 sps:$4 sm:$0xff]   ;;  %v10664_v63 = vld [vmem:[#allocation10 + $0x9c0] ss:$16 sps:$4 sm:$0xff]  }
  0xd2   :  { %1591 = vmatpush1.bf16.msra.mxu1 %v10622_v31  ;;  %1551 = vmatprep.subr.bf16.mxu0 %v10623_v32  ;;  %v10665_v0 = vld [vmem:[#allocation10 + $0x7e4] ss:$16 sps:$4 sm:$0xff]   ;;  %v10669_v2 = vld [vmem:[#allocation10 + $0x7e0] ss:$16 sps:$4 sm:$0xff]   ;;  %v10716_v31 = vld [vmem:[#allocation10 + $0x6cc] ss:$16 sps:$4 sm:$0xff]  }
  0xd3   :  { %1592 = vmatprep.subr.bf16.mxu1 %v10625_v33  ;;  %v10667_v1 = vld [vmem:[#allocation10 + $0x9e4] ss:$16 sps:$4 sm:$0xff]   ;;  %v10670_v3 = vld [vmem:[#allocation10 + $0x9e0] ss:$16 sps:$4 sm:$0xff]  }
  0xd4   :  { %v10677_v4 = vld [vmem:[#allocation10 + $0xa04] ss:$16 sps:$4 sm:$0xff]   ;;  %v10675_v8 = vld [vmem:[#allocation10 + $0xa00] ss:$16 sps:$4 sm:$0xff]  }
  0xd5   :  { %1552 = vmatpush1.bf16.msra.mxu0 %v10627_v34  ;;  %v10683_v10 = vld [vmem:[#allocation10 + $0xa24] ss:$16 sps:$4 sm:$0xff]   ;;  %v10681_v12 = vld [vmem:[#allocation10 + $0xa20] ss:$16 sps:$4 sm:$0xff]  }
  0xd6   :  { %1593 = vmatpush1.bf16.msra.mxu1 %v10628_v35  ;;  %1553 = vmatprep.subr.bf16.mxu0 %v10629_v36  ;;  %v10689_v14 = vld [vmem:[#allocation10 + $0xa44] ss:$16 sps:$4 sm:$0xff]   ;;  %v10687_v16 = vld [vmem:[#allocation10 + $0xa40] ss:$16 sps:$4 sm:$0xff]   ;;  %v10714_v35 = vld [vmem:[#allocation10 + $0x6c8] ss:$16 sps:$4 sm:$0xff]  }
  0xd7   :  { %1594 = vmatprep.subr.bf16.mxu1 %v10631_v37  ;;  %v10695_v18 = vld [vmem:[#allocation10 + $0xa64] ss:$16 sps:$4 sm:$0xff]   ;;  %v10693_v20 = vld [vmem:[#allocation10 + $0xa60] ss:$16 sps:$4 sm:$0xff]   ;;  %v10722_v37 = vld [vmem:[#allocation10 + $0x6ec] ss:$16 sps:$4 sm:$0xff]  }
  0xd8   :  { %v10701_v22 = vld [vmem:[#allocation10 + $0xa84] ss:$16 sps:$4 sm:$0xff]   ;;  %v10699_v24 = vld [vmem:[#allocation10 + $0xa80] ss:$16 sps:$4 sm:$0xff]  }
  0xd9   :  { %1554 = vmatpush1.bf16.msra.mxu0 %v10633_v38  ;;  %v10707_v26 = vld [vmem:[#allocation10 + $0xaa4] ss:$16 sps:$4 sm:$0xff]   ;;  %v10705_v28 = vld [vmem:[#allocation10 + $0xaa0] ss:$16 sps:$4 sm:$0xff]  }
  0xda   :  { %1595 = vmatpush1.bf16.msra.mxu1 %v10634_v39  ;;  %1555 = vmatprep.subr.bf16.mxu0 %v10635_v40  ;;  %v10713_v30 = vld [vmem:[#allocation10 + $0xac4] ss:$16 sps:$4 sm:$0xff]   ;;  %v10711_v33 = vld [vmem:[#allocation10 + $0xac0] ss:$16 sps:$4 sm:$0xff]   ;;  %v10720_v39 = vld [vmem:[#allocation10 + $0x6e8] ss:$16 sps:$4 sm:$0xff]  }
  0xdb   :  { %1596 = vmatprep.subr.bf16.mxu1 %v10637_v41  ;;  %v12918_v32 = vld [vmem:[#allocation5 + $0x10] sm:$0xff]  ;;  %v10728_v41 = vld [vmem:[#allocation10 + $0x70c] ss:$16 sps:$4 sm:$0xff]  }
  0xdc   :  { %v12922_v34 = vcombine.high %v12918_v32, %v12918_v32  ;;  %v10719_v36 = vld [vmem:[#allocation10 + $0xae4] ss:$16 sps:$4 sm:$0xff]   ;;  %v10717_v38 = vld [vmem:[#allocation10 + $0xae0] ss:$16 sps:$4 sm:$0xff]  }
  0xdd   :  { %1556 = vmatpush1.bf16.msra.mxu0 %v10639_v42  ;;  %v10725_v40 = vld [vmem:[#allocation10 + $0xb04] ss:$16 sps:$4 sm:$0xff]   ;;  %v10723_v42 = vld [vmem:[#allocation10 + $0xb00] ss:$16 sps:$4 sm:$0xff]  }
  0xde   :  { %1597 = vmatpush1.bf16.msra.mxu1 %v10640_v43  ;;  %1557 = vmatprep.subr.bf16.mxu0 %v10641_v44  ;;  %v10726_v43 = vld [vmem:[#allocation10 + $0x708] ss:$16 sps:$4 sm:$0xff]   ;;  %v10731_v44 = vld [vmem:[#allocation10 + $0xb24] ss:$16 sps:$4 sm:$0xff]   ;;  %v10729_v46 = vld [vmem:[#allocation10 + $0xb20] ss:$16 sps:$4 sm:$0xff]  }
  0xdf   :  { %1598 = vmatprep.subr.bf16.mxu1 %v10643_v45  ;;  %v10734_v45 = vld [vmem:[#allocation10 + $0x72c] ss:$16 sps:$4 sm:$0xff]  }
  0xe1   :  { %1558 = vmatpush1.bf16.msra.mxu0 %v10645_v49  ;;  %v10737_v49 = vld [vmem:[#allocation10 + $0xb44] ss:$16 sps:$4 sm:$0xff]  }
  0xe2   :  { %1599 = vmatpush1.bf16.msra.mxu1 %v10646_v50  ;;  %1559 = vmatprep.subr.bf16.mxu0 %v10647_v52  ;;  %v10740_v50 = vld [vmem:[#allocation10 + $0x74c] ss:$16 sps:$4 sm:$0xff]   ;;  %v10735_v52 = vld [vmem:[#allocation10 + $0xb40] ss:$16 sps:$4 sm:$0xff]  }
  0xe3   :  { %1600 = vmatprep.subr.bf16.mxu1 %v10649_v53  ;;  %v10738_v53 = vld [vmem:[#allocation10 + $0x748] ss:$16 sps:$4 sm:$0xff]  }
  0xe5   :  { %1560 = vmatpush1.bf16.msra.mxu0 %v10651_v54  ;;  %v10743_v54 = vld [vmem:[#allocation10 + $0xb64] ss:$16 sps:$4 sm:$0xff]  }
  0xe6   :  { %1601 = vmatpush1.bf16.msra.mxu1 %v10652_v55  ;;  %1561 = vmatprep.subr.bf16.mxu0 %v10653_v56  ;;  %v10746_v55 = vld [vmem:[#allocation10 + $0x76c] ss:$16 sps:$4 sm:$0xff]   ;;  %v10741_v56 = vld [vmem:[#allocation10 + $0xb60] ss:$16 sps:$4 sm:$0xff]  }
  0xe7   :  { %1602 = vmatprep.subr.bf16.mxu1 %v10655_v57  ;;  %v10744_v57 = vld [vmem:[#allocation10 + $0x768] ss:$16 sps:$4 sm:$0xff]  }
  0xe9   :  { %1562 = vmatpush1.bf16.msra.mxu0 %v10657_v58  ;;  %v10749_v58 = vld [vmem:[#allocation10 + $0xb84] ss:$16 sps:$4 sm:$0xff]  }
  0xea   :  { %1603 = vmatpush1.bf16.msra.mxu1 %v10658_v59  ;;  %1563 = vmatprep.subr.bf16.mxu0 %v10659_v60  ;;  %v10752_v59 = vld [vmem:[#allocation10 + $0x78c] ss:$16 sps:$4 sm:$0xff]   ;;  %v10747_v60 = vld [vmem:[#allocation10 + $0xb80] ss:$16 sps:$4 sm:$0xff]  }
  0xeb   :  { %1604 = vmatprep.subr.bf16.mxu1 %v10661_v61  ;;  %v10750_v61 = vld [vmem:[#allocation10 + $0x788] ss:$16 sps:$4 sm:$0xff]  }
  0xed   :  { %1564 = vmatpush1.bf16.msra.mxu0 %v10663_v62  ;;  %v10755_v62 = vld [vmem:[#allocation10 + $0xba4] ss:$16 sps:$4 sm:$0xff]  }
  0xee   :  { %1605 = vmatpush1.bf16.msra.mxu1 %v10664_v63  ;;  %1565 = vmatprep.subr.bf16.mxu0 %v10665_v0  ;;  %v10758_v63 = vld [vmem:[#allocation10 + $0x7ac] ss:$16 sps:$4 sm:$0xff]   ;;  %v10753_v0 = vld [vmem:[#allocation10 + $0xba0] ss:$16 sps:$4 sm:$0xff]  }
  0xef   :  { %1606 = vmatprep.subr.bf16.mxu1 %v10667_v1  ;;  %v10756_v1 = vld [vmem:[#allocation10 + $0x7a8] ss:$16 sps:$4 sm:$0xff]  }
  0xf1   :  { %1566 = vmatpush1.bf16.msra.mxu0 %v10669_v2  ;;  %v10761_v2 = vld [vmem:[#allocation10 + $0xbc4] ss:$16 sps:$4 sm:$0xff]  }
  0xf2   :  { %1607 = vmatpush1.bf16.msra.mxu1 %v10670_v3  ;;  %1617 = vmatprep.subr.bf16.mxu0 %v10677_v4  ;;  %v10764_v3 = vld [vmem:[#allocation10 + $0x7cc] ss:$16 sps:$4 sm:$0xff]   ;;  %v10759_v4 = vld [vmem:[#allocation10 + $0xbc0] ss:$16 sps:$4 sm:$0xff]  }
  0xf3   :  { %1658 = vmatprep.subr.bf16.mxu1 %v10680_v5  ;;  %v10762_v5 = vld [vmem:[#allocation10 + $0x7c8] ss:$16 sps:$4 sm:$0xff]  }
  0xf4   :  { %1568 = vmatmul.mubr.bf16.vlgmr.msra.gmra.mrb[0].mxu0 %v12911_v6 }
  0xf5   :  { %1609 = vmatmul.mubr.bf16.vlgmr.msra.gmra.mrb[0].mxu1 %v12913_v7  ;;  %1618 = vmatpush1.bf16.msra.mxu0 %v10675_v8  ;;  %v10767_v8 = vld [vmem:[#allocation10 + $0xbe4] ss:$16 sps:$4 sm:$0xff]  }
  0xf6   :  { %1659 = vmatpush1.bf16.msra.mxu1 %v10678_v9  ;;  %1619 = vmatprep.subr.bf16.mxu0 %v10683_v10  ;;  %v10770_v9 = vld [vmem:[#allocation10 + $0x7ec] ss:$16 sps:$4 sm:$0xff]   ;;  %v10765_v10 = vld [vmem:[#allocation10 + $0xbe0] ss:$16 sps:$4 sm:$0xff]  }
  0xf7   :  { %1660 = vmatprep.subr.bf16.mxu1 %v10686_v11  ;;  %1690 = vmatprep.mubr.bf16.mxu1 %v12905_v47  ;;  %v10768_v11 = vld [vmem:[#allocation10 + $0x7e8] ss:$16 sps:$4 sm:$0xff]  }
  0xf8   :  { %1649 = vmatprep.mubr.bf16.mxu0 %v12922_v34 }
  0xf9   :  { %1620 = vmatpush1.bf16.msra.mxu0 %v10681_v12  ;;  %v10775_v12 = vld [vmem:[#allocation10 + $0x80c] ss:$16 sps:$4 sm:$0xff]  }
  0xfa   :  { %1661 = vmatpush1.bf16.msra.mxu1 %v10684_v13  ;;  %1621 = vmatprep.subr.bf16.mxu0 %v10689_v14  ;;  %v10778_v13 = vld [vmem:[#allocation10 + $0xa0c] ss:$16 sps:$4 sm:$0xff]   ;;  %v12927_v14 = vcombine.low %v12918_v32, %v12918_v32  ;;  %v10800_v32 = vld [vmem:[#allocation10 + $0xa88] ss:$16 sps:$4 sm:$0xff]  }
  0xfb   :  { %1662 = vmatprep.subr.bf16.mxu1 %v10692_v15  ;;  %v10773_v15 = vld [vmem:[#allocation10 + $0x808] ss:$16 sps:$4 sm:$0xff]  }
  0xfd   :  { %1622 = vmatpush1.bf16.msra.mxu0 %v10687_v16  ;;  %v10776_v16 = vld [vmem:[#allocation10 + $0xa08] ss:$16 sps:$4 sm:$0xff]  }
  0xfe   :  { %1663 = vmatpush1.bf16.msra.mxu1 %v10690_v17  ;;  %1623 = vmatprep.subr.bf16.mxu0 %v10695_v18  ;;  %v10781_v17 = vld [vmem:[#allocation10 + $0x82c] ss:$16 sps:$4 sm:$0xff]  }
  0xff   :  { %1664 = vmatprep.subr.bf16.mxu1 %v10698_v19  ;;  %v10784_v18 = vld [vmem:[#allocation10 + $0xa2c] ss:$16 sps:$4 sm:$0xff]   ;;  %v10779_v19 = vld [vmem:[#allocation10 + $0x828] ss:$16 sps:$4 sm:$0xff]  }
 0x101   :  { %1624 = vmatpush1.bf16.msra.mxu0 %v10693_v20  ;;  %v10782_v20 = vld [vmem:[#allocation10 + $0xa28] ss:$16 sps:$4 sm:$0xff]  }
 0x102   :  { %1665 = vmatpush1.bf16.msra.mxu1 %v10696_v21  ;;  %1625 = vmatprep.subr.bf16.mxu0 %v10701_v22  ;;  %v10787_v21 = vld [vmem:[#allocation10 + $0x84c] ss:$16 sps:$4 sm:$0xff]  }
 0x103   :  { %1666 = vmatprep.subr.bf16.mxu1 %v10704_v23  ;;  %v10790_v22 = vld [vmem:[#allocation10 + $0xa4c] ss:$16 sps:$4 sm:$0xff]   ;;  %v10785_v23 = vld [vmem:[#allocation10 + $0x848] ss:$16 sps:$4 sm:$0xff]  }
 0x105   :  { %1626 = vmatpush1.bf16.msra.mxu0 %v10699_v24  ;;  %v10788_v24 = vld [vmem:[#allocation10 + $0xa48] ss:$16 sps:$4 sm:$0xff]  }
 0x106   :  { %1667 = vmatpush1.bf16.msra.mxu1 %v10702_v25  ;;  %1627 = vmatprep.subr.bf16.mxu0 %v10707_v26  ;;  %v10793_v25 = vld [vmem:[#allocation10 + $0x86c] ss:$16 sps:$4 sm:$0xff]  }
 0x107   :  { %1668 = vmatprep.subr.bf16.mxu1 %v10710_v27  ;;  %v10796_v26 = vld [vmem:[#allocation10 + $0xa6c] ss:$16 sps:$4 sm:$0xff]   ;;  %v10791_v27 = vld [vmem:[#allocation10 + $0x868] ss:$16 sps:$4 sm:$0xff]  }
 0x109   :  { %1628 = vmatpush1.bf16.msra.mxu0 %v10705_v28  ;;  %v10794_v28 = vld [vmem:[#allocation10 + $0xa68] ss:$16 sps:$4 sm:$0xff]  }
 0x10a   :  { %1669 = vmatpush1.bf16.msra.mxu1 %v10708_v29  ;;  %1629 = vmatprep.subr.bf16.mxu0 %v10713_v30  ;;  %v10799_v29 = vld [vmem:[#allocation10 + $0x88c] ss:$16 sps:$4 sm:$0xff]  }
 0x10b   :  { %1670 = vmatprep.subr.bf16.mxu1 %v10716_v31  ;;  %v10802_v30 = vld [vmem:[#allocation10 + $0xa8c] ss:$16 sps:$4 sm:$0xff]   ;;  %v10797_v31 = vld [vmem:[#allocation10 + $0x888] ss:$16 sps:$4 sm:$0xff]  }
 0x10d   :  { %1630 = vmatpush1.bf16.msra.mxu0 %v10711_v33  ;;  %v10805_v33 = vld [vmem:[#allocation10 + $0x8ac] ss:$16 sps:$4 sm:$0xff]  }
 0x10e   :  { %1671 = vmatpush1.bf16.msra.mxu1 %v10714_v35  ;;  %1631 = vmatprep.subr.bf16.mxu0 %v10719_v36  ;;  %v10808_v35 = vld [vmem:[#allocation10 + $0xaac] ss:$16 sps:$4 sm:$0xff]   ;;  %v10803_v36 = vld [vmem:[#allocation10 + $0x8a8] ss:$16 sps:$4 sm:$0xff]  }
 0x10f   :  { %1672 = vmatprep.subr.bf16.mxu1 %v10722_v37  ;;  %v10806_v37 = vld [vmem:[#allocation10 + $0xaa8] ss:$16 sps:$4 sm:$0xff]  }
 0x111   :  { %1632 = vmatpush1.bf16.msra.mxu0 %v10717_v38  ;;  %v10811_v38 = vld [vmem:[#allocation10 + $0x8cc] ss:$16 sps:$4 sm:$0xff]  }
 0x112   :  { %1673 = vmatpush1.bf16.msra.mxu1 %v10720_v39  ;;  %1633 = vmatprep.subr.bf16.mxu0 %v10725_v40  ;;  %v10814_v39 = vld [vmem:[#allocation10 + $0xacc] ss:$16 sps:$4 sm:$0xff]   ;;  %v10809_v40 = vld [vmem:[#allocation10 + $0x8c8] ss:$16 sps:$4 sm:$0xff]  }
 0x113   :  { %1674 = vmatprep.subr.bf16.mxu1 %v10728_v41  ;;  %v10812_v41 = vld [vmem:[#allocation10 + $0xac8] ss:$16 sps:$4 sm:$0xff]  }
 0x115   :  { %1634 = vmatpush1.bf16.msra.mxu0 %v10723_v42  ;;  %v10817_v42 = vld [vmem:[#allocation10 + $0x8ec] ss:$16 sps:$4 sm:$0xff]  }
 0x116   :  { %1675 = vmatpush1.bf16.msra.mxu1 %v10726_v43  ;;  %1635 = vmatprep.subr.bf16.mxu0 %v10731_v44  ;;  %v10820_v43 = vld [vmem:[#allocation10 + $0xaec] ss:$16 sps:$4 sm:$0xff]   ;;  %v10815_v44 = vld [vmem:[#allocation10 + $0x8e8] ss:$16 sps:$4 sm:$0xff]  }
 0x117   :  { %1676 = vmatprep.subr.bf16.mxu1 %v10734_v45  ;;  %v10818_v45 = vld [vmem:[#allocation10 + $0xae8] ss:$16 sps:$4 sm:$0xff]  }
 0x119   :  { %1636 = vmatpush1.bf16.msra.mxu0 %v10729_v46  ;;  %v10823_v46 = vld [vmem:[#allocation10 + $0x90c] ss:$16 sps:$4 sm:$0xff]  }
 0x11a   :  { %1677 = vmatpush1.bf16.msra.mxu1 %v10732_v48  ;;  %1637 = vmatprep.subr.bf16.mxu0 %v10737_v49  ;;  %v10826_v48 = vld [vmem:[#allocation10 + $0xb0c] ss:$16 sps:$4 sm:$0xff]   ;;  %v10821_v49 = vld [vmem:[#allocation10 + $0x908] ss:$16 sps:$4 sm:$0xff]  }
 0x11b   :  { %1678 = vmatprep.subr.bf16.mxu1 %v10740_v50  ;;  %v10824_v50 = vld [vmem:[#allocation10 + $0xb08] ss:$16 sps:$4 sm:$0xff]  }
 0x11d   :  { %1638 = vmatpush1.bf16.msra.mxu0 %v10735_v52  ;;  %v10829_v52 = vld [vmem:[#allocation10 + $0x92c] ss:$16 sps:$4 sm:$0xff]  }
 0x11e   :  { %1679 = vmatpush1.bf16.msra.mxu1 %v10738_v53  ;;  %1639 = vmatprep.subr.bf16.mxu0 %v10743_v54  ;;  %v10832_v53 = vld [vmem:[#allocation10 + $0xb2c] ss:$16 sps:$4 sm:$0xff]   ;;  %v10827_v54 = vld [vmem:[#allocation10 + $0x928] ss:$16 sps:$4 sm:$0xff]  }
 0x11f   :  { %1680 = vmatprep.subr.bf16.mxu1 %v10746_v55  ;;  %v10830_v55 = vld [vmem:[#allocation10 + $0xb28] ss:$16 sps:$4 sm:$0xff]  }
 0x121   :  { %1640 = vmatpush1.bf16.msra.mxu0 %v10741_v56  ;;  %v10835_v56 = vld [vmem:[#allocation10 + $0x94c] ss:$16 sps:$4 sm:$0xff]  }
 0x122   :  { %1681 = vmatpush1.bf16.msra.mxu1 %v10744_v57  ;;  %1641 = vmatprep.subr.bf16.mxu0 %v10749_v58  ;;  %v10838_v57 = vld [vmem:[#allocation10 + $0xb4c] ss:$16 sps:$4 sm:$0xff]   ;;  %v10833_v58 = vld [vmem:[#allocation10 + $0x948] ss:$16 sps:$4 sm:$0xff]  }
 0x123   :  { %1682 = vmatprep.subr.bf16.mxu1 %v10752_v59  ;;  %v10836_v59 = vld [vmem:[#allocation10 + $0xb48] ss:$16 sps:$4 sm:$0xff]  }
 0x125   :  { %1642 = vmatpush1.bf16.msra.mxu0 %v10747_v60  ;;  %v10841_v60 = vld [vmem:[#allocation10 + $0x96c] ss:$16 sps:$4 sm:$0xff]  }
 0x126   :  { %1683 = vmatpush1.bf16.msra.mxu1 %v10750_v61  ;;  %1643 = vmatprep.subr.bf16.mxu0 %v10755_v62  ;;  %v10844_v61 = vld [vmem:[#allocation10 + $0xb6c] ss:$16 sps:$4 sm:$0xff]   ;;  %v10839_v62 = vld [vmem:[#allocation10 + $0x968] ss:$16 sps:$4 sm:$0xff]  }
 0x127   :  { %1684 = vmatprep.subr.bf16.mxu1 %v10758_v63  ;;  %v10842_v63 = vld [vmem:[#allocation10 + $0xb68] ss:$16 sps:$4 sm:$0xff]  }
 0x129   :  { %1644 = vmatpush1.bf16.msra.mxu0 %v10753_v0  ;;  %v10847_v0 = vld [vmem:[#allocation10 + $0x98c] ss:$16 sps:$4 sm:$0xff]  }
 0x12a   :  { %1685 = vmatpush1.bf16.msra.mxu1 %v10756_v1  ;;  %1645 = vmatprep.subr.bf16.mxu0 %v10761_v2  ;;  %v10850_v1 = vld [vmem:[#allocation10 + $0xb8c] ss:$16 sps:$4 sm:$0xff]   ;;  %v10845_v2 = vld [vmem:[#allocation10 + $0x988] ss:$16 sps:$4 sm:$0xff]  }
 0x12b   :  { %1686 = vmatprep.subr.bf16.mxu1 %v10764_v3  ;;  %v10848_v3 = vld [vmem:[#allocation10 + $0xb88] ss:$16 sps:$4 sm:$0xff]  }
 0x12d   :  { %1646 = vmatpush1.bf16.msra.mxu0 %v10759_v4  ;;  %v10853_v4 = vld [vmem:[#allocation10 + $0x9ac] ss:$16 sps:$4 sm:$0xff]  }
 0x12e   :  { %1687 = vmatpush1.bf16.msra.mxu1 %v10762_v5  ;;  %1647 = vmatprep.subr.bf16.mxu0 %v10767_v8  ;;  %v10856_v5 = vld [vmem:[#allocation10 + $0xbac] ss:$16 sps:$4 sm:$0xff]   ;;  %v10851_v8 = vld [vmem:[#allocation10 + $0x9a8] ss:$16 sps:$4 sm:$0xff]  }
 0x12f   :  { %1688 = vmatprep.subr.bf16.mxu1 %v10770_v9  ;;  %v10854_v9 = vld [vmem:[#allocation10 + $0xba8] ss:$16 sps:$4 sm:$0xff]  }
 0x131   :  { %1648 = vmatpush1.bf16.msra.mxu0 %v10765_v10  ;;  %v10859_v10 = vld [vmem:[#allocation10 + $0x9cc] ss:$16 sps:$4 sm:$0xff]  }
 0x132   :  { %1689 = vmatpush1.bf16.msra.mxu1 %v10768_v11  ;;  %1699 = vmatprep.subr.bf16.mxu0 %v10775_v12  ;;  %v10862_v11 = vld [vmem:[#allocation10 + $0xbcc] ss:$16 sps:$4 sm:$0xff]   ;;  %v10857_v12 = vld [vmem:[#allocation10 + $0x9c8] ss:$16 sps:$4 sm:$0xff]  }
 0x133   :  { %1740 = vmatprep.subr.bf16.mxu1 %v10778_v13  ;;  %v10860_v13 = vld [vmem:[#allocation10 + $0xbc8] ss:$16 sps:$4 sm:$0xff]  }
 0x134   :  { %1650 = vmatmul.mubr.bf16.vlgmr.msra.gmra.mrb[4].mxu0 %v12927_v14 }
 0x135   :  { %1691 = vmatmul.mubr.bf16.vlgmr.msra.gmra.mrb[4].mxu1 %v12911_v6  ;;  %1700 = vmatpush1.bf16.msra.mxu0 %v10773_v15  ;;  %v10865_v15 = vld [vmem:[#allocation10 + $0x9ec] ss:$16 sps:$4 sm:$0xff]  }
 0x136   :  { %1741 = vmatpush1.bf16.msra.mxu1 %v10776_v16  ;;  %1701 = vmatprep.subr.bf16.mxu0 %v10781_v17  ;;  %v10868_v16 = vld [vmem:[#allocation10 + $0xbec] ss:$16 sps:$4 sm:$0xff]   ;;  %v10863_v17 = vld [vmem:[#allocation10 + $0x9e8] ss:$16 sps:$4 sm:$0xff]  }
 0x137   :  { %1742 = vmatprep.subr.bf16.mxu1 %v10784_v18  ;;  %1731 = vmatprep.mubr.bf16.mxu0 %v12907_v51  ;;  %v10866_v18 = vld [vmem:[#allocation10 + $0xbe8] ss:$16 sps:$4 sm:$0xff]  }
 0x138   :  { %1772 = vmatprep.mubr.bf16.mxu1 %v12922_v34 }
 0x139   :  { %1702 = vmatpush1.bf16.msra.mxu0 %v10779_v19  ;;  %v10871_v19 = vld [vmem:[#allocation10 + $0x4] ss:$16 sps:$4 sm:$0xff]  }
 0x13a   :  { %1743 = vmatpush1.bf16.msra.mxu1 %v10782_v20  ;;  %1703 = vmatprep.subr.bf16.mxu0 %v10787_v21  ;;  %v10874_v20 = vld [vmem:[#allocation10 + $0x204] ss:$16 sps:$4 sm:$0xff]   ;;  %v10869_v21 = vld [vmem:[#allocation10] ss:$16 sps:$4 sm:$0xff]  }
 0x13b   :  { %1744 = vmatprep.subr.bf16.mxu1 %v10790_v22  ;;  %v12933_v22 = vld [vmem:[#allocation2] sm:$0xff] }
 0x13d   :  { %1704 = vmatpush1.bf16.msra.mxu0 %v10785_v23  ;;  %v12935_v23 = vld [vmem:[#allocation2 + $0x8] sm:$0xff] }
 0x13e   :  { %1745 = vmatpush1.bf16.msra.mxu1 %v10788_v24  ;;  %1705 = vmatprep.subr.bf16.mxu0 %v10793_v25  ;;  %v10872_v24 = vld [vmem:[#allocation10 + $0x200] ss:$16 sps:$4 sm:$0xff]   ;;  %v10877_v25 = vld [vmem:[#allocation10 + $0x24] ss:$16 sps:$4 sm:$0xff]  }
 0x13f   :  { %1746 = vmatprep.subr.bf16.mxu1 %v10796_v26  ;;  %v10880_v26 = vld [vmem:[#allocation10 + $0x224] ss:$16 sps:$4 sm:$0xff]  }
 0x141   :  { %1706 = vmatpush1.bf16.msra.mxu0 %v10791_v27  ;;  %v12939_v27 = vcombine.high %v12933_v22, %v12933_v22 }
 0x142   :  { %1747 = vmatpush1.bf16.msra.mxu1 %v10794_v28  ;;  %1707 = vmatprep.subr.bf16.mxu0 %v10799_v29  ;;  %v12943_v28 = vcombine.high %v12935_v23, %v12935_v23  ;;  %v10875_v29 = vld [vmem:[#allocation10 + $0x20] ss:$16 sps:$4 sm:$0xff]  }
 0x143   :  { %1748 = vmatprep.subr.bf16.mxu1 %v10802_v30  ;;  %v10878_v30 = vld [vmem:[#allocation10 + $0x220] ss:$16 sps:$4 sm:$0xff]  }
 0x145   :  { %1708 = vmatpush1.bf16.msra.mxu0 %v10797_v31  ;;  %v10883_v31 = vld [vmem:[#allocation10 + $0x44] ss:$16 sps:$4 sm:$0xff]  }
 0x146   :  { %1749 = vmatpush1.bf16.msra.mxu1 %v10800_v32  ;;  %1709 = vmatprep.subr.bf16.mxu0 %v10805_v33  ;;  %v10886_v32 = vld [vmem:[#allocation10 + $0x244] ss:$16 sps:$4 sm:$0xff]   ;;  %v10881_v33 = vld [vmem:[#allocation10 + $0x40] ss:$16 sps:$4 sm:$0xff]  }
 0x147   :  { %1750 = vmatprep.subr.bf16.mxu1 %v10808_v35  ;;  %v10884_v35 = vld [vmem:[#allocation10 + $0x240] ss:$16 sps:$4 sm:$0xff]  }
 0x149   :  { %1710 = vmatpush1.bf16.msra.mxu0 %v10803_v36  ;;  %v10889_v36 = vld [vmem:[#allocation10 + $0x64] ss:$16 sps:$4 sm:$0xff]  }
 0x14a   :  { %1751 = vmatpush1.bf16.msra.mxu1 %v10806_v37  ;;  %1711 = vmatprep.subr.bf16.mxu0 %v10811_v38  ;;  %v10892_v37 = vld [vmem:[#allocation10 + $0x264] ss:$16 sps:$4 sm:$0xff]   ;;  %v10887_v38 = vld [vmem:[#allocation10 + $0x60] ss:$16 sps:$4 sm:$0xff]  }
 0x14b   :  { %1752 = vmatprep.subr.bf16.mxu1 %v10814_v39  ;;  %v10890_v39 = vld [vmem:[#allocation10 + $0x260] ss:$16 sps:$4 sm:$0xff]  }
 0x14d   :  { %1712 = vmatpush1.bf16.msra.mxu0 %v10809_v40  ;;  %v10895_v40 = vld [vmem:[#allocation10 + $0x84] ss:$16 sps:$4 sm:$0xff]  }
 0x14e   :  { %1753 = vmatpush1.bf16.msra.mxu1 %v10812_v41  ;;  %1713 = vmatprep.subr.bf16.mxu0 %v10817_v42  ;;  %v10898_v41 = vld [vmem:[#allocation10 + $0x284] ss:$16 sps:$4 sm:$0xff]   ;;  %v10893_v42 = vld [vmem:[#allocation10 + $0x80] ss:$16 sps:$4 sm:$0xff]  }
 0x14f   :  { %1754 = vmatprep.subr.bf16.mxu1 %v10820_v43  ;;  %v10896_v43 = vld [vmem:[#allocation10 + $0x280] ss:$16 sps:$4 sm:$0xff]  }
 0x151   :  { %1714 = vmatpush1.bf16.msra.mxu0 %v10815_v44  ;;  %v10901_v44 = vld [vmem:[#allocation10 + $0xa4] ss:$16 sps:$4 sm:$0xff]  }
 0x152   :  { %1755 = vmatpush1.bf16.msra.mxu1 %v10818_v45  ;;  %1715 = vmatprep.subr.bf16.mxu0 %v10823_v46  ;;  %v10904_v45 = vld [vmem:[#allocation10 + $0x2a4] ss:$16 sps:$4 sm:$0xff]   ;;  %v10899_v46 = vld [vmem:[#allocation10 + $0xa0] ss:$16 sps:$4 sm:$0xff]  }
 0x153   :  { %1756 = vmatprep.subr.bf16.mxu1 %v10826_v48  ;;  %v10902_v48 = vld [vmem:[#allocation10 + $0x2a0] ss:$16 sps:$4 sm:$0xff]  }
 0x155   :  { %1716 = vmatpush1.bf16.msra.mxu0 %v10821_v49  ;;  %v10907_v49 = vld [vmem:[#allocation10 + $0xc4] ss:$16 sps:$4 sm:$0xff]  }
 0x156   :  { %1757 = vmatpush1.bf16.msra.mxu1 %v10824_v50  ;;  %1717 = vmatprep.subr.bf16.mxu0 %v10829_v52  ;;  %v10910_v50 = vld [vmem:[#allocation10 + $0x2c4] ss:$16 sps:$4 sm:$0xff]   ;;  %v10905_v52 = vld [vmem:[#allocation10 + $0xc0] ss:$16 sps:$4 sm:$0xff]  }
 0x157   :  { %1758 = vmatprep.subr.bf16.mxu1 %v10832_v53  ;;  %v10908_v53 = vld [vmem:[#allocation10 + $0x2c0] ss:$16 sps:$4 sm:$0xff]  }
 0x159   :  { %1718 = vmatpush1.bf16.msra.mxu0 %v10827_v54  ;;  %v10913_v54 = vld [vmem:[#allocation10 + $0xe4] ss:$16 sps:$4 sm:$0xff]  }
 0x15a   :  { %1759 = vmatpush1.bf16.msra.mxu1 %v10830_v55  ;;  %1719 = vmatprep.subr.bf16.mxu0 %v10835_v56  ;;  %v10916_v55 = vld [vmem:[#allocation10 + $0x2e4] ss:$16 sps:$4 sm:$0xff]   ;;  %v10911_v56 = vld [vmem:[#allocation10 + $0xe0] ss:$16 sps:$4 sm:$0xff]  }
 0x15b   :  { %1760 = vmatprep.subr.bf16.mxu1 %v10838_v57  ;;  %v10914_v57 = vld [vmem:[#allocation10 + $0x2e0] ss:$16 sps:$4 sm:$0xff]  }
 0x15d   :  { %1720 = vmatpush1.bf16.msra.mxu0 %v10833_v58  ;;  %v10919_v58 = vld [vmem:[#allocation10 + $0x104] ss:$16 sps:$4 sm:$0xff]  }
 0x15e   :  { %1761 = vmatpush1.bf16.msra.mxu1 %v10836_v59  ;;  %1721 = vmatprep.subr.bf16.mxu0 %v10841_v60  ;;  %v10922_v59 = vld [vmem:[#allocation10 + $0x304] ss:$16 sps:$4 sm:$0xff]   ;;  %v10917_v60 = vld [vmem:[#allocation10 + $0x100] ss:$16 sps:$4 sm:$0xff]  }
 0x15f   :  { %1762 = vmatprep.subr.bf16.mxu1 %v10844_v61  ;;  %v10920_v61 = vld [vmem:[#allocation10 + $0x300] ss:$16 sps:$4 sm:$0xff]  }
 0x161   :  { %1722 = vmatpush1.bf16.msra.mxu0 %v10839_v62  ;;  %v10925_v62 = vld [vmem:[#allocation10 + $0x124] ss:$16 sps:$4 sm:$0xff]  }
 0x162   :  { %1763 = vmatpush1.bf16.msra.mxu1 %v10842_v63  ;;  %1723 = vmatprep.subr.bf16.mxu0 %v10847_v0  ;;  %v10928_v63 = vld [vmem:[#allocation10 + $0x324] ss:$16 sps:$4 sm:$0xff]   ;;  %v10923_v0 = vld [vmem:[#allocation10 + $0x120] ss:$16 sps:$4 sm:$0xff]  }
 0x163   :  { %1764 = vmatprep.subr.bf16.mxu1 %v10850_v1  ;;  %v10926_v1 = vld [vmem:[#allocation10 + $0x320] ss:$16 sps:$4 sm:$0xff]  }
 0x165   :  { %1724 = vmatpush1.bf16.msra.mxu0 %v10845_v2  ;;  %v10931_v2 = vld [vmem:[#allocation10 + $0x144] ss:$16 sps:$4 sm:$0xff]  }
 0x166   :  { %1765 = vmatpush1.bf16.msra.mxu1 %v10848_v3  ;;  %1725 = vmatprep.subr.bf16.mxu0 %v10853_v4  ;;  %v10934_v3 = vld [vmem:[#allocation10 + $0x344] ss:$16 sps:$4 sm:$0xff]   ;;  %v10929_v4 = vld [vmem:[#allocation10 + $0x140] ss:$16 sps:$4 sm:$0xff]  }
 0x167   :  { %1766 = vmatprep.subr.bf16.mxu1 %v10856_v5  ;;  %v10932_v5 = vld [vmem:[#allocation10 + $0x340] ss:$16 sps:$4 sm:$0xff]  }
 0x169   :  { %1726 = vmatpush1.bf16.msra.mxu0 %v10851_v8  ;;  %v10937_v8 = vld [vmem:[#allocation10 + $0x164] ss:$16 sps:$4 sm:$0xff]  }
 0x16a   :  { %1767 = vmatpush1.bf16.msra.mxu1 %v10854_v9  ;;  %1727 = vmatprep.subr.bf16.mxu0 %v10859_v10  ;;  %v10940_v9 = vld [vmem:[#allocation10 + $0x364] ss:$16 sps:$4 sm:$0xff]   ;;  %v10935_v10 = vld [vmem:[#allocation10 + $0x160] ss:$16 sps:$4 sm:$0xff]  }
 0x16b   :  { %1768 = vmatprep.subr.bf16.mxu1 %v10862_v11  ;;  %v10938_v11 = vld [vmem:[#allocation10 + $0x360] ss:$16 sps:$4 sm:$0xff]  }
 0x16d   :  { %1728 = vmatpush1.bf16.msra.mxu0 %v10857_v12  ;;  %v10943_v12 = vld [vmem:[#allocation10 + $0x184] ss:$16 sps:$4 sm:$0xff]  }
 0x16e   :  { %1769 = vmatpush1.bf16.msra.mxu1 %v10860_v13  ;;  %1729 = vmatprep.subr.bf16.mxu0 %v10865_v15  ;;  %v10946_v13 = vld [vmem:[#allocation10 + $0x384] ss:$16 sps:$4 sm:$0xff]   ;;  %v10941_v15 = vld [vmem:[#allocation10 + $0x180] ss:$16 sps:$4 sm:$0xff]  }
 0x16f   :  { %1770 = vmatprep.subr.bf16.mxu1 %v10868_v16  ;;  %v10944_v16 = vld [vmem:[#allocation10 + $0x380] ss:$16 sps:$4 sm:$0xff]  }
 0x171   :  { %1730 = vmatpush1.bf16.msra.mxu0 %v10863_v17  ;;  %v10949_v17 = vld [vmem:[#allocation10 + $0x1a4] ss:$16 sps:$4 sm:$0xff]  }
 0x172   :  { %1771 = vmatpush1.bf16.msra.mxu1 %v10866_v18  ;;  %2762 = vmatprep.subr.bf16.mxu0 %v10871_v19  ;;  %v10952_v18 = vld [vmem:[#allocation10 + $0x3a4] ss:$16 sps:$4 sm:$0xff]   ;;  %v10947_v19 = vld [vmem:[#allocation10 + $0x1a0] ss:$16 sps:$4 sm:$0xff]  }
 0x173   :  { %2803 = vmatprep.subr.bf16.mxu1 %v10874_v20  ;;  %v10950_v20 = vld [vmem:[#allocation10 + $0x3a0] ss:$16 sps:$4 sm:$0xff]  }
 0x174   :  { %1732 = vmatmul.mubr.bf16.vlgmr.msra.gmra.mrb[8].mxu0 %v12913_v7 }
 0x175   :  { %1773 = vmatmul.mubr.bf16.vlgmr.msra.gmra.mrb[8].mxu1 %v12927_v14  ;;  %2763 = vmatpush1.bf16.msra.mxu0 %v10869_v21  ;;  %v10955_v21 = vld [vmem:[#allocation10 + $0x1c4] ss:$16 sps:$4 sm:$0xff]  }
 0x176   :  { %2804 = vmatpush1.bf16.msra.mxu1 %v10872_v24  ;;  %2764 = vmatprep.subr.bf16.mxu0 %v10877_v25  ;;  %v10958_v24 = vld [vmem:[#allocation10 + $0x3c4] ss:$16 sps:$4 sm:$0xff]   ;;  %v10953_v25 = vld [vmem:[#allocation10 + $0x1c0] ss:$16 sps:$4 sm:$0xff]  }
 0x177   :  { %2805 = vmatprep.subr.bf16.mxu1 %v10880_v26  ;;  %2794 = vmatprep.mubr.bf16.mxu0 %v12939_v27  ;;  %v10956_v26 = vld [vmem:[#allocation10 + $0x3c0] ss:$16 sps:$4 sm:$0xff]  }
 0x178   :  { %2835 = vmatprep.mubr.bf16.mxu1 %v12943_v28 }
 0x179   :  { %2765 = vmatpush1.bf16.msra.mxu0 %v10875_v29  ;;  %v10961_v29 = vld [vmem:[#allocation10 + $0x1e4] ss:$16 sps:$4 sm:$0xff]  }
 0x17a   :  { %2806 = vmatpush1.bf16.msra.mxu1 %v10878_v30  ;;  %2766 = vmatprep.subr.bf16.mxu0 %v10883_v31  ;;  %v10964_v30 = vld [vmem:[#allocation10 + $0x3e4] ss:$16 sps:$4 sm:$0xff]   ;;  %v10959_v31 = vld [vmem:[#allocation10 + $0x1e0] ss:$16 sps:$4 sm:$0xff]  }
 0x17b   :  { %2807 = vmatprep.subr.bf16.mxu1 %v10886_v32  ;;  %v10962_v32 = vld [vmem:[#allocation10 + $0x3e0] ss:$16 sps:$4 sm:$0xff]  }
 0x17d   :  { %2767 = vmatpush1.bf16.msra.mxu0 %v10881_v33  ;;  %v10971_v33 = vld [vmem:[#allocation10 + $0x404] ss:$16 sps:$4 sm:$0xff]  }
 0x17e   :  { %2808 = vmatpush1.bf16.msra.mxu1 %v10884_v35  ;;  %2768 = vmatprep.subr.bf16.mxu0 %v10889_v36  ;;  %v10974_v35 = vld [vmem:[#allocation10 + $0xc] ss:$16 sps:$4 sm:$0xff]   ;;  %v12951_v36 = vcombine.low %v12933_v22, %v12933_v22  ;;  %v10975_v22 = vld [vmem:[#allocation10 + $0x420] ss:$16 sps:$4 sm:$0xff]  }
 0x17f   :  { %2809 = vmatprep.subr.bf16.mxu1 %v10892_v37  ;;  %v12955_v37 = vcombine.low %v12935_v23, %v12935_v23  ;;  %v10978_v23 = vld [vmem:[#allocation10 + $0x28] ss:$16 sps:$4 sm:$0xff]  }
 0x181   :  { %2769 = vmatpush1.bf16.msra.mxu0 %v10887_v38  ;;  %v12957_v38 = vld [vmem:[#allocation2 + $0x10] sm:$0xff] }
 0x182   :  { %2810 = vmatpush1.bf16.msra.mxu1 %v10890_v39  ;;  %2770 = vmatprep.subr.bf16.mxu0 %v10895_v40  ;;  %v10969_v39 = vld [vmem:[#allocation10 + $0x400] ss:$16 sps:$4 sm:$0xff]   ;;  %v10972_v40 = vld [vmem:[#allocation10 + $0x8] ss:$16 sps:$4 sm:$0xff]  }
 0x183   :  { %2811 = vmatprep.subr.bf16.mxu1 %v10898_v41  ;;  %v10977_v41 = vld [vmem:[#allocation10 + $0x424] ss:$16 sps:$4 sm:$0xff]  }
 0x185   :  { %2771 = vmatpush1.bf16.msra.mxu0 %v10893_v42  ;;  %v10980_v42 = vld [vmem:[#allocation10 + $0x2c] ss:$16 sps:$4 sm:$0xff]  }
 0x186   :  { %2812 = vmatpush1.bf16.msra.mxu1 %v10896_v43  ;;  %2772 = vmatprep.subr.bf16.mxu0 %v10901_v44  ;;  %v12961_v43 = vcombine.high %v12957_v38, %v12957_v38  ;;  %v10983_v44 = vld [vmem:[#allocation10 + $0x444] ss:$16 sps:$4 sm:$0xff]  }
 0x187   :  { %2813 = vmatprep.subr.bf16.mxu1 %v10904_v45  ;;  %v10986_v45 = vld [vmem:[#allocation10 + $0x4c] ss:$16 sps:$4 sm:$0xff]  }
 0x189   :  { %2773 = vmatpush1.bf16.msra.mxu0 %v10899_v46  ;;  %v10981_v46 = vld [vmem:[#allocation10 + $0x440] ss:$16 sps:$4 sm:$0xff]  }
 0x18a   :  { %2814 = vmatpush1.bf16.msra.mxu1 %v10902_v48  ;;  %2774 = vmatprep.subr.bf16.mxu0 %v10907_v49  ;;  %v10984_v48 = vld [vmem:[#allocation10 + $0x48] ss:$16 sps:$4 sm:$0xff]   ;;  %v10989_v49 = vld [vmem:[#allocation10 + $0x464] ss:$16 sps:$4 sm:$0xff]  }
 0x18b   :  { %2815 = vmatprep.subr.bf16.mxu1 %v10910_v50  ;;  %v10992_v50 = vld [vmem:[#allocation10 + $0x6c] ss:$16 sps:$4 sm:$0xff]  }
 0x18d   :  { %2775 = vmatpush1.bf16.msra.mxu0 %v10905_v52  ;;  %v10987_v52 = vld [vmem:[#allocation10 + $0x460] ss:$16 sps:$4 sm:$0xff]  }
 0x18e   :  { %2816 = vmatpush1.bf16.msra.mxu1 %v10908_v53  ;;  %2776 = vmatprep.subr.bf16.mxu0 %v10913_v54  ;;  %v10990_v53 = vld [vmem:[#allocation10 + $0x68] ss:$16 sps:$4 sm:$0xff]   ;;  %v10995_v54 = vld [vmem:[#allocation10 + $0x484] ss:$16 sps:$4 sm:$0xff]  }
 0x18f   :  { %2817 = vmatprep.subr.bf16.mxu1 %v10916_v55  ;;  %v10998_v55 = vld [vmem:[#allocation10 + $0x8c] ss:$16 sps:$4 sm:$0xff]  }
 0x191   :  { %2777 = vmatpush1.bf16.msra.mxu0 %v10911_v56  ;;  %v10993_v56 = vld [vmem:[#allocation10 + $0x480] ss:$16 sps:$4 sm:$0xff]  }
 0x192   :  { %2818 = vmatpush1.bf16.msra.mxu1 %v10914_v57  ;;  %2778 = vmatprep.subr.bf16.mxu0 %v10919_v58  ;;  %v11001_v57 = vld [vmem:[#allocation10 + $0x4a4] ss:$16 sps:$4 sm:$0xff]   ;;  %v11004_v58 = vld [vmem:[#allocation10 + $0xac] ss:$16 sps:$4 sm:$0xff]  }
 0x193   :  { %2819 = vmatprep.subr.bf16.mxu1 %v10922_v59  ;;  %v10999_v59 = vld [vmem:[#allocation10 + $0x4a0] ss:$16 sps:$4 sm:$0xff]  }
 0x195   :  { %2779 = vmatpush1.bf16.msra.mxu0 %v10917_v60  ;;  %v11002_v60 = vld [vmem:[#allocation10 + $0xa8] ss:$16 sps:$4 sm:$0xff]  }
 0x196   :  { %2820 = vmatpush1.bf16.msra.mxu1 %v10920_v61  ;;  %2780 = vmatprep.subr.bf16.mxu0 %v10925_v62  ;;  %v11007_v61 = vld [vmem:[#allocation10 + $0x4c4] ss:$16 sps:$4 sm:$0xff]   ;;  %v11010_v62 = vld [vmem:[#allocation10 + $0xcc] ss:$16 sps:$4 sm:$0xff]  }
 0x197   :  { %2821 = vmatprep.subr.bf16.mxu1 %v10928_v63 }
 0x199   :  { %2781 = vmatpush1.bf16.msra.mxu0 %v10923_v0 }
 0x19a   :  { %2822 = vmatpush1.bf16.msra.mxu1 %v10926_v1  ;;  %2782 = vmatprep.subr.bf16.mxu0 %v10931_v2  ;;  %v11005_v1 = vld [vmem:[#allocation10 + $0x4c0] ss:$16 sps:$4 sm:$0xff]   ;;  %v11008_v2 = vld [vmem:[#allocation10 + $0xc8] ss:$16 sps:$4 sm:$0xff]  }
 0x19b   :  { %2823 = vmatprep.subr.bf16.mxu1 %v10934_v3 }
 0x19d   :  { %2783 = vmatpush1.bf16.msra.mxu0 %v10929_v4 }
 0x19e   :  { %2824 = vmatpush1.bf16.msra.mxu1 %v10932_v5  ;;  %2784 = vmatprep.subr.bf16.mxu0 %v10937_v8 }
 0x19f   :  { %2825 = vmatprep.subr.bf16.mxu1 %v10940_v9 }
 0x1a1   :  { %2785 = vmatpush1.bf16.msra.mxu0 %v10935_v10 }
 0x1a2   :  { %2826 = vmatpush1.bf16.msra.mxu1 %v10938_v11  ;;  %2786 = vmatprep.subr.bf16.mxu0 %v10943_v12 }
 0x1a3   :  { %2827 = vmatprep.subr.bf16.mxu1 %v10946_v13  ;;  %v11013_v13 = vld [vmem:[#allocation10 + $0x4e4] ss:$16 sps:$4 sm:$0xff]  }
 0x1a5   :  { %2787 = vmatpush1.bf16.msra.mxu0 %v10941_v15  ;;  %v11016_v15 = vld [vmem:[#allocation10 + $0xec] ss:$16 sps:$4 sm:$0xff]  }
 0x1a6   :  { %2828 = vmatpush1.bf16.msra.mxu1 %v10944_v16  ;;  %2788 = vmatprep.subr.bf16.mxu0 %v10949_v17  ;;  %v11011_v16 = vld [vmem:[#allocation10 + $0x4e0] ss:$16 sps:$4 sm:$0xff]   ;;  %v11014_v17 = vld [vmem:[#allocation10 + $0xe8] ss:$16 sps:$4 sm:$0xff]  }
 0x1a7   :  { %2829 = vmatprep.subr.bf16.mxu1 %v10952_v18  ;;  %v11019_v18 = vld [vmem:[#allocation10 + $0x504] ss:$16 sps:$4 sm:$0xff]  }
 0x1a9   :  { %2789 = vmatpush1.bf16.msra.mxu0 %v10947_v19  ;;  %v11022_v19 = vld [vmem:[#allocation10 + $0x10c] ss:$16 sps:$4 sm:$0xff]  }
 0x1aa   :  { %2830 = vmatpush1.bf16.msra.mxu1 %v10950_v20  ;;  %2790 = vmatprep.subr.bf16.mxu0 %v10955_v21  ;;  %v11017_v20 = vld [vmem:[#allocation10 + $0x500] ss:$16 sps:$4 sm:$0xff]   ;;  %v11020_v21 = vld [vmem:[#allocation10 + $0x108] ss:$16 sps:$4 sm:$0xff]  }
 0x1ab   :  { %2831 = vmatprep.subr.bf16.mxu1 %v10958_v24  ;;  %v11025_v24 = vld [vmem:[#allocation10 + $0x524] ss:$16 sps:$4 sm:$0xff]  }
 0x1ad   :  { %2791 = vmatpush1.bf16.msra.mxu0 %v10953_v25  ;;  %v11028_v25 = vld [vmem:[#allocation10 + $0x12c] ss:$16 sps:$4 sm:$0xff]  }
 0x1ae   :  { %2832 = vmatpush1.bf16.msra.mxu1 %v10956_v26  ;;  %2792 = vmatprep.subr.bf16.mxu0 %v10961_v29  ;;  %v11023_v26 = vld [vmem:[#allocation10 + $0x520] ss:$16 sps:$4 sm:$0xff]   ;;  %v11026_v29 = vld [vmem:[#allocation10 + $0x128] ss:$16 sps:$4 sm:$0xff]  }
 0x1af   :  { %2833 = vmatprep.subr.bf16.mxu1 %v10964_v30  ;;  %v11031_v30 = vld [vmem:[#allocation10 + $0x544] ss:$16 sps:$4 sm:$0xff]  }
 0x1b1   :  { %2793 = vmatpush1.bf16.msra.mxu0 %v10959_v31  ;;  %v11034_v31 = vld [vmem:[#allocation10 + $0x14c] ss:$16 sps:$4 sm:$0xff]  }
 0x1b2   :  { %2834 = vmatpush1.bf16.msra.mxu1 %v10962_v32  ;;  %2844 = vmatprep.subr.bf16.mxu0 %v10971_v33  ;;  %v11029_v32 = vld [vmem:[#allocation10 + $0x540] ss:$16 sps:$4 sm:$0xff]   ;;  %v11032_v33 = vld [vmem:[#allocation10 + $0x148] ss:$16 sps:$4 sm:$0xff]  }
 0x1b3   :  { %2885 = vmatprep.subr.bf16.mxu1 %v10974_v35  ;;  %v11037_v35 = vld [vmem:[#allocation10 + $0x564] ss:$16 sps:$4 sm:$0xff]  }
 0x1b4   :  { %2795 = vmatmul.mubr.bf16.vlgmr.msra.gmra.mrb[12].mxu0 %v12951_v36 }
 0x1b5   :  { %2836 = vmatmul.mubr.bf16.vlgmr.msra.gmra.mrb[12].mxu1 %v12955_v37  ;;  %2845 = vmatpush1.bf16.msra.mxu0 %v10969_v39  ;;  %v11040_v39 = vld [vmem:[#allocation10 + $0x16c] ss:$16 sps:$4 sm:$0xff]  }
 0x1b6   :  { %2886 = vmatpush1.bf16.msra.mxu1 %v10972_v40  ;;  %2846 = vmatprep.subr.bf16.mxu0 %v10977_v41  ;;  %v11035_v40 = vld [vmem:[#allocation10 + $0x560] ss:$16 sps:$4 sm:$0xff]   ;;  %v11038_v41 = vld [vmem:[#allocation10 + $0x168] ss:$16 sps:$4 sm:$0xff]  }
 0x1b7   :  { %2887 = vmatprep.subr.bf16.mxu1 %v10980_v42  ;;  %2876 = vmatprep.mubr.bf16.mxu0 %v12961_v43  ;;  %v11043_v42 = vld [vmem:[#allocation10 + $0x584] ss:$16 sps:$4 sm:$0xff]  }
 0x1b8   :  { %2917 = vmatprep.mubr.bf16.mxu1 %v12939_v27  ;;  %v10996_v27 = vld [vmem:[#allocation10 + $0x88] ss:$16 sps:$4 sm:$0xff]  }
 0x1b9   :  { %2847 = vmatpush1.bf16.msra.mxu0 %v10975_v22  ;;  %v11046_v22 = vld [vmem:[#allocation10 + $0x18c] ss:$16 sps:$4 sm:$0xff]  }
 0x1ba   :  { %2888 = vmatpush1.bf16.msra.mxu1 %v10978_v23  ;;  %2848 = vmatprep.subr.bf16.mxu0 %v10983_v44  ;;  %v11041_v23 = vld [vmem:[#allocation10 + $0x580] ss:$16 sps:$4 sm:$0xff]   ;;  %v11044_v44 = vld [vmem:[#allocation10 + $0x188] ss:$16 sps:$4 sm:$0xff]  }
 0x1bb   :  { %2889 = vmatprep.subr.bf16.mxu1 %v10986_v45  ;;  %v11049_v45 = vld [vmem:[#allocation10 + $0x5a4] ss:$16 sps:$4 sm:$0xff]  }
 0x1bd   :  { %2849 = vmatpush1.bf16.msra.mxu0 %v10981_v46  ;;  %v11052_v46 = vld [vmem:[#allocation10 + $0x1ac] ss:$16 sps:$4 sm:$0xff]  }
 0x1be   :  { %2890 = vmatpush1.bf16.msra.mxu1 %v10984_v48  ;;  %2850 = vmatprep.subr.bf16.mxu0 %v10989_v49  ;;  %v11047_v48 = vld [vmem:[#allocation10 + $0x5a0] ss:$16 sps:$4 sm:$0xff]   ;;  %v11050_v49 = vld [vmem:[#allocation10 + $0x1a8] ss:$16 sps:$4 sm:$0xff]  }
 0x1bf   :  { %2891 = vmatprep.subr.bf16.mxu1 %v10992_v50  ;;  %v11055_v50 = vld [vmem:[#allocation10 + $0x5c4] ss:$16 sps:$4 sm:$0xff]  }
 0x1c1   :  { %2851 = vmatpush1.bf16.msra.mxu0 %v10987_v52  ;;  %v11058_v52 = vld [vmem:[#allocation10 + $0x1cc] ss:$16 sps:$4 sm:$0xff]  }
 0x1c2   :  { %2892 = vmatpush1.bf16.msra.mxu1 %v10990_v53  ;;  %2852 = vmatprep.subr.bf16.mxu0 %v10995_v54  ;;  %v11053_v53 = vld [vmem:[#allocation10 + $0x5c0] ss:$16 sps:$4 sm:$0xff]   ;;  %v11056_v54 = vld [vmem:[#allocation10 + $0x1c8] ss:$16 sps:$4 sm:$0xff]  }
 0x1c3   :  { %2893 = vmatprep.subr.bf16.mxu1 %v10998_v55  ;;  %v11061_v55 = vld [vmem:[#allocation10 + $0x5e4] ss:$16 sps:$4 sm:$0xff]  }
 0x1c5   :  { %2853 = vmatpush1.bf16.msra.mxu0 %v10993_v56  ;;  %v11064_v56 = vld [vmem:[#allocation10 + $0x1ec] ss:$16 sps:$4 sm:$0xff]  }
 0x1c6   :  { %2894 = vmatpush1.bf16.msra.mxu1 %v10996_v27  ;;  %2854 = vmatprep.subr.bf16.mxu0 %v11001_v57  ;;  %v11059_v27 = vld [vmem:[#allocation10 + $0x5e0] ss:$16 sps:$4 sm:$0xff]   ;;  %v11062_v57 = vld [vmem:[#allocation10 + $0x1e8] ss:$16 sps:$4 sm:$0xff]  }
 0x1c7   :  { %2895 = vmatprep.subr.bf16.mxu1 %v11004_v58  ;;  %v1569_v63 = vpop.f32.mrb[0].mxu0  ;;  %v11069_v58 = vld [vmem:[#allocation10 + $0x20c] ss:$16 sps:$4 sm:$0xff]  }
 0x1c8   :  { %v1610_v0 = vpop.f32.mrb[0].mxu1  ;;  %v1571_v4 = vpop.f32.mrb[1].mxu0 }
 0x1c9   :  { %v12967_v3 = vadd.f32 %v1610_v0, %v1569_v63  ;;  %v1612_v5 = vpop.f32.mrb[1].mxu1  ;;  %v1573_v9 = vpop.f32.mrb[2].mxu0  ;;  %2855 = vmatpush1.bf16.msra.mxu0 %v10999_v59  ;;  %v11072_v59 = vld [vmem:[#allocation10 + $0x40c] ss:$16 sps:$4 sm:$0xff]  }
 0x1ca   :  { %v12969_v8 = vadd.f32 %v1612_v5, %v1571_v4  ;;  %v1614_v10 = vpop.f32.mrb[2].mxu1  ;;  %2896 = vmatpush1.bf16.msra.mxu1 %v11002_v60  ;;  %v1574_v11 = vpop.f32.mrb[3].mxu0  ;;  %2856 = vmatprep.subr.bf16.mxu0 %v11007_v61  ;;  %v12973_v60 = vcombine.low %v12957_v38, %v12957_v38  ;;  %v11067_v61 = vld [vmem:[#allocation10 + $0x208] ss:$16 sps:$4 sm:$0xff]   ;;  %v11075_v63 = vld [vmem:[#allocation10 + $0x22c] ss:$16 sps:$4 sm:$0xff]  }
 0x1cb   :  { %v1615_v12 = vpop.f32.mrb[3].mxu1  ;;  %2897 = vmatprep.subr.bf16.mxu1 %v11010_v62  ;;  %v11070_v62 = vld [vmem:[#allocation10 + $0x408] ss:$16 sps:$4 sm:$0xff]   ;;  %v11078_v0 = vld [vmem:[#allocation10 + $0x42c] ss:$16 sps:$4 sm:$0xff]  }
 0x1cc   :  { %v11081_v38 = vld [vmem:[#allocation10 + $0x24c] ss:$16 sps:$4 sm:$0xff]   ;;  %v11079_v5 = vld [vmem:[#allocation10 + $0x248] ss:$16 sps:$4 sm:$0xff]  }
 0x1cd   :  { %2857 = vmatpush1.bf16.msra.mxu0 %v11005_v1  ;;  %v11073_v1 = vld [vmem:[#allocation10 + $0x228] ss:$16 sps:$4 sm:$0xff]   ;;  %v11084_v4 = vld [vmem:[#allocation10 + $0x44c] ss:$16 sps:$4 sm:$0xff]  }
 0x1ce   :  { %2898 = vmatpush1.bf16.msra.mxu1 %v11008_v2  ;;  %2858 = vmatprep.subr.bf16.mxu0 %v11013_v13  ;;  %v11076_v2 = vld [vmem:[#allocation10 + $0x428] ss:$16 sps:$4 sm:$0xff]   ;;  %v11087_v10 = vld [vmem:[#allocation10 + $0x26c] ss:$16 sps:$4 sm:$0xff]  }
 0x1cf   :  { %2899 = vmatprep.subr.bf16.mxu1 %v11016_v15  ;;  %v11082_v9 = vld [vmem:[#allocation10 + $0x448] ss:$16 sps:$4 sm:$0xff]   ;;  %v11093_v13 = vld [vmem:[#allocation10 + $0x28c] ss:$16 sps:$4 sm:$0xff]  }
 0x1d0   :  { %v11085_v11 = vld [vmem:[#allocation10 + $0x268] ss:$16 sps:$4 sm:$0xff]   ;;  %v11096_v15 = vld [vmem:[#allocation10 + $0x48c] ss:$16 sps:$4 sm:$0xff]  }
 0x1d1   :  { %2859 = vmatpush1.bf16.msra.mxu0 %v11011_v16  ;;  %v11088_v12 = vld [vmem:[#allocation10 + $0x468] ss:$16 sps:$4 sm:$0xff]   ;;  %v11099_v16 = vld [vmem:[#allocation10 + $0x2ac] ss:$16 sps:$4 sm:$0xff]  }
 0x1d2   :  { %2900 = vmatpush1.bf16.msra.mxu1 %v11014_v17  ;;  %2860 = vmatprep.subr.bf16.mxu0 %v11019_v18  ;;  %v11102_v17 = vld [vmem:[#allocation10 + $0x4ac] ss:$16 sps:$4 sm:$0xff]   ;;  %v11097_v18 = vld [vmem:[#allocation10 + $0x2a8] ss:$16 sps:$4 sm:$0xff]  }
 0x1d3   :  { %2901 = vmatprep.subr.bf16.mxu1 %v11022_v19  ;;  %v11100_v19 = vld [vmem:[#allocation10 + $0x4a8] ss:$16 sps:$4 sm:$0xff]  }
 0x1d5   :  { %2861 = vmatpush1.bf16.msra.mxu0 %v11017_v20  ;;  %v11105_v20 = vld [vmem:[#allocation10 + $0x2cc] ss:$16 sps:$4 sm:$0xff]  }
 0x1d6   :  { %2902 = vmatpush1.bf16.msra.mxu1 %v11020_v21  ;;  %2862 = vmatprep.subr.bf16.mxu0 %v11025_v24  ;;  %v11108_v21 = vld [vmem:[#allocation10 + $0x4cc] ss:$16 sps:$4 sm:$0xff]  }
 0x1d7   :  { %2903 = vmatprep.subr.bf16.mxu1 %v11028_v25 }
 0x1d9   :  { %2863 = vmatpush1.bf16.msra.mxu0 %v11023_v26  ;;  %v11103_v26 = vld [vmem:[#allocation10 + $0x2c8] ss:$16 sps:$4 sm:$0xff]  }
 0x1da   :  { %2904 = vmatpush1.bf16.msra.mxu1 %v11026_v29  ;;  %2864 = vmatprep.subr.bf16.mxu0 %v11031_v30  ;;  %v11106_v29 = vld [vmem:[#allocation10 + $0x4c8] ss:$16 sps:$4 sm:$0xff]  }
 0x1db   :  { %2905 = vmatprep.subr.bf16.mxu1 %v11034_v31 }
 0x1dd   :  { %2865 = vmatpush1.bf16.msra.mxu0 %v11029_v32 }
 0x1de   :  { %2906 = vmatpush1.bf16.msra.mxu1 %v11032_v33  ;;  %2866 = vmatprep.subr.bf16.mxu0 %v11037_v35 }
 0x1df   :  { %2907 = vmatprep.subr.bf16.mxu1 %v11040_v39 }
 0x1e1   :  { %2867 = vmatpush1.bf16.msra.mxu0 %v11035_v40 }
 0x1e2   :  { %2908 = vmatpush1.bf16.msra.mxu1 %v11038_v41  ;;  %2868 = vmatprep.subr.bf16.mxu0 %v11043_v42  ;;  %v11111_v42 = vld [vmem:[#allocation10 + $0x2ec] ss:$16 sps:$4 sm:$0xff]  }
 0x1e3   :  { %2909 = vmatprep.subr.bf16.mxu1 %v11046_v22  ;;  %v11114_v22 = vld [vmem:[#allocation10 + $0x4ec] ss:$16 sps:$4 sm:$0xff]  }
 0x1e5   :  { %2869 = vmatpush1.bf16.msra.mxu0 %v11041_v23  ;;  %v11112_v23 = vld [vmem:[#allocation10 + $0x4e8] ss:$16 sps:$4 sm:$0xff]  }
 0x1e6   :  { %2910 = vmatpush1.bf16.msra.mxu1 %v11044_v44  ;;  %2870 = vmatprep.subr.bf16.mxu0 %v11049_v45  ;;  %v11117_v44 = vld [vmem:[#allocation10 + $0x30c] ss:$16 sps:$4 sm:$0xff]  }
 0x1e7   :  { %2911 = vmatprep.subr.bf16.mxu1 %v11052_v46  ;;  %v11120_v45 = vld [vmem:[#allocation10 + $0x50c] ss:$16 sps:$4 sm:$0xff]   ;;  %v11118_v46 = vld [vmem:[#allocation10 + $0x508] ss:$16 sps:$4 sm:$0xff]  }
 0x1e9   :  { %2871 = vmatpush1.bf16.msra.mxu0 %v11047_v48  ;;  %v11123_v48 = vld [vmem:[#allocation10 + $0x32c] ss:$16 sps:$4 sm:$0xff]  }
 0x1ea   :  { %2912 = vmatpush1.bf16.msra.mxu1 %v11050_v49  ;;  %2872 = vmatprep.subr.bf16.mxu0 %v11055_v50  ;;  %v11126_v49 = vld [vmem:[#allocation10 + $0x52c] ss:$16 sps:$4 sm:$0xff]   ;;  %v11121_v50 = vld [vmem:[#allocation10 + $0x328] ss:$16 sps:$4 sm:$0xff]  }
 0x1eb   :  { %2913 = vmatprep.subr.bf16.mxu1 %v11058_v52  ;;  %v11124_v52 = vld [vmem:[#allocation10 + $0x528] ss:$16 sps:$4 sm:$0xff]  }
 0x1ed   :  { %2873 = vmatpush1.bf16.msra.mxu0 %v11053_v53  ;;  %v11129_v53 = vld [vmem:[#allocation10 + $0x34c] ss:$16 sps:$4 sm:$0xff]  }
 0x1ee   :  { %2914 = vmatpush1.bf16.msra.mxu1 %v11056_v54  ;;  %2874 = vmatprep.subr.bf16.mxu0 %v11061_v55  ;;  %v11132_v54 = vld [vmem:[#allocation10 + $0x54c] ss:$16 sps:$4 sm:$0xff]   ;;  %v11127_v55 = vld [vmem:[#allocation10 + $0x348] ss:$16 sps:$4 sm:$0xff]  }
 0x1ef   :  { %2915 = vmatprep.subr.bf16.mxu1 %v11064_v56  ;;  %v11130_v56 = vld [vmem:[#allocation10 + $0x548] ss:$16 sps:$4 sm:$0xff]  }
 0x1f1   :  { %2875 = vmatpush1.bf16.msra.mxu0 %v11059_v27  ;;  %v11135_v27 = vld [vmem:[#allocation10 + $0x36c] ss:$16 sps:$4 sm:$0xff]  }
 0x1f2   :  { %2916 = vmatpush1.bf16.msra.mxu1 %v11062_v57  ;;  %2926 = vmatprep.subr.bf16.mxu0 %v11069_v58  ;;  %v11138_v57 = vld [vmem:[#allocation10 + $0x56c] ss:$16 sps:$4 sm:$0xff]   ;;  %v11133_v58 = vld [vmem:[#allocation10 + $0x368] ss:$16 sps:$4 sm:$0xff]  }
 0x1f3   :  { %2967 = vmatprep.subr.bf16.mxu1 %v11072_v59  ;;  %v11136_v59 = vld [vmem:[#allocation10 + $0x568] ss:$16 sps:$4 sm:$0xff]  }
 0x1f4   :  { %2877 = vmatmul.mubr.bf16.vlgmr.msra.gmra.mrb[16].mxu0 %v12973_v60 }
 0x1f5   :  { %2918 = vmatmul.mubr.bf16.vlgmr.msra.gmra.mrb[16].mxu1 %v12951_v36  ;;  %2927 = vmatpush1.bf16.msra.mxu0 %v11067_v61  ;;  %v11090_v36 = vld [vmem:[#allocation10 + $0x46c] ss:$16 sps:$4 sm:$0xff]  }
 0x1f6   :  { %2968 = vmatpush1.bf16.msra.mxu1 %v11070_v62  ;;  %2928 = vmatprep.subr.bf16.mxu0 %v11075_v63  ;;  %v11141_v61 = vld [vmem:[#allocation10 + $0x38c] ss:$16 sps:$4 sm:$0xff]   ;;  %v11139_v63 = vld [vmem:[#allocation10 + $0x388] ss:$16 sps:$4 sm:$0xff]  }
 0x1f7   :  { %2969 = vmatprep.subr.bf16.mxu1 %v11078_v0  ;;  %2958 = vmatprep.mubr.bf16.mxu0 %v12943_v28  ;;  %v11091_v28 = vld [vmem:[#allocation10 + $0x288] ss:$16 sps:$4 sm:$0xff]   ;;  %v11144_v62 = vld [vmem:[#allocation10 + $0x58c] ss:$16 sps:$4 sm:$0xff]  }
 0x1f8   :  { %2999 = vmatprep.mubr.bf16.mxu1 %v12961_v43  ;;  %v11094_v43 = vld [vmem:[#allocation10 + $0x488] ss:$16 sps:$4 sm:$0xff]  }
 0x1f9   :  { %2929 = vmatpush1.bf16.msra.mxu0 %v11073_v1  ;;  %v11142_v0 = vld [vmem:[#allocation10 + $0x588] ss:$16 sps:$4 sm:$0xff]   ;;  %v11147_v1 = vld [vmem:[#allocation10 + $0x3ac] ss:$16 sps:$4 sm:$0xff]  }
 0x1fa   :  { %2970 = vmatpush1.bf16.msra.mxu1 %v11076_v2  ;;  %2930 = vmatprep.subr.bf16.mxu0 %v11081_v38  ;;  %v11150_v2 = vld [vmem:[#allocation10 + $0x5ac] ss:$16 sps:$4 sm:$0xff]   ;;  %v11145_v38 = vld [vmem:[#allocation10 + $0x3a8] ss:$16 sps:$4 sm:$0xff]  }
 0x1fb   :  { %2971 = vmatprep.subr.bf16.mxu1 %v11084_v4  ;;  %v11148_v4 = vld [vmem:[#allocation10 + $0x5a8] ss:$16 sps:$4 sm:$0xff]  }
 0x1fd   :  { %2931 = vmatpush1.bf16.msra.mxu0 %v11079_v5  ;;  %v11153_v5 = vld [vmem:[#allocation10 + $0x3cc] ss:$16 sps:$4 sm:$0xff]  }
 0x1fe   :  { %2972 = vmatpush1.bf16.msra.mxu1 %v11082_v9  ;;  %2932 = vmatprep.subr.bf16.mxu0 %v11087_v10  ;;  %v11156_v9 = vld [vmem:[#allocation10 + $0x5cc] ss:$16 sps:$4 sm:$0xff]   ;;  %v11151_v10 = vld [vmem:[#allocation10 + $0x3c8] ss:$16 sps:$4 sm:$0xff]  }
 0x1ff   :  { %2973 = vmatprep.subr.bf16.mxu1 %v11090_v36  ;;  %v11154_v36 = vld [vmem:[#allocation10 + $0x5c8] ss:$16 sps:$4 sm:$0xff]  }
 0x201   :  { %2933 = vmatpush1.bf16.msra.mxu0 %v11085_v11  ;;  %v11159_v11 = vld [vmem:[#allocation10 + $0x3ec] ss:$16 sps:$4 sm:$0xff]  }
 0x202   :  { %2974 = vmatpush1.bf16.msra.mxu1 %v11088_v12  ;;  %2934 = vmatprep.subr.bf16.mxu0 %v11093_v13  ;;  %v11162_v12 = vld [vmem:[#allocation10 + $0x5ec] ss:$16 sps:$4 sm:$0xff]   ;;  %v11157_v13 = vld [vmem:[#allocation10 + $0x3e8] ss:$16 sps:$4 sm:$0xff]  }
 0x203   :  { %2975 = vmatprep.subr.bf16.mxu1 %v11096_v15  ;;  %v11160_v15 = vld [vmem:[#allocation10 + $0x5e8] ss:$16 sps:$4 sm:$0xff]  }
 0x205   :  { %2935 = vmatpush1.bf16.msra.mxu0 %v11091_v28  ;;  %v11165_v28 = vld [vmem:[#allocation10 + $0xc04] ss:$16 sps:$4 sm:$0xff]  }
 0x206   :  { %2976 = vmatpush1.bf16.msra.mxu1 %v11094_v43  ;;  %2936 = vmatprep.subr.bf16.mxu0 %v11099_v16  ;;  %v11168_v43 = vld [vmem:[#allocation10 + $0xe04] ss:$16 sps:$4 sm:$0xff]   ;;  %v12989_v16 = vld [vmem:[#allocation7] sm:$0xff] }
 0x207   :  { %2977 = vmatprep.subr.bf16.mxu1 %v11102_v17  ;;  %v1651_v24 = vpop.f32.mrb[4].mxu0  ;;  %v11163_v17 = vld [vmem:[#allocation10 + $0xc00] ss:$16 sps:$4 sm:$0xff]  }
 0x208   :  { %v12979_v25 = vpop.f32.mrb[4].mxu1  ;;  %v12982_v30 = vadd.f32 %v1651_v24, %v12967_v3  ;;  %v1653_v31 = vpop.f32.mrb[5].mxu0  ;;  %v11109_v3 = vld [vmem:[#allocation10 + $0x2e8] ss:$16 sps:$4 sm:$0xff]   ;;  %v12995_v24 = vcombine.high %v12989_v16, %v12989_v16 }
 0x209   :  { %v12984_v32 = vpop.f32.mrb[5].mxu1  ;;  %v12987_v33 = vadd.f32 %v1653_v31, %v12969_v8  ;;  %v1655_v35 = vpop.f32.mrb[6].mxu0  ;;  %2937 = vmatpush1.bf16.msra.mxu0 %v11097_v18  ;;  %v11115_v8 = vld [vmem:[#allocation10 + $0x308] ss:$16 sps:$4 sm:$0xff]   ;;  %v11166_v18 = vld [vmem:[#allocation10 + $0xe00] ss:$16 sps:$4 sm:$0xff]  }
 0x20a   :  { %v1696_v39 = vpop.f32.mrb[6].mxu1  ;;  %2978 = vmatpush1.bf16.msra.mxu1 %v11100_v19  ;;  %v1656_v40 = vpop.f32.mrb[7].mxu0  ;;  %2938 = vmatprep.subr.bf16.mxu0 %v11105_v20  ;;  %v12991_v19 = vld [vmem:[#allocation7 + $0x8] sm:$0xff] }
 0x20b   :  { %v1697_v41 = vpop.f32.mrb[7].mxu1  ;;  %2979 = vmatprep.subr.bf16.mxu1 %v11108_v21  ;;  %v11171_v20 = vld [vmem:[#allocation10 + $0xc24] ss:$16 sps:$4 sm:$0xff]   ;;  %v11172_v31 = vld [vmem:[#allocation10 + $0xe20] ss:$16 sps:$4 sm:$0xff]  }
 0x20c   :  { %v11174_v21 = vld [vmem:[#allocation10 + $0xe24] ss:$16 sps:$4 sm:$0xff]   ;;  %v11175_v40 = vld [vmem:[#allocation10 + $0xc40] ss:$16 sps:$4 sm:$0xff]  }
 0x20d   :  { %2939 = vmatpush1.bf16.msra.mxu0 %v11103_v26  ;;  %v12999_v26 = vcombine.high %v12991_v19, %v12991_v19  ;;  %v11177_v35 = vld [vmem:[#allocation10 + $0xc44] ss:$16 sps:$4 sm:$0xff]   ;;  %v11178_v41 = vld [vmem:[#allocation10 + $0xe40] ss:$16 sps:$4 sm:$0xff]  }
 0x20e   :  { %2980 = vmatpush1.bf16.msra.mxu1 %v11106_v29  ;;  %2940 = vmatprep.subr.bf16.mxu0 %v11111_v42  ;;  %v11169_v29 = vld [vmem:[#allocation10 + $0xc20] ss:$16 sps:$4 sm:$0xff]   ;;  %v11180_v39 = vld [vmem:[#allocation10 + $0xe44] ss:$16 sps:$4 sm:$0xff]  }
 0x20f   :  { %2981 = vmatprep.subr.bf16.mxu1 %v11114_v22  ;;  %v11181_v42 = vld [vmem:[#allocation10 + $0xc60] ss:$16 sps:$4 sm:$0xff]  }
 0x210   :  { %v11184_v22 = vld [vmem:[#allocation10 + $0xe60] ss:$16 sps:$4 sm:$0xff]  }
 0x211   :  { %2941 = vmatpush1.bf16.msra.mxu0 %v11109_v3  ;;  %v11189_v3 = vld [vmem:[#allocation10 + $0xc84] ss:$16 sps:$4 sm:$0xff]  }
 0x212   :  { %2982 = vmatpush1.bf16.msra.mxu1 %v11112_v23  ;;  %2942 = vmatprep.subr.bf16.mxu0 %v11117_v44  ;;  %v11192_v23 = vld [vmem:[#allocation10 + $0xe84] ss:$16 sps:$4 sm:$0xff]   ;;  %v11187_v44 = vld [vmem:[#allocation10 + $0xc80] ss:$16 sps:$4 sm:$0xff]  }
 0x213   :  { %2983 = vmatprep.subr.bf16.mxu1 %v11120_v45  ;;  %v11190_v45 = vld [vmem:[#allocation10 + $0xe80] ss:$16 sps:$4 sm:$0xff]  }
 0x215   :  { %2943 = vmatpush1.bf16.msra.mxu0 %v11115_v8  ;;  %v11195_v8 = vld [vmem:[#allocation10 + $0xca4] ss:$16 sps:$4 sm:$0xff]  }
 0x216   :  { %2984 = vmatpush1.bf16.msra.mxu1 %v11118_v46  ;;  %2944 = vmatprep.subr.bf16.mxu0 %v11123_v48  ;;  %v11198_v46 = vld [vmem:[#allocation10 + $0xea4] ss:$16 sps:$4 sm:$0xff]   ;;  %v11193_v48 = vld [vmem:[#allocation10 + $0xca0] ss:$16 sps:$4 sm:$0xff]  }
 0x217   :  { %2985 = vmatprep.subr.bf16.mxu1 %v11126_v49  ;;  %v11196_v49 = vld [vmem:[#allocation10 + $0xea0] ss:$16 sps:$4 sm:$0xff]  }
 0x219   :  { %2945 = vmatpush1.bf16.msra.mxu0 %v11121_v50  ;;  %v11201_v50 = vld [vmem:[#allocation10 + $0xcc4] ss:$16 sps:$4 sm:$0xff]  }
 0x21a   :  { %2986 = vmatpush1.bf16.msra.mxu1 %v11124_v52  ;;  %2946 = vmatprep.subr.bf16.mxu0 %v11129_v53  ;;  %v11204_v52 = vld [vmem:[#allocation10 + $0xec4] ss:$16 sps:$4 sm:$0xff]  }
 0x21b   :  { %2987 = vmatprep.subr.bf16.mxu1 %v11132_v54 }
 0x21d   :  { %2947 = vmatpush1.bf16.msra.mxu0 %v11127_v55  ;;  %v11199_v55 = vld [vmem:[#allocation10 + $0xcc0] ss:$16 sps:$4 sm:$0xff]  }
 0x21e   :  { %2988 = vmatpush1.bf16.msra.mxu1 %v11130_v56  ;;  %2948 = vmatprep.subr.bf16.mxu0 %v11135_v27  ;;  %v11202_v56 = vld [vmem:[#allocation10 + $0xec0] ss:$16 sps:$4 sm:$0xff]  }
 0x21f   :  { %2989 = vmatprep.subr.bf16.mxu1 %v11138_v57 }
 0x221   :  { %2949 = vmatpush1.bf16.msra.mxu0 %v11133_v58 }
 0x222   :  { %2990 = vmatpush1.bf16.msra.mxu1 %v11136_v59  ;;  %2950 = vmatprep.subr.bf16.mxu0 %v11141_v61 }
 0x223   :  { %2991 = vmatprep.subr.bf16.mxu1 %v11144_v62 }
 0x225   :  { %2951 = vmatpush1.bf16.msra.mxu0 %v11139_v63 }
 0x226   :  { %2992 = vmatpush1.bf16.msra.mxu1 %v11142_v0  ;;  %2952 = vmatprep.subr.bf16.mxu0 %v11147_v1 }
 0x227   :  { %2993 = vmatprep.subr.bf16.mxu1 %v11150_v2  ;;  %v11207_v2 = vld [vmem:[#allocation10 + $0xce4] ss:$16 sps:$4 sm:$0xff]  }
 0x229   :  { %2953 = vmatpush1.bf16.msra.mxu0 %v11145_v38  ;;  %v11210_v38 = vld [vmem:[#allocation10 + $0xee4] ss:$16 sps:$4 sm:$0xff]  }
 0x22a   :  { %2994 = vmatpush1.bf16.msra.mxu1 %v11148_v4  ;;  %2954 = vmatprep.subr.bf16.mxu0 %v11153_v5  ;;  %v11208_v5 = vld [vmem:[#allocation10 + $0xee0] ss:$16 sps:$4 sm:$0xff]  }
 0x22b   :  { %2995 = vmatprep.subr.bf16.mxu1 %v11156_v9  ;;  %v11216_v9 = vld [vmem:[#allocation10 + $0xf04] ss:$16 sps:$4 sm:$0xff]  }
 0x22d   :  { %2955 = vmatpush1.bf16.msra.mxu0 %v11151_v10  ;;  %v11211_v10 = vld [vmem:[#allocation10 + $0xd00] ss:$16 sps:$4 sm:$0xff]  }
 0x22e   :  { %2996 = vmatpush1.bf16.msra.mxu1 %v11154_v36  ;;  %2956 = vmatprep.subr.bf16.mxu0 %v11159_v11  ;;  %v11214_v36 = vld [vmem:[#allocation10 + $0xf00] ss:$16 sps:$4 sm:$0xff]   ;;  %v11219_v11 = vld [vmem:[#allocation10 + $0xd24] ss:$16 sps:$4 sm:$0xff]  }
 0x22f   :  { %2997 = vmatprep.subr.bf16.mxu1 %v11162_v12  ;;  %v11222_v12 = vld [vmem:[#allocation10 + $0xf24] ss:$16 sps:$4 sm:$0xff]  }
 0x231   :  { %2957 = vmatpush1.bf16.msra.mxu0 %v11157_v13  ;;  %v11217_v13 = vld [vmem:[#allocation10 + $0xd20] ss:$16 sps:$4 sm:$0xff]  }
 0x232   :  { %2998 = vmatpush1.bf16.msra.mxu1 %v11160_v15  ;;  %4181 = vmatprep.subr.bf16.mxu0 %v11165_v28  ;;  %v11220_v15 = vld [vmem:[#allocation10 + $0xf20] ss:$16 sps:$4 sm:$0xff]   ;;  %v11225_v28 = vld [vmem:[#allocation10 + $0xd44] ss:$16 sps:$4 sm:$0xff]  }
 0x233   :  { %4222 = vmatprep.subr.bf16.mxu1 %v11168_v43  ;;  %v11228_v43 = vld [vmem:[#allocation10 + $0xf44] ss:$16 sps:$4 sm:$0xff]  }
 0x234   :  { %2959 = vmatmul.mubr.bf16.vlgmr.msra.gmra.mrb[20].mxu0 %v12955_v37  ;;  %v11183_v37 = vld [vmem:[#allocation10 + $0xc64] ss:$16 sps:$4 sm:$0xff]  }
 0x235   :  { %3000 = vmatmul.mubr.bf16.vlgmr.msra.gmra.mrb[20].mxu1 %v12973_v60  ;;  %4182 = vmatpush1.bf16.msra.mxu0 %v11163_v17  ;;  %v11186_v60 = vld [vmem:[#allocation10 + $0xe64] ss:$16 sps:$4 sm:$0xff]   ;;  %v11223_v17 = vld [vmem:[#allocation10 + $0xd40] ss:$16 sps:$4 sm:$0xff]  }
 0x236   :  { %4223 = vmatpush1.bf16.msra.mxu1 %v11166_v18  ;;  %4183 = vmatprep.subr.bf16.mxu0 %v11171_v20  ;;  %v11226_v18 = vld [vmem:[#allocation10 + $0xf40] ss:$16 sps:$4 sm:$0xff]   ;;  %v11231_v20 = vld [vmem:[#allocation10 + $0xd64] ss:$16 sps:$4 sm:$0xff]  }
 0x237   :  { %4224 = vmatprep.subr.bf16.mxu1 %v11174_v21  ;;  %4213 = vmatprep.mubr.bf16.mxu0 %v12995_v24  ;;  %v11234_v21 = vld [vmem:[#allocation10 + $0xf64] ss:$16 sps:$4 sm:$0xff]  }
 0x238   :  { %4254 = vmatprep.mubr.bf16.mxu1 %v12999_v26 }
 0x239   :  { %4184 = vmatpush1.bf16.msra.mxu0 %v11169_v29  ;;  %v11229_v29 = vld [vmem:[#allocation10 + $0xd60] ss:$16 sps:$4 sm:$0xff]  }
 0x23a   :  { %4225 = vmatpush1.bf16.msra.mxu1 %v11172_v31  ;;  %4185 = vmatprep.subr.bf16.mxu0 %v11177_v35  ;;  %v11232_v31 = vld [vmem:[#allocation10 + $0xf60] ss:$16 sps:$4 sm:$0xff]   ;;  %v11237_v35 = vld [vmem:[#allocation10 + $0xd84] ss:$16 sps:$4 sm:$0xff]  }
 0x23b   :  { %4226 = vmatprep.subr.bf16.mxu1 %v11180_v39  ;;  %v11240_v39 = vld [vmem:[#allocation10 + $0xf84] ss:$16 sps:$4 sm:$0xff]  }
 0x23d   :  { %4186 = vmatpush1.bf16.msra.mxu0 %v11175_v40  ;;  %v11235_v40 = vld [vmem:[#allocation10 + $0xd80] ss:$16 sps:$4 sm:$0xff]  }
 0x23e   :  { %4227 = vmatpush1.bf16.msra.mxu1 %v11178_v41  ;;  %4187 = vmatprep.subr.bf16.mxu0 %v11183_v37  ;;  %v11238_v41 = vld [vmem:[#allocation10 + $0xf80] ss:$16 sps:$4 sm:$0xff]   ;;  %v11243_v37 = vld [vmem:[#allocation10 + $0xda4] ss:$16 sps:$4 sm:$0xff]  }
 0x23f   :  { %4228 = vmatprep.subr.bf16.mxu1 %v11186_v60  ;;  %v11246_v60 = vld [vmem:[#allocation10 + $0xfa4] ss:$16 sps:$4 sm:$0xff]  }
 0x241   :  { %4188 = vmatpush1.bf16.msra.mxu0 %v11181_v42  ;;  %v11241_v42 = vld [vmem:[#allocation10 + $0xda0] ss:$16 sps:$4 sm:$0xff]  }
 0x242   :  { %4229 = vmatpush1.bf16.msra.mxu1 %v11184_v22  ;;  %4189 = vmatprep.subr.bf16.mxu0 %v11189_v3  ;;  %v11244_v22 = vld [vmem:[#allocation10 + $0xfa0] ss:$16 sps:$4 sm:$0xff]   ;;  %v11249_v3 = vld [vmem:[#allocation10 + $0xdc4] ss:$16 sps:$4 sm:$0xff]  }
 0x243   :  { %4230 = vmatprep.subr.bf16.mxu1 %v11192_v23  ;;  %v11252_v23 = vld [vmem:[#allocation10 + $0xfc4] ss:$16 sps:$4 sm:$0xff]  }
 0x245   :  { %4190 = vmatpush1.bf16.msra.mxu0 %v11187_v44  ;;  %v11247_v44 = vld [vmem:[#allocation10 + $0xdc0] ss:$16 sps:$4 sm:$0xff]  }
 0x246   :  { %4231 = vmatpush1.bf16.msra.mxu1 %v11190_v45  ;;  %4191 = vmatprep.subr.bf16.mxu0 %v11195_v8  ;;  %v11250_v45 = vld [vmem:[#allocation10 + $0xfc0] ss:$16 sps:$4 sm:$0xff]   ;;  %v11255_v8 = vld [vmem:[#allocation10 + $0xde4] ss:$16 sps:$4 sm:$0xff]  }
 0x247   :  { %4232 = vmatprep.subr.bf16.mxu1 %v11198_v46  ;;  %v1733_v53 = vpop.f32.mrb[8].mxu0  ;;  %v11258_v46 = vld [vmem:[#allocation10 + $0xfe4] ss:$16 sps:$4 sm:$0xff]  }
 0x248   :  { %v1774_v54 = vpop.f32.mrb[8].mxu1  ;;  %v1734_v27 = vadd.f32 %v1733_v53, %v12979_v25  ;;  %v1735_v57 = vpop.f32.mrb[9].mxu0  ;;  %v11205_v25 = vld [vmem:[#allocation10 + $0xce0] ss:$16 sps:$4 sm:$0xff]   ;;  %v13011_v53 = vld [vmem:[#allocation7 + $0x10] sm:$0xff] }
 0x249   :  { %v1776_v58 = vpop.f32.mrb[9].mxu1  ;;  %v1736_v59 = vadd.f32 %v1735_v57, %v12984_v32  ;;  %v1737_v61 = vpop.f32.mrb[10].mxu0  ;;  %4192 = vmatpush1.bf16.msra.mxu0 %v11193_v48  ;;  %v11213_v32 = vld [vmem:[#allocation10 + $0xd04] ss:$16 sps:$4 sm:$0xff]   ;;  %v11253_v48 = vld [vmem:[#allocation10 + $0xde0] ss:$16 sps:$4 sm:$0xff]  }
 0x24a   :  { %v1778_v62 = vpop.f32.mrb[10].mxu1  ;;  %4233 = vmatpush1.bf16.msra.mxu1 %v11196_v49  ;;  %v13007_v63 = vadd.f32 %v1774_v54, %v1734_v27  ;;  %v1738_v0 = vpop.f32.mrb[11].mxu0  ;;  %4193 = vmatprep.subr.bf16.mxu0 %v11201_v50  ;;  %v11256_v49 = vld [vmem:[#allocation10 + $0xfe0] ss:$16 sps:$4 sm:$0xff]   ;;  %v11265_v50 = vld [vmem:[#allocation10 + $0x1004] ss:$16 sps:$4 sm:$0xff]   ;;  %v13019_v27 = vcombine.low %v12991_v19, %v12991_v19 }
 0x24b   :  { %v1779_v1 = vpop.f32.mrb[11].mxu1  ;;  %4234 = vmatprep.subr.bf16.mxu1 %v11204_v52  ;;  %v13009_v4 = vadd.f32 %v1776_v58, %v1736_v59  ;;  %v11268_v52 = vld [vmem:[#allocation10 + $0xc0c] ss:$16 sps:$4 sm:$0xff]   ;;  %v11263_v54 = vld [vmem:[#allocation10 + $0x1000] ss:$16 sps:$4 sm:$0xff]   ;;  %v13023_v59 = vcombine.high %v13011_v53, %v13011_v53 }
 0x24c   :  { %v11271_v57 = vld [vmem:[#allocation10 + $0x1024] ss:$16 sps:$4 sm:$0xff]   ;;  %v11274_v58 = vld [vmem:[#allocation10 + $0xc2c] ss:$16 sps:$4 sm:$0xff]   ;;  %v11272_v61 = vld [vmem:[#allocation10 + $0xc28] ss:$16 sps:$4 sm:$0xff]  }
 0x24d   :  { %4194 = vmatpush1.bf16.msra.mxu0 %v11199_v55  ;;  %v11266_v55 = vld [vmem:[#allocation10 + $0xc08] ss:$16 sps:$4 sm:$0xff]   ;;  %v11277_v19 = vld [vmem:[#allocation10 + $0x1044] ss:$16 sps:$4 sm:$0xff]   ;;  %v11280_v62 = vld [vmem:[#allocation10 + $0xc4c] ss:$16 sps:$4 sm:$0xff]  }
 0x24e   :  { %4235 = vmatpush1.bf16.msra.mxu1 %v11202_v56  ;;  %4195 = vmatprep.subr.bf16.mxu0 %v11207_v2  ;;  %v13015_v56 = vcombine.low %v12989_v16, %v12989_v16  ;;  %v11269_v16 = vld [vmem:[#allocation10 + $0x1020] ss:$16 sps:$4 sm:$0xff]   ;;  %v11278_v1 = vld [vmem:[#allocation10 + $0xc48] ss:$16 sps:$4 sm:$0xff]   ;;  %v11283_v2 = vld [vmem:[#allocation10 + $0x1064] ss:$16 sps:$4 sm:$0xff]  }
 0x24f   :  { %4236 = vmatprep.subr.bf16.mxu1 %v11210_v38  ;;  %v11275_v0 = vld [vmem:[#allocation10 + $0x1040] ss:$16 sps:$4 sm:$0xff]   ;;  %v11286_v38 = vld [vmem:[#allocation10 + $0xc6c] ss:$16 sps:$4 sm:$0xff]  }
 0x251   :  { %4196 = vmatpush1.bf16.msra.mxu0 %v11205_v25  ;;  %v11281_v25 = vld [vmem:[#allocation10 + $0x1060] ss:$16 sps:$4 sm:$0xff]  }
 0x252   :  { %4237 = vmatpush1.bf16.msra.mxu1 %v11208_v5  ;;  %4197 = vmatprep.subr.bf16.mxu0 %v11213_v32  ;;  %v11284_v5 = vld [vmem:[#allocation10 + $0xc68] ss:$16 sps:$4 sm:$0xff]   ;;  %v11289_v32 = vld [vmem:[#allocation10 + $0x1084] ss:$16 sps:$4 sm:$0xff]  }
 0x253   :  { %4238 = vmatprep.subr.bf16.mxu1 %v11216_v9  ;;  %v11292_v9 = vld [vmem:[#allocation10 + $0xc8c] ss:$16 sps:$4 sm:$0xff]  }
 0x255   :  { %4198 = vmatpush1.bf16.msra.mxu0 %v11211_v10  ;;  %v11287_v10 = vld [vmem:[#allocation10 + $0x1080] ss:$16 sps:$4 sm:$0xff]  }
 0x256   :  { %4239 = vmatpush1.bf16.msra.mxu1 %v11214_v36  ;;  %4199 = vmatprep.subr.bf16.mxu0 %v11219_v11  ;;  %v11290_v36 = vld [vmem:[#allocation10 + $0xc88] ss:$16 sps:$4 sm:$0xff]   ;;  %v11295_v11 = vld [vmem:[#allocation10 + $0x10a4] ss:$16 sps:$4 sm:$0xff]  }
 0x257   :  { %4240 = vmatprep.subr.bf16.mxu1 %v11222_v12  ;;  %v11298_v12 = vld [vmem:[#allocation10 + $0xcac] ss:$16 sps:$4 sm:$0xff]  }
 0x259   :  { %4200 = vmatpush1.bf16.msra.mxu0 %v11217_v13  ;;  %v11293_v13 = vld [vmem:[#allocation10 + $0x10a0] ss:$16 sps:$4 sm:$0xff]  }
 0x25a   :  { %4241 = vmatpush1.bf16.msra.mxu1 %v11220_v15  ;;  %4201 = vmatprep.subr.bf16.mxu0 %v11225_v28  ;;  %v11296_v15 = vld [vmem:[#allocation10 + $0xca8] ss:$16 sps:$4 sm:$0xff]   ;;  %v11301_v28 = vld [vmem:[#allocation10 + $0x10c4] ss:$16 sps:$4 sm:$0xff]  }
 0x25b   :  { %4242 = vmatprep.subr.bf16.mxu1 %v11228_v43  ;;  %v11304_v43 = vld [vmem:[#allocation10 + $0xccc] ss:$16 sps:$4 sm:$0xff]  }
 0x25d   :  { %4202 = vmatpush1.bf16.msra.mxu0 %v11223_v17 }
 0x25e   :  { %4243 = vmatpush1.bf16.msra.mxu1 %v11226_v18  ;;  %4203 = vmatprep.subr.bf16.mxu0 %v11231_v20  ;;  %v11299_v20 = vld [vmem:[#allocation10 + $0x10c0] ss:$16 sps:$4 sm:$0xff]  }
 0x25f   :  { %4244 = vmatprep.subr.bf16.mxu1 %v11234_v21  ;;  %v11302_v21 = vld [vmem:[#allocation10 + $0xcc8] ss:$16 sps:$4 sm:$0xff]  }
 0x261   :  { %4204 = vmatpush1.bf16.msra.mxu0 %v11229_v29 }
 0x262   :  { %4245 = vmatpush1.bf16.msra.mxu1 %v11232_v31  ;;  %4205 = vmatprep.subr.bf16.mxu0 %v11237_v35 }
 0x263   :  { %4246 = vmatprep.subr.bf16.mxu1 %v11240_v39 }
 0x265   :  { %4206 = vmatpush1.bf16.msra.mxu0 %v11235_v40 }
 0x266   :  { %4247 = vmatpush1.bf16.msra.mxu1 %v11238_v41  ;;  %4207 = vmatprep.subr.bf16.mxu0 %v11243_v37 }
 0x267   :  { %4248 = vmatprep.subr.bf16.mxu1 %v11246_v60 }
 0x269   :  { %4208 = vmatpush1.bf16.msra.mxu0 %v11241_v42 }
 0x26a   :  { %4249 = vmatpush1.bf16.msra.mxu1 %v11244_v22  ;;  %4209 = vmatprep.subr.bf16.mxu0 %v11249_v3  ;;  %v11307_v22 = vld [vmem:[#allocation10 + $0x10e4] ss:$16 sps:$4 sm:$0xff]   ;;  %v11310_v3 = vld [vmem:[#allocation10 + $0xcec] ss:$16 sps:$4 sm:$0xff]  }
 0x26b   :  { %4250 = vmatprep.subr.bf16.mxu1 %v11252_v23 }
 0x26d   :  { %4210 = vmatpush1.bf16.msra.mxu0 %v11247_v44  ;;  %v11308_v44 = vld [vmem:[#allocation10 + $0xce8] ss:$16 sps:$4 sm:$0xff]  }
 0x26e   :  { %4251 = vmatpush1.bf16.msra.mxu1 %v11250_v45  ;;  %4211 = vmatprep.subr.bf16.mxu0 %v11255_v8  ;;  %v11316_v45 = vld [vmem:[#allocation10 + $0xd0c] ss:$16 sps:$4 sm:$0xff]   ;;  %v11311_v8 = vld [vmem:[#allocation10 + $0x1100] ss:$16 sps:$4 sm:$0xff]  }
 0x26f   :  { %4252 = vmatprep.subr.bf16.mxu1 %v11258_v46  ;;  %v11314_v46 = vld [vmem:[#allocation10 + $0xd08] ss:$16 sps:$4 sm:$0xff]  }
 0x271   :  { %4212 = vmatpush1.bf16.msra.mxu0 %v11253_v48  ;;  %v11319_v48 = vld [vmem:[#allocation10 + $0x1124] ss:$16 sps:$4 sm:$0xff]  }
 0x272   :  { %4253 = vmatpush1.bf16.msra.mxu1 %v11256_v49  ;;  %4263 = vmatprep.subr.bf16.mxu0 %v11265_v50  ;;  %v11322_v49 = vld [vmem:[#allocation10 + $0xd2c] ss:$16 sps:$4 sm:$0xff]   ;;  %v11317_v50 = vld [vmem:[#allocation10 + $0x1120] ss:$16 sps:$4 sm:$0xff]  }
 0x273   :  { %4304 = vmatprep.subr.bf16.mxu1 %v11268_v52  ;;  %v11320_v52 = vld [vmem:[#allocation10 + $0xd28] ss:$16 sps:$4 sm:$0xff]  }
 0x274   :  { %4214 = vmatmul.mubr.bf16.vlgmr.msra.gmra.mrb[24].mxu0 %v13015_v56 }
 0x275   :  { %4255 = vmatmul.mubr.bf16.vlgmr.msra.gmra.mrb[24].mxu1 %v13019_v27  ;;  %4264 = vmatpush1.bf16.msra.mxu0 %v11263_v54  ;;  %v11325_v54 = vld [vmem:[#allocation10 + $0x1144] ss:$16 sps:$4 sm:$0xff]  }
 0x276   :  { %4305 = vmatpush1.bf16.msra.mxu1 %v11266_v55  ;;  %4265 = vmatprep.subr.bf16.mxu0 %v11271_v57  ;;  %v11328_v55 = vld [vmem:[#allocation10 + $0xd4c] ss:$16 sps:$4 sm:$0xff]   ;;  %v11323_v57 = vld [vmem:[#allocation10 + $0x1140] ss:$16 sps:$4 sm:$0xff]  }
 0x277   :  { %4306 = vmatprep.subr.bf16.mxu1 %v11274_v58  ;;  %4295 = vmatprep.mubr.bf16.mxu0 %v13023_v59  ;;  %v11326_v58 = vld [vmem:[#allocation10 + $0xd48] ss:$16 sps:$4 sm:$0xff]  }
 0x278   :  { %4336 = vmatprep.mubr.bf16.mxu1 %v12995_v24 }
 0x279   :  { %4266 = vmatpush1.bf16.msra.mxu0 %v11269_v16  ;;  %v11331_v16 = vld [vmem:[#allocation10 + $0x1164] ss:$16 sps:$4 sm:$0xff]  }
 0x27a   :  { %4307 = vmatpush1.bf16.msra.mxu1 %v11272_v61  ;;  %4267 = vmatprep.subr.bf16.mxu0 %v11277_v19  ;;  %v11334_v61 = vld [vmem:[#allocation10 + $0xd6c] ss:$16 sps:$4 sm:$0xff]   ;;  %v11329_v19 = vld [vmem:[#allocation10 + $0x1160] ss:$16 sps:$4 sm:$0xff]  }
 0x27b   :  { %4308 = vmatprep.subr.bf16.mxu1 %v11280_v62  ;;  %v11332_v62 = vld [vmem:[#allocation10 + $0xd68] ss:$16 sps:$4 sm:$0xff]  }
 0x27d   :  { %4268 = vmatpush1.bf16.msra.mxu0 %v11275_v0  ;;  %v11337_v0 = vld [vmem:[#allocation10 + $0x1184] ss:$16 sps:$4 sm:$0xff]  }
 0x27e   :  { %4309 = vmatpush1.bf16.msra.mxu1 %v11278_v1  ;;  %4269 = vmatprep.subr.bf16.mxu0 %v11283_v2  ;;  %v11340_v1 = vld [vmem:[#allocation10 + $0xd8c] ss:$16 sps:$4 sm:$0xff]   ;;  %v11335_v2 = vld [vmem:[#allocation10 + $0x1180] ss:$16 sps:$4 sm:$0xff]  }
 0x27f   :  { %4310 = vmatprep.subr.bf16.mxu1 %v11286_v38  ;;  %v11338_v38 = vld [vmem:[#allocation10 + $0xd88] ss:$16 sps:$4 sm:$0xff]  }
 0x281   :  { %4270 = vmatpush1.bf16.msra.mxu0 %v11281_v25  ;;  %v11343_v25 = vld [vmem:[#allocation10 + $0x11a4] ss:$16 sps:$4 sm:$0xff]  }
 0x282   :  { %4311 = vmatpush1.bf16.msra.mxu1 %v11284_v5  ;;  %4271 = vmatprep.subr.bf16.mxu0 %v11289_v32  ;;  %v11346_v5 = vld [vmem:[#allocation10 + $0xdac] ss:$16 sps:$4 sm:$0xff]   ;;  %v11341_v32 = vld [vmem:[#allocation10 + $0x11a0] ss:$16 sps:$4 sm:$0xff]  }
 0x283   :  { %4312 = vmatprep.subr.bf16.mxu1 %v11292_v9  ;;  %v11344_v9 = vld [vmem:[#allocation10 + $0xda8] ss:$16 sps:$4 sm:$0xff]  }
 0x285   :  { %4272 = vmatpush1.bf16.msra.mxu0 %v11287_v10  ;;  %v11349_v10 = vld [vmem:[#allocation10 + $0x11c4] ss:$16 sps:$4 sm:$0xff]  }
 0x286   :  { %4313 = vmatpush1.bf16.msra.mxu1 %v11290_v36  ;;  %4273 = vmatprep.subr.bf16.mxu0 %v11295_v11  ;;  %v11352_v36 = vld [vmem:[#allocation10 + $0xdcc] ss:$16 sps:$4 sm:$0xff]   ;;  %v11347_v11 = vld [vmem:[#allocation10 + $0x11c0] ss:$16 sps:$4 sm:$0xff]  }
 0x287   :  { %4314 = vmatprep.subr.bf16.mxu1 %v11298_v12  ;;  %v2796_v17 = vpop.f32.mrb[12].mxu0  ;;  %v11350_v12 = vld [vmem:[#allocation10 + $0xdc8] ss:$16 sps:$4 sm:$0xff]  }
 0x288   :  { %v2837_v18 = vpop.f32.mrb[12].mxu1  ;;  %v2797_v29 = vadd.f32 %v2796_v17, %v12982_v30  ;;  %v2798_v31 = vpop.f32.mrb[13].mxu0  ;;  %v11305_v30 = vld [vmem:[#allocation10 + $0x10e0] ss:$16 sps:$4 sm:$0xff]   ;;  %v11363_v17 = vld [vmem:[#allocation10 + $0xe0c] ss:$16 sps:$4 sm:$0xff]  }
 0x289   :  { %v2839_v35 = vpop.f32.mrb[13].mxu1  ;;  %v2799_v39 = vadd.f32 %v2798_v31, %v12987_v33  ;;  %v2800_v40 = vpop.f32.mrb[14].mxu0  ;;  %4274 = vmatpush1.bf16.msra.mxu0 %v11293_v13  ;;  %v11313_v33 = vld [vmem:[#allocation10 + $0x1104] ss:$16 sps:$4 sm:$0xff]   ;;  %v11369_v31 = vld [vmem:[#allocation10 + $0xe2c] ss:$16 sps:$4 sm:$0xff]  }
 0x28a   :  { %v2841_v41 = vpop.f32.mrb[14].mxu1  ;;  %4315 = vmatpush1.bf16.msra.mxu1 %v11296_v15  ;;  %v13031_v37 = vadd.f32 %v2837_v18, %v2797_v29  ;;  %v2801_v60 = vpop.f32.mrb[15].mxu0  ;;  %4275 = vmatprep.subr.bf16.mxu0 %v11301_v28  ;;  %v11355_v13 = vld [vmem:[#allocation10 + $0x11e4] ss:$16 sps:$4 sm:$0xff]   ;;  %v11358_v15 = vld [vmem:[#allocation10 + $0xdec] ss:$16 sps:$4 sm:$0xff]  }
 0x28b   :  { %v2842_v42 = vpop.f32.mrb[15].mxu1  ;;  %4316 = vmatprep.subr.bf16.mxu1 %v11304_v43  ;;  %v13033_v23 = vadd.f32 %v2839_v35, %v2799_v39  ;;  %v11353_v28 = vld [vmem:[#allocation10 + $0x11e0] ss:$16 sps:$4 sm:$0xff]   ;;  %v11356_v43 = vld [vmem:[#allocation10 + $0xde8] ss:$16 sps:$4 sm:$0xff]  }
 0x28c   :  { %v11366_v18 = vld [vmem:[#allocation10 + $0x100c] ss:$16 sps:$4 sm:$0xff]   ;;  %v11364_v29 = vld [vmem:[#allocation10 + $0x1008] ss:$16 sps:$4 sm:$0xff]  }
 0x28d   :  { %4276 = vmatpush1.bf16.msra.mxu0 %v11299_v20  ;;  %v13037_v20 = vcombine.low %v13011_v53, %v13011_v53  ;;  %v11372_v35 = vld [vmem:[#allocation10 + $0x102c] ss:$16 sps:$4 sm:$0xff]   ;;  %v11367_v39 = vld [vmem:[#allocation10 + $0xe28] ss:$16 sps:$4 sm:$0xff]  }
 0x28e   :  { %4317 = vmatpush1.bf16.msra.mxu1 %v11302_v21  ;;  %4277 = vmatprep.subr.bf16.mxu0 %v11307_v22  ;;  %v11361_v21 = vld [vmem:[#allocation10 + $0xe08] ss:$16 sps:$4 sm:$0xff]   ;;  %v11375_v53 = vld [vmem:[#allocation10 + $0xe4c] ss:$16 sps:$4 sm:$0xff]  }
 0x28f   :  { %4318 = vmatprep.subr.bf16.mxu1 %v11310_v3  ;;  %v11370_v40 = vld [vmem:[#allocation10 + $0x1028] ss:$16 sps:$4 sm:$0xff]   ;;  %v11378_v41 = vld [vmem:[#allocation10 + $0x104c] ss:$16 sps:$4 sm:$0xff]  }
 0x290   :  { %v11373_v60 = vld [vmem:[#allocation10 + $0xe48] ss:$16 sps:$4 sm:$0xff]   ;;  %v11381_v22 = vld [vmem:[#allocation10 + $0xe6c] ss:$16 sps:$4 sm:$0xff]  }
 0x291   :  { %4278 = vmatpush1.bf16.msra.mxu0 %v11305_v30  ;;  %v11376_v42 = vld [vmem:[#allocation10 + $0x1048] ss:$16 sps:$4 sm:$0xff]   ;;  %v11384_v3 = vld [vmem:[#allocation10 + $0x106c] ss:$16 sps:$4 sm:$0xff]  }
 0x292   :  { %4319 = vmatpush1.bf16.msra.mxu1 %v11308_v44  ;;  %4279 = vmatprep.subr.bf16.mxu0 %v11313_v33  ;;  %v11379_v30 = vld [vmem:[#allocation10 + $0xe68] ss:$16 sps:$4 sm:$0xff]   ;;  %v11387_v33 = vld [vmem:[#allocation10 + $0xe8c] ss:$16 sps:$4 sm:$0xff]  }
 0x293   :  { %4320 = vmatprep.subr.bf16.mxu1 %v11316_v45  ;;  %v11382_v44 = vld [vmem:[#allocation10 + $0x1068] ss:$16 sps:$4 sm:$0xff]   ;;  %v11390_v45 = vld [vmem:[#allocation10 + $0x108c] ss:$16 sps:$4 sm:$0xff]  }
 0x295   :  { %4280 = vmatpush1.bf16.msra.mxu0 %v11311_v8  ;;  %v11385_v8 = vld [vmem:[#allocation10 + $0xe88] ss:$16 sps:$4 sm:$0xff]  }
 0x296   :  { %4321 = vmatpush1.bf16.msra.mxu1 %v11314_v46  ;;  %4281 = vmatprep.subr.bf16.mxu0 %v11319_v48  ;;  %v11388_v46 = vld [vmem:[#allocation10 + $0x1088] ss:$16 sps:$4 sm:$0xff]   ;;  %v11393_v48 = vld [vmem:[#allocation10 + $0xeac] ss:$16 sps:$4 sm:$0xff]  }
 0x297   :  { %4322 = vmatprep.subr.bf16.mxu1 %v11322_v49  ;;  %v11396_v49 = vld [vmem:[#allocation10 + $0x10ac] ss:$16 sps:$4 sm:$0xff]  }
 0x299   :  { %4282 = vmatpush1.bf16.msra.mxu0 %v11317_v50  ;;  %v11391_v50 = vld [vmem:[#allocation10 + $0xea8] ss:$16 sps:$4 sm:$0xff]  }
 0x29a   :  { %4323 = vmatpush1.bf16.msra.mxu1 %v11320_v52  ;;  %4283 = vmatprep.subr.bf16.mxu0 %v11325_v54  ;;  %v11394_v52 = vld [vmem:[#allocation10 + $0x10a8] ss:$16 sps:$4 sm:$0xff]   ;;  %v11399_v54 = vld [vmem:[#allocation10 + $0xecc] ss:$16 sps:$4 sm:$0xff]  }
 0x29b   :  { %4324 = vmatprep.subr.bf16.mxu1 %v11328_v55  ;;  %v11402_v55 = vld [vmem:[#allocation10 + $0x10cc] ss:$16 sps:$4 sm:$0xff]  }
 0x29d   :  { %4284 = vmatpush1.bf16.msra.mxu0 %v11323_v57 }
 0x29e   :  { %4325 = vmatpush1.bf16.msra.mxu1 %v11326_v58  ;;  %4285 = vmatprep.subr.bf16.mxu0 %v11331_v16  ;;  %v11397_v16 = vld [vmem:[#allocation10 + $0xec8] ss:$16 sps:$4 sm:$0xff]  }
 0x29f   :  { %4326 = vmatprep.subr.bf16.mxu1 %v11334_v61  ;;  %v11400_v61 = vld [vmem:[#allocation10 + $0x10c8] ss:$16 sps:$4 sm:$0xff]  }
 0x2a1   :  { %4286 = vmatpush1.bf16.msra.mxu0 %v11329_v19 }
 0x2a2   :  { %4327 = vmatpush1.bf16.msra.mxu1 %v11332_v62  ;;  %4287 = vmatprep.subr.bf16.mxu0 %v11337_v0 }
 0x2a3   :  { %4328 = vmatprep.subr.bf16.mxu1 %v11340_v1 }
 0x2a5   :  { %4288 = vmatpush1.bf16.msra.mxu0 %v11335_v2 }
 0x2a6   :  { %4329 = vmatpush1.bf16.msra.mxu1 %v11338_v38  ;;  %4289 = vmatprep.subr.bf16.mxu0 %v11343_v25 }
 0x2a7   :  { %4330 = vmatprep.subr.bf16.mxu1 %v11346_v5 }
 0x2a9   :  { %4290 = vmatpush1.bf16.msra.mxu0 %v11341_v32 }
 0x2aa   :  { %4331 = vmatpush1.bf16.msra.mxu1 %v11344_v9  ;;  %4291 = vmatprep.subr.bf16.mxu0 %v11349_v10  ;;  %v11408_v10 = vld [vmem:[#allocation10 + $0x10ec] ss:$16 sps:$4 sm:$0xff]  }
 0x2ab   :  { %4332 = vmatprep.subr.bf16.mxu1 %v11352_v36  ;;  %v11406_v36 = vld [vmem:[#allocation10 + $0x10e8] ss:$16 sps:$4 sm:$0xff]  }
 0x2ad   :  { %4292 = vmatpush1.bf16.msra.mxu0 %v11347_v11  ;;  %v11414_v11 = vld [vmem:[#allocation10 + $0x110c] ss:$16 sps:$4 sm:$0xff]  }
 0x2ae   :  { %4333 = vmatpush1.bf16.msra.mxu1 %v11350_v12  ;;  %4293 = vmatprep.subr.bf16.mxu0 %v11355_v13  ;;  %v11412_v12 = vld [vmem:[#allocation10 + $0x1108] ss:$16 sps:$4 sm:$0xff]   ;;  %v11417_v13 = vld [vmem:[#allocation10 + $0xf2c] ss:$16 sps:$4 sm:$0xff]  }
 0x2af   :  { %4334 = vmatprep.subr.bf16.mxu1 %v11358_v15  ;;  %v11420_v15 = vld [vmem:[#allocation10 + $0x112c] ss:$16 sps:$4 sm:$0xff]  }
 0x2b1   :  { %4294 = vmatpush1.bf16.msra.mxu0 %v11353_v28  ;;  %v11415_v28 = vld [vmem:[#allocation10 + $0xf28] ss:$16 sps:$4 sm:$0xff]  }
 0x2b2   :  { %4335 = vmatpush1.bf16.msra.mxu1 %v11356_v43  ;;  %4345 = vmatprep.subr.bf16.mxu0 %v11363_v17  ;;  %v11418_v43 = vld [vmem:[#allocation10 + $0x1128] ss:$16 sps:$4 sm:$0xff]   ;;  %v11423_v17 = vld [vmem:[#allocation10 + $0xf4c] ss:$16 sps:$4 sm:$0xff]  }
 0x2b3   :  { %4386 = vmatprep.subr.bf16.mxu1 %v11366_v18  ;;  %v11426_v18 = vld [vmem:[#allocation10 + $0x114c] ss:$16 sps:$4 sm:$0xff]  }
 0x2b4   :  { %4296 = vmatmul.mubr.bf16.vlgmr.msra.gmra.mrb[28].mxu0 %v13037_v20 }
 0x2b5   :  { %4337 = vmatmul.mubr.bf16.vlgmr.msra.gmra.mrb[28].mxu1 %v13015_v56  ;;  %4346 = vmatpush1.bf16.msra.mxu0 %v11361_v21  ;;  %v11421_v21 = vld [vmem:[#allocation10 + $0xf48] ss:$16 sps:$4 sm:$0xff]  }
 0x2b6   :  { %4387 = vmatpush1.bf16.msra.mxu1 %v11364_v29  ;;  %4347 = vmatprep.subr.bf16.mxu0 %v11369_v31  ;;  %v11424_v29 = vld [vmem:[#allocation10 + $0x1148] ss:$16 sps:$4 sm:$0xff]   ;;  %v11429_v31 = vld [vmem:[#allocation10 + $0xf6c] ss:$16 sps:$4 sm:$0xff]  }
 0x2b7   :  { %4388 = vmatprep.subr.bf16.mxu1 %v11372_v35  ;;  %4377 = vmatprep.mubr.bf16.mxu0 %v12999_v26  ;;  %v11432_v35 = vld [vmem:[#allocation10 + $0x116c] ss:$16 sps:$4 sm:$0xff]  }
 0x2b8   :  { %4418 = vmatprep.mubr.bf16.mxu1 %v13023_v59 }
 0x2b9   :  { %4348 = vmatpush1.bf16.msra.mxu0 %v11367_v39  ;;  %v11427_v39 = vld [vmem:[#allocation10 + $0xf68] ss:$16 sps:$4 sm:$0xff]  }
 0x2ba   :  { %4389 = vmatpush1.bf16.msra.mxu1 %v11370_v40  ;;  %4349 = vmatprep.subr.bf16.mxu0 %v11375_v53  ;;  %v11430_v40 = vld [vmem:[#allocation10 + $0x1168] ss:$16 sps:$4 sm:$0xff]   ;;  %v11435_v53 = vld [vmem:[#allocation10 + $0xf8c] ss:$16 sps:$4 sm:$0xff]  }
 0x2bb   :  { %4390 = vmatprep.subr.bf16.mxu1 %v11378_v41  ;;  %v11438_v41 = vld [vmem:[#allocation10 + $0x118c] ss:$16 sps:$4 sm:$0xff]  }
 0x2bd   :  { %4350 = vmatpush1.bf16.msra.mxu0 %v11373_v60  ;;  %v11433_v60 = vld [vmem:[#allocation10 + $0xf88] ss:$16 sps:$4 sm:$0xff]  }
 0x2be   :  { %4391 = vmatpush1.bf16.msra.mxu1 %v11376_v42  ;;  %4351 = vmatprep.subr.bf16.mxu0 %v11381_v22  ;;  %v11436_v42 = vld [vmem:[#allocation10 + $0x1188] ss:$16 sps:$4 sm:$0xff]   ;;  %v11441_v22 = vld [vmem:[#allocation10 + $0xfac] ss:$16 sps:$4 sm:$0xff]  }
 0x2bf   :  { %4392 = vmatprep.subr.bf16.mxu1 %v11384_v3  ;;  %v11444_v3 = vld [vmem:[#allocation10 + $0x11ac] ss:$16 sps:$4 sm:$0xff]  }
 0x2c1   :  { %4352 = vmatpush1.bf16.msra.mxu0 %v11379_v30  ;;  %v11439_v30 = vld [vmem:[#allocation10 + $0xfa8] ss:$16 sps:$4 sm:$0xff]  }
 0x2c2   :  { %4393 = vmatpush1.bf16.msra.mxu1 %v11382_v44  ;;  %4353 = vmatprep.subr.bf16.mxu0 %v11387_v33  ;;  %v11442_v44 = vld [vmem:[#allocation10 + $0x11a8] ss:$16 sps:$4 sm:$0xff]   ;;  %v11447_v33 = vld [vmem:[#allocation10 + $0xfcc] ss:$16 sps:$4 sm:$0xff]  }
 0x2c3   :  { %4394 = vmatprep.subr.bf16.mxu1 %v11390_v45  ;;  %v11450_v45 = vld [vmem:[#allocation10 + $0x11cc] ss:$16 sps:$4 sm:$0xff]  }
 0x2c5   :  { %4354 = vmatpush1.bf16.msra.mxu0 %v11385_v8  ;;  %v11445_v8 = vld [vmem:[#allocation10 + $0xfc8] ss:$16 sps:$4 sm:$0xff]  }
 0x2c6   :  { %4395 = vmatpush1.bf16.msra.mxu1 %v11388_v46  ;;  %4355 = vmatprep.subr.bf16.mxu0 %v11393_v48  ;;  %v11448_v46 = vld [vmem:[#allocation10 + $0x11c8] ss:$16 sps:$4 sm:$0xff]   ;;  %v11453_v48 = vld [vmem:[#allocation10 + $0xfec] ss:$16 sps:$4 sm:$0xff]  }
 0x2c7   :  { %4396 = vmatprep.subr.bf16.mxu1 %v11396_v49  ;;  %v2878_v57 = vpop.f32.mrb[16].mxu0  ;;  %v11456_v49 = vld [vmem:[#allocation10 + $0x11ec] ss:$16 sps:$4 sm:$0xff]  }
 0x2c8   :  { %v2919_v58 = vpop.f32.mrb[16].mxu1  ;;  %v13044_v19 = vadd.f32 %v2878_v57, %v13031_v37  ;;  %v2880_v0 = vpop.f32.mrb[17].mxu0  ;;  %v11405_v37 = vld [vmem:[#allocation10 + $0xeec] ss:$16 sps:$4 sm:$0xff]   ;;  %v13055_v57 = vld [vmem:[#allocation8] sm:$0xff] }
 0x2c9   :  { %v13047_v62 = vadd.f32 %v2919_v58, %v13007_v63  ;;  %v2921_v1 = vpop.f32.mrb[17].mxu1  ;;  %v13050_v2 = vadd.f32 %v2880_v0, %v13033_v23  ;;  %v2882_v25 = vpop.f32.mrb[18].mxu0  ;;  %4356 = vmatpush1.bf16.msra.mxu0 %v11391_v50  ;;  %v11403_v63 = vld [vmem:[#allocation10 + $0xee8] ss:$16 sps:$4 sm:$0xff]   ;;  %v11411_v23 = vld [vmem:[#allocation10 + $0xf0c] ss:$16 sps:$4 sm:$0xff]  }
 0x2ca   :  { %v13053_v38 = vadd.f32 %v2921_v1, %v13009_v4  ;;  %v2923_v5 = vpop.f32.mrb[18].mxu1  ;;  %4397 = vmatpush1.bf16.msra.mxu1 %v11394_v52  ;;  %v2883_v32 = vpop.f32.mrb[19].mxu0  ;;  %4357 = vmatprep.subr.bf16.mxu0 %v11399_v54  ;;  %v11409_v4 = vld [vmem:[#allocation10 + $0xf08] ss:$16 sps:$4 sm:$0xff]   ;;  %v11459_v54 = vld [vmem:[#allocation10 + $0x1204] ss:$16 sps:$4 sm:$0xff]   ;;  %v13061_v25 = vcombine.high %v13055_v57, %v13055_v57 }
 0x2cb   :  { %v2924_v9 = vpop.f32.mrb[19].mxu1  ;;  %4398 = vmatprep.subr.bf16.mxu1 %v11402_v55  ;;  %v11451_v50 = vld [vmem:[#allocation10 + $0xfe8] ss:$16 sps:$4 sm:$0xff]   ;;  %v11462_v55 = vld [vmem:[#allocation10 + $0x1404] ss:$16 sps:$4 sm:$0xff]  }
 0x2cc   :  { %v11454_v52 = vld [vmem:[#allocation10 + $0x11e8] ss:$16 sps:$4 sm:$0xff]   ;;  %v11465_v0 = vld [vmem:[#allocation10 + $0x1224] ss:$16 sps:$4 sm:$0xff]   ;;  %v11463_v32 = vld [vmem:[#allocation10 + $0x1220] ss:$16 sps:$4 sm:$0xff]  }
 0x2cd   :  { %4358 = vmatpush1.bf16.msra.mxu0 %v11397_v16  ;;  %v13057_v58 = vld [vmem:[#allocation8 + $0x8] sm:$0xff]  ;;  %v11457_v16 = vld [vmem:[#allocation10 + $0x1200] ss:$16 sps:$4 sm:$0xff]   ;;  %v11468_v1 = vld [vmem:[#allocation10 + $0x1424] ss:$16 sps:$4 sm:$0xff]  }
 0x2ce   :  { %4399 = vmatpush1.bf16.msra.mxu1 %v11400_v61  ;;  %4359 = vmatprep.subr.bf16.mxu0 %v11405_v37  ;;  %v11460_v61 = vld [vmem:[#allocation10 + $0x1400] ss:$16 sps:$4 sm:$0xff]   ;;  %v13065_v5 = vcombine.high %v13057_v58, %v13057_v58  ;;  %v11471_v37 = vld [vmem:[#allocation10 + $0x1244] ss:$16 sps:$4 sm:$0xff]  }
 0x2cf   :  { %4400 = vmatprep.subr.bf16.mxu1 %v11408_v10  ;;  %v11466_v9 = vld [vmem:[#allocation10 + $0x1420] ss:$16 sps:$4 sm:$0xff]   ;;  %v11474_v10 = vld [vmem:[#allocation10 + $0x1444] ss:$16 sps:$4 sm:$0xff]  }
 0x2d1   :  { %4360 = vmatpush1.bf16.msra.mxu0 %v11403_v63  ;;  %v11469_v63 = vld [vmem:[#allocation10 + $0x1240] ss:$16 sps:$4 sm:$0xff]  }
 0x2d2   :  { %4401 = vmatpush1.bf16.msra.mxu1 %v11406_v36  ;;  %4361 = vmatprep.subr.bf16.mxu0 %v11411_v23  ;;  %v11472_v36 = vld [vmem:[#allocation10 + $0x1440] ss:$16 sps:$4 sm:$0xff]   ;;  %v11477_v23 = vld [vmem:[#allocation10 + $0x1264] ss:$16 sps:$4 sm:$0xff]  }
 0x2d3   :  { %4402 = vmatprep.subr.bf16.mxu1 %v11414_v11  ;;  %v11480_v11 = vld [vmem:[#allocation10 + $0x1464] ss:$16 sps:$4 sm:$0xff]  }
 0x2d5   :  { %4362 = vmatpush1.bf16.msra.mxu0 %v11409_v4  ;;  %v11475_v4 = vld [vmem:[#allocation10 + $0x1260] ss:$16 sps:$4 sm:$0xff]  }
 0x2d6   :  { %4403 = vmatpush1.bf16.msra.mxu1 %v11412_v12  ;;  %4363 = vmatprep.subr.bf16.mxu0 %v11417_v13  ;;  %v11478_v12 = vld [vmem:[#allocation10 + $0x1460] ss:$16 sps:$4 sm:$0xff]   ;;  %v11483_v13 = vld [vmem:[#allocation10 + $0x1284] ss:$16 sps:$4 sm:$0xff]  }
 0x2d7   :  { %4404 = vmatprep.subr.bf16.mxu1 %v11420_v15  ;;  %v11486_v15 = vld [vmem:[#allocation10 + $0x1484] ss:$16 sps:$4 sm:$0xff]  }
 0x2d9   :  { %4364 = vmatpush1.bf16.msra.mxu0 %v11415_v28  ;;  %v11481_v28 = vld [vmem:[#allocation10 + $0x1280] ss:$16 sps:$4 sm:$0xff]  }
 0x2da   :  { %4405 = vmatpush1.bf16.msra.mxu1 %v11418_v43  ;;  %4365 = vmatprep.subr.bf16.mxu0 %v11423_v17  ;;  %v11484_v43 = vld [vmem:[#allocation10 + $0x1480] ss:$16 sps:$4 sm:$0xff]   ;;  %v11489_v17 = vld [vmem:[#allocation10 + $0x12a4] ss:$16 sps:$4 sm:$0xff]  }
 0x2db   :  { %4406 = vmatprep.subr.bf16.mxu1 %v11426_v18  ;;  %v11492_v18 = vld [vmem:[#allocation10 + $0x14a4] ss:$16 sps:$4 sm:$0xff]  }
 0x2dd   :  { %4366 = vmatpush1.bf16.msra.mxu0 %v11421_v21  ;;  %v11487_v21 = vld [vmem:[#allocation10 + $0x12a0] ss:$16 sps:$4 sm:$0xff]  }
 0x2de   :  { %4407 = vmatpush1.bf16.msra.mxu1 %v11424_v29  ;;  %4367 = vmatprep.subr.bf16.mxu0 %v11429_v31  ;;  %v11490_v29 = vld [vmem:[#allocation10 + $0x14a0] ss:$16 sps:$4 sm:$0xff]   ;;  %v11495_v31 = vld [vmem:[#allocation10 + $0x12c4] ss:$16 sps:$4 sm:$0xff]  }
 0x2df   :  { %4408 = vmatprep.subr.bf16.mxu1 %v11432_v35  ;;  %v11498_v35 = vld [vmem:[#allocation10 + $0x14c4] ss:$16 sps:$4 sm:$0xff]  }
 0x2e1   :  { %4368 = vmatpush1.bf16.msra.mxu0 %v11427_v39 }
 0x2e2   :  { %4409 = vmatpush1.bf16.msra.mxu1 %v11430_v40  ;;  %4369 = vmatprep.subr.bf16.mxu0 %v11435_v53  ;;  %v11493_v53 = vld [vmem:[#allocation10 + $0x12c0] ss:$16 sps:$4 sm:$0xff]  }
 0x2e3   :  { %4410 = vmatprep.subr.bf16.mxu1 %v11438_v41  ;;  %v11496_v41 = vld [vmem:[#allocation10 + $0x14c0] ss:$16 sps:$4 sm:$0xff]  }
 0x2e5   :  { %4370 = vmatpush1.bf16.msra.mxu0 %v11433_v60 }
 0x2e6   :  { %4411 = vmatpush1.bf16.msra.mxu1 %v11436_v42  ;;  %4371 = vmatprep.subr.bf16.mxu0 %v11441_v22 }
 0x2e7   :  { %4412 = vmatprep.subr.bf16.mxu1 %v11444_v3 }
 0x2e9   :  { %4372 = vmatpush1.bf16.msra.mxu0 %v11439_v30 }
 0x2ea   :  { %4413 = vmatpush1.bf16.msra.mxu1 %v11442_v44  ;;  %4373 = vmatprep.subr.bf16.mxu0 %v11447_v33 }
 0x2eb   :  { %4414 = vmatprep.subr.bf16.mxu1 %v11450_v45 }
 0x2ed   :  { %4374 = vmatpush1.bf16.msra.mxu0 %v11445_v8 }
 0x2ee   :  { %4415 = vmatpush1.bf16.msra.mxu1 %v11448_v46  ;;  %4375 = vmatprep.subr.bf16.mxu0 %v11453_v48  ;;  %v11501_v46 = vld [vmem:[#allocation10 + $0x12e4] ss:$16 sps:$4 sm:$0xff]  }
 0x2ef   :  { %4416 = vmatprep.subr.bf16.mxu1 %v11456_v49  ;;  %v11504_v48 = vld [vmem:[#allocation10 + $0x14e4] ss:$16 sps:$4 sm:$0xff]  }
 0x2f1   :  { %4376 = vmatpush1.bf16.msra.mxu0 %v11451_v50  ;;  %v11502_v50 = vld [vmem:[#allocation10 + $0x14e0] ss:$16 sps:$4 sm:$0xff]  }
 0x2f2   :  { %4417 = vmatpush1.bf16.msra.mxu1 %v11454_v52  ;;  %5213 = vmatprep.subr.bf16.mxu0 %v11459_v54  ;;  %v11510_v52 = vld [vmem:[#allocation10 + $0x1504] ss:$16 sps:$4 sm:$0xff]   ;;  %v11505_v54 = vld [vmem:[#allocation10 + $0x1300] ss:$16 sps:$4 sm:$0xff]  }
 0x2f3   :  { %5254 = vmatprep.subr.bf16.mxu1 %v11462_v55  ;;  %v11508_v55 = vld [vmem:[#allocation10 + $0x1500] ss:$16 sps:$4 sm:$0xff]  }
 0x2f4   :  { %4378 = vmatmul.mubr.bf16.vlgmr.msra.gmra.mrb[32].mxu0 %v13019_v27 }
 0x2f5   :  { %4419 = vmatmul.mubr.bf16.vlgmr.msra.gmra.mrb[32].mxu1 %v13037_v20  ;;  %5214 = vmatpush1.bf16.msra.mxu0 %v11457_v16  ;;  %v11513_v16 = vld [vmem:[#allocation10 + $0x1324] ss:$16 sps:$4 sm:$0xff]  }
 0x2f6   :  { %5255 = vmatpush1.bf16.msra.mxu1 %v11460_v61  ;;  %5215 = vmatprep.subr.bf16.mxu0 %v11465_v0  ;;  %v11516_v61 = vld [vmem:[#allocation10 + $0x1524] ss:$16 sps:$4 sm:$0xff]   ;;  %v11511_v0 = vld [vmem:[#allocation10 + $0x1320] ss:$16 sps:$4 sm:$0xff]  }
 0x2f7   :  { %5256 = vmatprep.subr.bf16.mxu1 %v11468_v1  ;;  %5245 = vmatprep.mubr.bf16.mxu0 %v13061_v25  ;;  %v11514_v1 = vld [vmem:[#allocation10 + $0x1520] ss:$16 sps:$4 sm:$0xff]  }
 0x2f8   :  { %5286 = vmatprep.mubr.bf16.mxu1 %v13065_v5 }
 0x2f9   :  { %5216 = vmatpush1.bf16.msra.mxu0 %v11463_v32  ;;  %v11519_v32 = vld [vmem:[#allocation10 + $0x1344] ss:$16 sps:$4 sm:$0xff]  }
 0x2fa   :  { %5257 = vmatpush1.bf16.msra.mxu1 %v11466_v9  ;;  %5217 = vmatprep.subr.bf16.mxu0 %v11471_v37  ;;  %v11522_v9 = vld [vmem:[#allocation10 + $0x1544] ss:$16 sps:$4 sm:$0xff]   ;;  %v11517_v37 = vld [vmem:[#allocation10 + $0x1340] ss:$16 sps:$4 sm:$0xff]  }
 0x2fb   :  { %5258 = vmatprep.subr.bf16.mxu1 %v11474_v10  ;;  %v11520_v10 = vld [vmem:[#allocation10 + $0x1540] ss:$16 sps:$4 sm:$0xff]  }
 0x2fd   :  { %5218 = vmatpush1.bf16.msra.mxu0 %v11469_v63  ;;  %v11525_v63 = vld [vmem:[#allocation10 + $0x1364] ss:$16 sps:$4 sm:$0xff]  }
 0x2fe   :  { %5259 = vmatpush1.bf16.msra.mxu1 %v11472_v36  ;;  %5219 = vmatprep.subr.bf16.mxu0 %v11477_v23  ;;  %v11528_v36 = vld [vmem:[#allocation10 + $0x1564] ss:$16 sps:$4 sm:$0xff]   ;;  %v11523_v23 = vld [vmem:[#allocation10 + $0x1360] ss:$16 sps:$4 sm:$0xff]  }
 0x2ff   :  { %5260 = vmatprep.subr.bf16.mxu1 %v11480_v11  ;;  %v11526_v11 = vld [vmem:[#allocation10 + $0x1560] ss:$16 sps:$4 sm:$0xff]  }
 0x301   :  { %5220 = vmatpush1.bf16.msra.mxu0 %v11475_v4  ;;  %v11531_v4 = vld [vmem:[#allocation10 + $0x1384] ss:$16 sps:$4 sm:$0xff]  }
 0x302   :  { %5261 = vmatpush1.bf16.msra.mxu1 %v11478_v12  ;;  %5221 = vmatprep.subr.bf16.mxu0 %v11483_v13  ;;  %v11534_v12 = vld [vmem:[#allocation10 + $0x1584] ss:$16 sps:$4 sm:$0xff]   ;;  %v11529_v13 = vld [vmem:[#allocation10 + $0x1380] ss:$16 sps:$4 sm:$0xff]  }
 0x303   :  { %5262 = vmatprep.subr.bf16.mxu1 %v11486_v15  ;;  %v11532_v15 = vld [vmem:[#allocation10 + $0x1580] ss:$16 sps:$4 sm:$0xff]  }
 0x305   :  { %5222 = vmatpush1.bf16.msra.mxu0 %v11481_v28  ;;  %v11537_v28 = vld [vmem:[#allocation10 + $0x13a4] ss:$16 sps:$4 sm:$0xff]  }
 0x306   :  { %5263 = vmatpush1.bf16.msra.mxu1 %v11484_v43  ;;  %5223 = vmatprep.subr.bf16.mxu0 %v11489_v17  ;;  %v11540_v43 = vld [vmem:[#allocation10 + $0x15a4] ss:$16 sps:$4 sm:$0xff]   ;;  %v11535_v17 = vld [vmem:[#allocation10 + $0x13a0] ss:$16 sps:$4 sm:$0xff]  }
 0x307   :  { %5264 = vmatprep.subr.bf16.mxu1 %v11492_v18  ;;  %v2960_v39 = vpop.f32.mrb[20].mxu0  ;;  %v11538_v18 = vld [vmem:[#allocation10 + $0x15a0] ss:$16 sps:$4 sm:$0xff]  }
 0x308   :  { %v3001_v40 = vpop.f32.mrb[20].mxu1  ;;  %v2961_v60 = vadd.f32 %v2960_v39, %v13047_v62  ;;  %v2962_v42 = vpop.f32.mrb[21].mxu0  ;;  %v11499_v62 = vld [vmem:[#allocation10 + $0x12e0] ss:$16 sps:$4 sm:$0xff]   ;;  %v11549_v39 = vld [vmem:[#allocation10 + $0x13e4] ss:$16 sps:$4 sm:$0xff]  }
 0x309   :  { %v3003_v22 = vpop.f32.mrb[21].mxu1  ;;  %v2963_v3 = vadd.f32 %v2962_v42, %v13053_v38  ;;  %v2964_v30 = vpop.f32.mrb[22].mxu0  ;;  %5224 = vmatpush1.bf16.msra.mxu0 %v11487_v21  ;;  %v11507_v38 = vld [vmem:[#allocation10 + $0x1304] ss:$16 sps:$4 sm:$0xff]   ;;  %v11562_v42 = vld [vmem:[#allocation10 + $0x140c] ss:$16 sps:$4 sm:$0xff]  }
 0x30a   :  { %v3005_v44 = vpop.f32.mrb[22].mxu1  ;;  %5265 = vmatpush1.bf16.msra.mxu1 %v11490_v29  ;;  %v13073_v33 = vadd.f32 %v3001_v40, %v2961_v60  ;;  %v2965_v45 = vpop.f32.mrb[23].mxu0  ;;  %5225 = vmatprep.subr.bf16.mxu0 %v11495_v31  ;;  %v11543_v21 = vld [vmem:[#allocation10 + $0x13c4] ss:$16 sps:$4 sm:$0xff]   ;;  %v11541_v31 = vld [vmem:[#allocation10 + $0x13c0] ss:$16 sps:$4 sm:$0xff]   ;;  %v13079_v30 = vcombine.low %v13055_v57, %v13055_v57 }
 0x30b   :  { %v3006_v8 = vpop.f32.mrb[23].mxu1  ;;  %5266 = vmatprep.subr.bf16.mxu1 %v11498_v35  ;;  %v13075_v49 = vadd.f32 %v3003_v22, %v2963_v3  ;;  %v11546_v29 = vld [vmem:[#allocation10 + $0x15c4] ss:$16 sps:$4 sm:$0xff]   ;;  %v11544_v35 = vld [vmem:[#allocation10 + $0x15c0] ss:$16 sps:$4 sm:$0xff]   ;;  %v13083_v44 = vcombine.low %v13057_v58, %v13057_v58 }
 0x30c   :  { %v11552_v40 = vld [vmem:[#allocation10 + $0x15e4] ss:$16 sps:$4 sm:$0xff]   ;;  %v11559_v60 = vld [vmem:[#allocation10 + $0x120c] ss:$16 sps:$4 sm:$0xff]   ;;  %v11557_v22 = vld [vmem:[#allocation10 + $0x1208] ss:$16 sps:$4 sm:$0xff]  }
 0x30d   :  { %5226 = vmatpush1.bf16.msra.mxu0 %v11493_v53  ;;  %v11547_v53 = vld [vmem:[#allocation10 + $0x13e0] ss:$16 sps:$4 sm:$0xff]   ;;  %v11560_v3 = vld [vmem:[#allocation10 + $0x1408] ss:$16 sps:$4 sm:$0xff]   ;;  %v11565_v45 = vld [vmem:[#allocation10 + $0x122c] ss:$16 sps:$4 sm:$0xff]  }
 0x30e   :  { %5267 = vmatpush1.bf16.msra.mxu1 %v11496_v41  ;;  %5227 = vmatprep.subr.bf16.mxu0 %v11501_v46  ;;  %v11550_v41 = vld [vmem:[#allocation10 + $0x15e0] ss:$16 sps:$4 sm:$0xff]   ;;  %v11568_v8 = vld [vmem:[#allocation10 + $0x142c] ss:$16 sps:$4 sm:$0xff]   ;;  %v11563_v46 = vld [vmem:[#allocation10 + $0x1228] ss:$16 sps:$4 sm:$0xff]  }
 0x30f   :  { %5268 = vmatprep.subr.bf16.mxu1 %v11504_v48  ;;  %v11566_v48 = vld [vmem:[#allocation10 + $0x1428] ss:$16 sps:$4 sm:$0xff]   ;;  %v11571_v57 = vld [vmem:[#allocation10 + $0x124c] ss:$16 sps:$4 sm:$0xff]  }
 0x310   :  { %v11569_v58 = vld [vmem:[#allocation10 + $0x1248] ss:$16 sps:$4 sm:$0xff]  }
 0x311   :  { %5228 = vmatpush1.bf16.msra.mxu0 %v11499_v62  ;;  %v11574_v62 = vld [vmem:[#allocation10 + $0x144c] ss:$16 sps:$4 sm:$0xff]  }
 0x312   :  { %5269 = vmatpush1.bf16.msra.mxu1 %v11502_v50  ;;  %5229 = vmatprep.subr.bf16.mxu0 %v11507_v38  ;;  %v11572_v50 = vld [vmem:[#allocation10 + $0x1448] ss:$16 sps:$4 sm:$0xff]   ;;  %v11577_v38 = vld [vmem:[#allocation10 + $0x126c] ss:$16 sps:$4 sm:$0xff]  }
 0x313   :  { %5270 = vmatprep.subr.bf16.mxu1 %v11510_v52  ;;  %v11580_v52 = vld [vmem:[#allocation10 + $0x146c] ss:$16 sps:$4 sm:$0xff]  }
 0x315   :  { %5230 = vmatpush1.bf16.msra.mxu0 %v11505_v54  ;;  %v11575_v54 = vld [vmem:[#allocation10 + $0x1268] ss:$16 sps:$4 sm:$0xff]  }
 0x316   :  { %5271 = vmatpush1.bf16.msra.mxu1 %v11508_v55  ;;  %5231 = vmatprep.subr.bf16.mxu0 %v11513_v16  ;;  %v11578_v55 = vld [vmem:[#allocation10 + $0x1468] ss:$16 sps:$4 sm:$0xff]   ;;  %v11583_v16 = vld [vmem:[#allocation10 + $0x128c] ss:$16 sps:$4 sm:$0xff]  }
 0x317   :  { %5272 = vmatprep.subr.bf16.mxu1 %v11516_v61  ;;  %v11586_v61 = vld [vmem:[#allocation10 + $0x148c] ss:$16 sps:$4 sm:$0xff]  }
 0x319   :  { %5232 = vmatpush1.bf16.msra.mxu0 %v11511_v0  ;;  %v11581_v0 = vld [vmem:[#allocation10 + $0x1288] ss:$16 sps:$4 sm:$0xff]  }
 0x31a   :  { %5273 = vmatpush1.bf16.msra.mxu1 %v11514_v1  ;;  %5233 = vmatprep.subr.bf16.mxu0 %v11519_v32  ;;  %v11584_v1 = vld [vmem:[#allocation10 + $0x1488] ss:$16 sps:$4 sm:$0xff]   ;;  %v11589_v32 = vld [vmem:[#allocation10 + $0x12ac] ss:$16 sps:$4 sm:$0xff]  }
 0x31b   :  { %5274 = vmatprep.subr.bf16.mxu1 %v11522_v9  ;;  %v11592_v9 = vld [vmem:[#allocation10 + $0x14ac] ss:$16 sps:$4 sm:$0xff]  }
 0x31d   :  { %5234 = vmatpush1.bf16.msra.mxu0 %v11517_v37  ;;  %v11587_v37 = vld [vmem:[#allocation10 + $0x12a8] ss:$16 sps:$4 sm:$0xff]  }
 0x31e   :  { %5275 = vmatpush1.bf16.msra.mxu1 %v11520_v10  ;;  %5235 = vmatprep.subr.bf16.mxu0 %v11525_v63  ;;  %v11590_v10 = vld [vmem:[#allocation10 + $0x14a8] ss:$16 sps:$4 sm:$0xff]   ;;  %v11595_v63 = vld [vmem:[#allocation10 + $0x12cc] ss:$16 sps:$4 sm:$0xff]  }
 0x31f   :  { %5276 = vmatprep.subr.bf16.mxu1 %v11528_v36  ;;  %v11598_v36 = vld [vmem:[#allocation10 + $0x14cc] ss:$16 sps:$4 sm:$0xff]  }
 0x321   :  { %5236 = vmatpush1.bf16.msra.mxu0 %v11523_v23 }
 0x322   :  { %5277 = vmatpush1.bf16.msra.mxu1 %v11526_v11  ;;  %5237 = vmatprep.subr.bf16.mxu0 %v11531_v4  ;;  %v11593_v4 = vld [vmem:[#allocation10 + $0x12c8] ss:$16 sps:$4 sm:$0xff]  }
 0x323   :  { %5278 = vmatprep.subr.bf16.mxu1 %v11534_v12  ;;  %v11596_v12 = vld [vmem:[#allocation10 + $0x14c8] ss:$16 sps:$4 sm:$0xff]  }
 0x325   :  { %5238 = vmatpush1.bf16.msra.mxu0 %v11529_v13 }
 0x326   :  { %5279 = vmatpush1.bf16.msra.mxu1 %v11532_v15  ;;  %5239 = vmatprep.subr.bf16.mxu0 %v11537_v28 }
 0x327   :  { %5280 = vmatprep.subr.bf16.mxu1 %v11540_v43 }
 0x329   :  { %5240 = vmatpush1.bf16.msra.mxu0 %v11535_v17 }
 0x32a   :  { %5281 = vmatpush1.bf16.msra.mxu1 %v11538_v18  ;;  %5241 = vmatprep.subr.bf16.mxu0 %v11543_v21 }
 0x32b   :  { %5282 = vmatprep.subr.bf16.mxu1 %v11546_v29 }
 0x32d   :  { %5242 = vmatpush1.bf16.msra.mxu0 %v11541_v31  ;;  %v11601_v31 = vld [vmem:[#allocation10 + $0x12ec] ss:$16 sps:$4 sm:$0xff]  }
 0x32e   :  { %5283 = vmatpush1.bf16.msra.mxu1 %v11544_v35  ;;  %5243 = vmatprep.subr.bf16.mxu0 %v11549_v39  ;;  %v11604_v35 = vld [vmem:[#allocation10 + $0x14ec] ss:$16 sps:$4 sm:$0xff]   ;;  %v11599_v39 = vld [vmem:[#allocation10 + $0x12e8] ss:$16 sps:$4 sm:$0xff]  }
 0x32f   :  { %5284 = vmatprep.subr.bf16.mxu1 %v11552_v40  ;;  %v11602_v40 = vld [vmem:[#allocation10 + $0x14e8] ss:$16 sps:$4 sm:$0xff]  }
 0x331   :  { %5244 = vmatpush1.bf16.msra.mxu0 %v11547_v53  ;;  %v11607_v53 = vld [vmem:[#allocation10 + $0x130c] ss:$16 sps:$4 sm:$0xff]  }
 0x332   :  { %5285 = vmatpush1.bf16.msra.mxu1 %v11550_v41  ;;  %5295 = vmatprep.subr.bf16.mxu0 %v11559_v60  ;;  %v11610_v41 = vld [vmem:[#allocation10 + $0x150c] ss:$16 sps:$4 sm:$0xff]   ;;  %v11605_v60 = vld [vmem:[#allocation10 + $0x1308] ss:$16 sps:$4 sm:$0xff]  }
 0x333   :  { %5336 = vmatprep.subr.bf16.mxu1 %v11562_v42  ;;  %v11608_v42 = vld [vmem:[#allocation10 + $0x1508] ss:$16 sps:$4 sm:$0xff]  }
 0x334   :  { %5246 = vmatmul.mubr.bf16.vlgmr.msra.gmra.mrb[36].mxu0 %v13079_v30 }
 0x335   :  { %5287 = vmatmul.mubr.bf16.vlgmr.msra.gmra.mrb[36].mxu1 %v13083_v44  ;;  %5296 = vmatpush1.bf16.msra.mxu0 %v11557_v22  ;;  %v11613_v22 = vld [vmem:[#allocation10 + $0x132c] ss:$16 sps:$4 sm:$0xff]  }
 0x336   :  { %5337 = vmatpush1.bf16.msra.mxu1 %v11560_v3  ;;  %5297 = vmatprep.subr.bf16.mxu0 %v11565_v45  ;;  %v11616_v3 = vld [vmem:[#allocation10 + $0x152c] ss:$16 sps:$4 sm:$0xff]   ;;  %v11611_v45 = vld [vmem:[#allocation10 + $0x1328] ss:$16 sps:$4 sm:$0xff]  }
 0x337   :  { %5338 = vmatprep.subr.bf16.mxu1 %v11568_v8  ;;  %5327 = vmatprep.mubr.bf16.mxu0 %v13061_v25  ;;  %v11614_v8 = vld [vmem:[#allocation10 + $0x1528] ss:$16 sps:$4 sm:$0xff]  }
 0x338   :  { %5368 = vmatprep.mubr.bf16.mxu1 %v13065_v5 }
 0x339   :  { %5298 = vmatpush1.bf16.msra.mxu0 %v11563_v46  ;;  %v11619_v46 = vld [vmem:[#allocation10 + $0x134c] ss:$16 sps:$4 sm:$0xff]  }
 0x33a   :  { %5339 = vmatpush1.bf16.msra.mxu1 %v11566_v48  ;;  %5299 = vmatprep.subr.bf16.mxu0 %v11571_v57  ;;  %v11622_v48 = vld [vmem:[#allocation10 + $0x154c] ss:$16 sps:$4 sm:$0xff]   ;;  %v11617_v57 = vld [vmem:[#allocation10 + $0x1348] ss:$16 sps:$4 sm:$0xff]  }
 0x33b   :  { %5340 = vmatprep.subr.bf16.mxu1 %v11574_v62  ;;  %v11620_v62 = vld [vmem:[#allocation10 + $0x1548] ss:$16 sps:$4 sm:$0xff]  }
 0x33d   :  { %5300 = vmatpush1.bf16.msra.mxu0 %v11569_v58  ;;  %v11625_v58 = vld [vmem:[#allocation10 + $0x136c] ss:$16 sps:$4 sm:$0xff]  }
 0x33e   :  { %5341 = vmatpush1.bf16.msra.mxu1 %v11572_v50  ;;  %5301 = vmatprep.subr.bf16.mxu0 %v11577_v38  ;;  %v11628_v50 = vld [vmem:[#allocation10 + $0x156c] ss:$16 sps:$4 sm:$0xff]   ;;  %v11623_v38 = vld [vmem:[#allocation10 + $0x1368] ss:$16 sps:$4 sm:$0xff]  }
 0x33f   :  { %5342 = vmatprep.subr.bf16.mxu1 %v11580_v52  ;;  %v11626_v52 = vld [vmem:[#allocation10 + $0x1568] ss:$16 sps:$4 sm:$0xff]  }
 0x341   :  { %5302 = vmatpush1.bf16.msra.mxu0 %v11575_v54  ;;  %v11631_v54 = vld [vmem:[#allocation10 + $0x138c] ss:$16 sps:$4 sm:$0xff]  }
 0x342   :  { %5343 = vmatpush1.bf16.msra.mxu1 %v11578_v55  ;;  %5303 = vmatprep.subr.bf16.mxu0 %v11583_v16  ;;  %v11634_v55 = vld [vmem:[#allocation10 + $0x158c] ss:$16 sps:$4 sm:$0xff]   ;;  %v11629_v16 = vld [vmem:[#allocation10 + $0x1388] ss:$16 sps:$4 sm:$0xff]  }
 0x343   :  { %5344 = vmatprep.subr.bf16.mxu1 %v11586_v61  ;;  %v11632_v61 = vld [vmem:[#allocation10 + $0x1588] ss:$16 sps:$4 sm:$0xff]  }
 0x345   :  { %5304 = vmatpush1.bf16.msra.mxu0 %v11581_v0  ;;  %v11637_v0 = vld [vmem:[#allocation10 + $0x13ac] ss:$16 sps:$4 sm:$0xff]  }
 0x346   :  { %5345 = vmatpush1.bf16.msra.mxu1 %v11584_v1  ;;  %5305 = vmatprep.subr.bf16.mxu0 %v11589_v32  ;;  %v11640_v1 = vld [vmem:[#allocation10 + $0x15ac] ss:$16 sps:$4 sm:$0xff]   ;;  %v11635_v32 = vld [vmem:[#allocation10 + $0x13a8] ss:$16 sps:$4 sm:$0xff]  }
 0x347   :  { %5346 = vmatprep.subr.bf16.mxu1 %v11592_v9  ;;  %v4215_v23 = vpop.f32.mrb[24].mxu0  ;;  %v11638_v9 = vld [vmem:[#allocation10 + $0x15a8] ss:$16 sps:$4 sm:$0xff]  }
 0x348   :  { %v4256_v11 = vpop.f32.mrb[24].mxu1  ;;  %v4217_v15 = vpop.f32.mrb[25].mxu0 }
 0x349   :  { %v13089_v13 = vadd.f32 %v4256_v11, %v4215_v23  ;;  %v4258_v28 = vpop.f32.mrb[25].mxu1  ;;  %v4219_v17 = vpop.f32.mrb[26].mxu0  ;;  %5306 = vmatpush1.bf16.msra.mxu0 %v11587_v37  ;;  %v11643_v37 = vld [vmem:[#allocation10 + $0x13cc] ss:$16 sps:$4 sm:$0xff]  }
 0x34a   :  { %v13091_v43 = vadd.f32 %v4258_v28, %v4217_v15  ;;  %v4260_v18 = vpop.f32.mrb[26].mxu1  ;;  %5347 = vmatpush1.bf16.msra.mxu1 %v11590_v10  ;;  %v4220_v21 = vpop.f32.mrb[27].mxu0  ;;  %5307 = vmatprep.subr.bf16.mxu0 %v11595_v63  ;;  %v11646_v10 = vld [vmem:[#allocation10 + $0x15cc] ss:$16 sps:$4 sm:$0xff]   ;;  %v11641_v63 = vld [vmem:[#allocation10 + $0x13c8] ss:$16 sps:$4 sm:$0xff]  }
 0x34b   :  { %v4261_v29 = vpop.f32.mrb[27].mxu1  ;;  %5348 = vmatprep.subr.bf16.mxu1 %v11598_v36  ;;  %v11644_v36 = vld [vmem:[#allocation10 + $0x15c8] ss:$16 sps:$4 sm:$0xff]   ;;  %v11649_v23 = vld [vmem:[#allocation10 + $0x13ec] ss:$16 sps:$4 sm:$0xff]  }
 0x34c   :  { %v11652_v11 = vld [vmem:[#allocation10 + $0x15ec] ss:$16 sps:$4 sm:$0xff]   ;;  %v11655_v15 = vld [vmem:[#allocation11 + $0x604] ss:$16 sps:$4 sm:$0xff]   ;;  %v11653_v17 = vld [vmem:[#allocation11 + $0x600] ss:$16 sps:$4 sm:$0xff]  }
 0x34d   :  { %5308 = vmatpush1.bf16.msra.mxu0 %v11593_v4  ;;  %v11647_v4 = vld [vmem:[#allocation10 + $0x13e8] ss:$16 sps:$4 sm:$0xff]   ;;  %v11658_v28 = vld [vmem:[#allocation11 + $0x804] ss:$16 sps:$4 sm:$0xff]   ;;  %v11656_v18 = vld [vmem:[#allocation11 + $0x800] ss:$16 sps:$4 sm:$0xff]  }
 0x34e   :  { %5349 = vmatpush1.bf16.msra.mxu1 %v11596_v12  ;;  %5309 = vmatprep.subr.bf16.mxu0 %v11601_v31  ;;  %v11650_v12 = vld [vmem:[#allocation10 + $0x15e8] ss:$16 sps:$4 sm:$0xff]   ;;  %v11661_v21 = vld [vmem:[#allocation11 + $0x624] ss:$16 sps:$4 sm:$0xff]   ;;  %v11659_v31 = vld [vmem:[#allocation11 + $0x620] ss:$16 sps:$4 sm:$0xff]  }
 0x34f   :  { %5350 = vmatprep.subr.bf16.mxu1 %v11604_v35  ;;  %v11664_v29 = vld [vmem:[#allocation11 + $0x824] ss:$16 sps:$4 sm:$0xff]   ;;  %v11662_v35 = vld [vmem:[#allocation11 + $0x820] ss:$16 sps:$4 sm:$0xff]  }
 0x351   :  { %5310 = vmatpush1.bf16.msra.mxu0 %v11599_v39  ;;  %v11667_v39 = vld [vmem:[#allocation11 + $0x644] ss:$16 sps:$4 sm:$0xff]  }
 0x352   :  { %5351 = vmatpush1.bf16.msra.mxu1 %v11602_v40  ;;  %5311 = vmatprep.subr.bf16.mxu0 %v11607_v53  ;;  %v11670_v40 = vld [vmem:[#allocation11 + $0x844] ss:$16 sps:$4 sm:$0xff]   ;;  %v11665_v53 = vld [vmem:[#allocation11 + $0x640] ss:$16 sps:$4 sm:$0xff]  }
 0x353   :  { %5352 = vmatprep.subr.bf16.mxu1 %v11610_v41  ;;  %v11668_v41 = vld [vmem:[#allocation11 + $0x840] ss:$16 sps:$4 sm:$0xff]  }
 0x355   :  { %5312 = vmatpush1.bf16.msra.mxu0 %v11605_v60  ;;  %v11673_v60 = vld [vmem:[#allocation11 + $0x664] ss:$16 sps:$4 sm:$0xff]  }
 0x356   :  { %5353 = vmatpush1.bf16.msra.mxu1 %v11608_v42  ;;  %5313 = vmatprep.subr.bf16.mxu0 %v11613_v22  ;;  %v11676_v42 = vld [vmem:[#allocation11 + $0x864] ss:$16 sps:$4 sm:$0xff]   ;;  %v11671_v22 = vld [vmem:[#allocation11 + $0x660] ss:$16 sps:$4 sm:$0xff]  }
 0x357   :  { %5354 = vmatprep.subr.bf16.mxu1 %v11616_v3  ;;  %v11674_v3 = vld [vmem:[#allocation11 + $0x860] ss:$16 sps:$4 sm:$0xff]  }
 0x359   :  { %5314 = vmatpush1.bf16.msra.mxu0 %v11611_v45  ;;  %v11679_v45 = vld [vmem:[#allocation11 + $0x684] ss:$16 sps:$4 sm:$0xff]  }
 0x35a   :  { %5355 = vmatpush1.bf16.msra.mxu1 %v11614_v8  ;;  %5315 = vmatprep.subr.bf16.mxu0 %v11619_v46  ;;  %v11682_v8 = vld [vmem:[#allocation11 + $0x884] ss:$16 sps:$4 sm:$0xff]   ;;  %v11677_v46 = vld [vmem:[#allocation11 + $0x680] ss:$16 sps:$4 sm:$0xff]  }
 0x35b   :  { %5356 = vmatprep.subr.bf16.mxu1 %v11622_v48  ;;  %v11680_v48 = vld [vmem:[#allocation11 + $0x880] ss:$16 sps:$4 sm:$0xff]  }
 0x35d   :  { %5316 = vmatpush1.bf16.msra.mxu0 %v11617_v57  ;;  %v11685_v57 = vld [vmem:[#allocation11 + $0x6a4] ss:$16 sps:$4 sm:$0xff]  }
 0x35e   :  { %5357 = vmatpush1.bf16.msra.mxu1 %v11620_v62  ;;  %5317 = vmatprep.subr.bf16.mxu0 %v11625_v58  ;;  %v11688_v62 = vld [vmem:[#allocation11 + $0x8a4] ss:$16 sps:$4 sm:$0xff]   ;;  %v11683_v58 = vld [vmem:[#allocation11 + $0x6a0] ss:$16 sps:$4 sm:$0xff]  }
 0x35f   :  { %5358 = vmatprep.subr.bf16.mxu1 %v11628_v50  ;;  %v11686_v50 = vld [vmem:[#allocation11 + $0x8a0] ss:$16 sps:$4 sm:$0xff]  }
 0x361   :  { %5318 = vmatpush1.bf16.msra.mxu0 %v11623_v38  ;;  %v11691_v38 = vld [vmem:[#allocation11 + $0x6c4] ss:$16 sps:$4 sm:$0xff]  }
 0x362   :  { %5359 = vmatpush1.bf16.msra.mxu1 %v11626_v52  ;;  %5319 = vmatprep.subr.bf16.mxu0 %v11631_v54  ;;  %v11694_v52 = vld [vmem:[#allocation11 + $0x8c4] ss:$16 sps:$4 sm:$0xff]  }
 0x363   :  { %5360 = vmatprep.subr.bf16.mxu1 %v11634_v55 }
 0x365   :  { %5320 = vmatpush1.bf16.msra.mxu0 %v11629_v16 }
 0x366   :  { %5361 = vmatpush1.bf16.msra.mxu1 %v11632_v61  ;;  %5321 = vmatprep.subr.bf16.mxu0 %v11637_v0 }
 0x367   :  { %5362 = vmatprep.subr.bf16.mxu1 %v11640_v1 }
 0x369   :  { %5322 = vmatpush1.bf16.msra.mxu0 %v11635_v32 }
 0x36a   :  { %5363 = vmatpush1.bf16.msra.mxu1 %v11638_v9  ;;  %5323 = vmatprep.subr.bf16.mxu0 %v11643_v37  ;;  %v11689_v37 = vld [vmem:[#allocation11 + $0x6c0] ss:$16 sps:$4 sm:$0xff]  }
 0x36b   :  { %5364 = vmatprep.subr.bf16.mxu1 %v11646_v10  ;;  %v11692_v10 = vld [vmem:[#allocation11 + $0x8c0] ss:$16 sps:$4 sm:$0xff]  }
 0x36d   :  { %5324 = vmatpush1.bf16.msra.mxu0 %v11641_v63 }
 0x36e   :  { %5365 = vmatpush1.bf16.msra.mxu1 %v11644_v36  ;;  %5325 = vmatprep.subr.bf16.mxu0 %v11649_v23 }
 0x36f   :  { %5366 = vmatprep.subr.bf16.mxu1 %v11652_v11  ;;  %v11697_v11 = vld [vmem:[#allocation11 + $0x6e4] ss:$16 sps:$4 sm:$0xff]  }
 0x371   :  { %5326 = vmatpush1.bf16.msra.mxu0 %v11647_v4 }
 0x372   :  { %5367 = vmatpush1.bf16.msra.mxu1 %v11650_v12  ;;  %6751 = vmatprep.subr.bf16.mxu0 %v11655_v15  ;;  %v11698_v12 = vld [vmem:[#allocation11 + $0x8e0] ss:$16 sps:$4 sm:$0xff]   ;;  %v11703_v15 = vld [vmem:[#allocation11 + $0x704] ss:$16 sps:$4 sm:$0xff]  }
 0x373   :  { %6792 = vmatprep.subr.bf16.mxu1 %v11658_v28  ;;  %v11706_v28 = vld [vmem:[#allocation11 + $0x904] ss:$16 sps:$4 sm:$0xff]  }
 0x374   :  { %5328 = vmatmul.mubr.bf16.vlgmr.msra.gmra.mrb[40].mxu0 %v13079_v30 }
 0x375   :  { %5369 = vmatmul.mubr.bf16.vlgmr.msra.gmra.mrb[40].mxu1 %v13083_v44  ;;  %6752 = vmatpush1.bf16.msra.mxu0 %v11653_v17  ;;  %v11704_v17 = vld [vmem:[#allocation11 + $0x900] ss:$16 sps:$4 sm:$0xff]  }
 0x376   :  { %6793 = vmatpush1.bf16.msra.mxu1 %v11656_v18  ;;  %6753 = vmatprep.subr.bf16.mxu0 %v11661_v21  ;;  %v11709_v18 = vld [vmem:[#allocation11 + $0x724] ss:$16 sps:$4 sm:$0xff]  }
 0x377   :  { %6794 = vmatprep.subr.bf16.mxu1 %v11664_v29  ;;  %6783 = vmatprep.mubr.bf16.mxu0 %v12995_v24  ;;  %v11712_v21 = vld [vmem:[#allocation11 + $0x924] ss:$16 sps:$4 sm:$0xff]   ;;  %v11710_v29 = vld [vmem:[#allocation11 + $0x920] ss:$16 sps:$4 sm:$0xff]  }
 0x378   :  { %6824 = vmatprep.mubr.bf16.mxu1 %v12999_v26 }
 0x379   :  { %6754 = vmatpush1.bf16.msra.mxu0 %v11659_v31  ;;  %v11715_v31 = vld [vmem:[#allocation11 + $0x744] ss:$16 sps:$4 sm:$0xff]  }
 0x37a   :  { %6795 = vmatpush1.bf16.msra.mxu1 %v11662_v35  ;;  %6755 = vmatprep.subr.bf16.mxu0 %v11667_v39  ;;  %v11718_v35 = vld [vmem:[#allocation11 + $0x944] ss:$16 sps:$4 sm:$0xff]   ;;  %v11713_v39 = vld [vmem:[#allocation11 + $0x740] ss:$16 sps:$4 sm:$0xff]  }
 0x37b   :  { %6796 = vmatprep.subr.bf16.mxu1 %v11670_v40  ;;  %v11716_v40 = vld [vmem:[#allocation11 + $0x940] ss:$16 sps:$4 sm:$0xff]  }
 0x37d   :  { %6756 = vmatpush1.bf16.msra.mxu0 %v11665_v53  ;;  %v11721_v53 = vld [vmem:[#allocation11 + $0x764] ss:$16 sps:$4 sm:$0xff]  }
 0x37e   :  { %6797 = vmatpush1.bf16.msra.mxu1 %v11668_v41  ;;  %6757 = vmatprep.subr.bf16.mxu0 %v11673_v60  ;;  %v11724_v41 = vld [vmem:[#allocation11 + $0x964] ss:$16 sps:$4 sm:$0xff]   ;;  %v11719_v60 = vld [vmem:[#allocation11 + $0x760] ss:$16 sps:$4 sm:$0xff]  }
 0x37f   :  { %6798 = vmatprep.subr.bf16.mxu1 %v11676_v42  ;;  %v11722_v42 = vld [vmem:[#allocation11 + $0x960] ss:$16 sps:$4 sm:$0xff]  }
 0x381   :  { %6758 = vmatpush1.bf16.msra.mxu0 %v11671_v22  ;;  %v11727_v22 = vld [vmem:[#allocation11 + $0x784] ss:$16 sps:$4 sm:$0xff]  }
 0x382   :  { %6799 = vmatpush1.bf16.msra.mxu1 %v11674_v3  ;;  %6759 = vmatprep.subr.bf16.mxu0 %v11679_v45  ;;  %v11730_v3 = vld [vmem:[#allocation11 + $0x984] ss:$16 sps:$4 sm:$0xff]   ;;  %v11725_v45 = vld [vmem:[#allocation11 + $0x780] ss:$16 sps:$4 sm:$0xff]  }
 0x383   :  { %6800 = vmatprep.subr.bf16.mxu1 %v11682_v8  ;;  %v11728_v8 = vld [vmem:[#allocation11 + $0x980] ss:$16 sps:$4 sm:$0xff]  }
 0x385   :  { %6760 = vmatpush1.bf16.msra.mxu0 %v11677_v46  ;;  %v11733_v46 = vld [vmem:[#allocation11 + $0x7a4] ss:$16 sps:$4 sm:$0xff]  }
 0x386   :  { %6801 = vmatpush1.bf16.msra.mxu1 %v11680_v48  ;;  %6761 = vmatprep.subr.bf16.mxu0 %v11685_v57  ;;  %v11736_v48 = vld [vmem:[#allocation11 + $0x9a4] ss:$16 sps:$4 sm:$0xff]   ;;  %v11731_v57 = vld [vmem:[#allocation11 + $0x7a0] ss:$16 sps:$4 sm:$0xff]  }
 0x387   :  { %6802 = vmatprep.subr.bf16.mxu1 %v11688_v62  ;;  %v4297_v54 = vpop.f32.mrb[28].mxu0  ;;  %v11734_v62 = vld [vmem:[#allocation11 + $0x9a0] ss:$16 sps:$4 sm:$0xff]  }
 0x388   :  { %v13097_v55 = vpop.f32.mrb[28].mxu1  ;;  %v4298_v16 = vadd.f32 %v4297_v54, %v13089_v13  ;;  %v4299_v61 = vpop.f32.mrb[29].mxu0  ;;  %v11700_v13 = vld [vmem:[#allocation11 + $0x8e4] ss:$16 sps:$4 sm:$0xff]  }
 0x389   :  { %v13100_v0 = vpop.f32.mrb[29].mxu1  ;;  %v4300_v1 = vadd.f32 %v4299_v61, %v13091_v43  ;;  %v4301_v32 = vpop.f32.mrb[30].mxu0  ;;  %6762 = vmatpush1.bf16.msra.mxu0 %v11683_v58  ;;  %v11695_v43 = vld [vmem:[#allocation11 + $0x6e0] ss:$16 sps:$4 sm:$0xff]   ;;  %v11739_v58 = vld [vmem:[#allocation11 + $0x7c4] ss:$16 sps:$4 sm:$0xff]  }
 0x38a   :  { %v4342_v9 = vpop.f32.mrb[30].mxu1  ;;  %6803 = vmatpush1.bf16.msra.mxu1 %v11686_v50  ;;  %v13104_v63 = vadd.f32 %v4298_v16, %v13044_v19  ;;  %v4302_v36 = vpop.f32.mrb[31].mxu0  ;;  %6763 = vmatprep.subr.bf16.mxu0 %v11691_v38  ;;  %v11701_v19 = vld [vmem:[#allocation11 + $0x700] ss:$16 sps:$4 sm:$0xff]   ;;  %v11742_v50 = vld [vmem:[#allocation11 + $0x9c4] ss:$16 sps:$4 sm:$0xff]  }
 0x38b   :  { %v4343_v23 = vpop.f32.mrb[31].mxu1  ;;  %6804 = vmatprep.subr.bf16.mxu1 %v11694_v52  ;;  %v13107_v4 = vadd.f32 %v4300_v1, %v13050_v2  ;;  %v11707_v2 = vld [vmem:[#allocation11 + $0x720] ss:$16 sps:$4 sm:$0xff]   ;;  %v11745_v54 = vld [vmem:[#allocation11 + $0x7e4] ss:$16 sps:$4 sm:$0xff]  }
 0x38c   :  { %v11737_v38 = vld [vmem:[#allocation11 + $0x7c0] ss:$16 sps:$4 sm:$0xff]   ;;  %v11748_v16 = vld [vmem:[#allocation11 + $0x9e4] ss:$16 sps:$4 sm:$0xff]   ;;  %v11754_v9 = vld [vmem:[#allocation11 + $0x60c] ss:$16 sps:$4 sm:$0xff]  }
 0x38d   :  { %6764 = vmatpush1.bf16.msra.mxu0 %v11689_v37  ;;  %v11740_v52 = vld [vmem:[#allocation11 + $0x9c0] ss:$16 sps:$4 sm:$0xff]   ;;  %v11751_v32 = vld [vmem:[#allocation11 + $0xa04] ss:$16 sps:$4 sm:$0xff]   ;;  %v11760_v23 = vld [vmem:[#allocation11 + $0x62c] ss:$16 sps:$4 sm:$0xff]  }
 0x38e   :  { %6805 = vmatpush1.bf16.msra.mxu1 %v11692_v10  ;;  %6765 = vmatprep.subr.bf16.mxu0 %v11697_v11  ;;  %v11743_v61 = vld [vmem:[#allocation11 + $0x7e0] ss:$16 sps:$4 sm:$0xff]   ;;  %v11752_v10 = vld [vmem:[#allocation11 + $0x608] ss:$16 sps:$4 sm:$0xff]   ;;  %v11757_v36 = vld [vmem:[#allocation11 + $0xa24] ss:$16 sps:$4 sm:$0xff]  }
 0x38f   :  { %6806 = vmatprep.subr.bf16.mxu1 %v11700_v13  ;;  %v11746_v1 = vld [vmem:[#allocation11 + $0x9e0] ss:$16 sps:$4 sm:$0xff]   ;;  %v11758_v13 = vld [vmem:[#allocation11 + $0x628] ss:$16 sps:$4 sm:$0xff]  }
 0x390   :  { %v11749_v37 = vld [vmem:[#allocation11 + $0xa00] ss:$16 sps:$4 sm:$0xff]  }
 0x391   :  { %6766 = vmatpush1.bf16.msra.mxu0 %v11695_v43  ;;  %v11755_v11 = vld [vmem:[#allocation11 + $0xa20] ss:$16 sps:$4 sm:$0xff]   ;;  %v11763_v43 = vld [vmem:[#allocation11 + $0xa44] ss:$16 sps:$4 sm:$0xff]  }
 0x392   :  { %6807 = vmatpush1.bf16.msra.mxu1 %v11698_v12  ;;  %6767 = vmatprep.subr.bf16.mxu0 %v11703_v15  ;;  %v11766_v12 = vld [vmem:[#allocation11 + $0x64c] ss:$16 sps:$4 sm:$0xff]   ;;  %v11761_v15 = vld [vmem:[#allocation11 + $0xa40] ss:$16 sps:$4 sm:$0xff]  }
 0x393   :  { %6808 = vmatprep.subr.bf16.mxu1 %v11706_v28  ;;  %v11764_v28 = vld [vmem:[#allocation11 + $0x648] ss:$16 sps:$4 sm:$0xff]  }
 0x395   :  { %6768 = vmatpush1.bf16.msra.mxu0 %v11701_v19  ;;  %v11769_v19 = vld [vmem:[#allocation11 + $0xa64] ss:$16 sps:$4 sm:$0xff]  }
 0x396   :  { %6809 = vmatpush1.bf16.msra.mxu1 %v11704_v17  ;;  %6769 = vmatprep.subr.bf16.mxu0 %v11709_v18  ;;  %v11772_v17 = vld [vmem:[#allocation11 + $0x66c] ss:$16 sps:$4 sm:$0xff]   ;;  %v11767_v18 = vld [vmem:[#allocation11 + $0xa60] ss:$16 sps:$4 sm:$0xff]  }
 0x397   :  { %6810 = vmatprep.subr.bf16.mxu1 %v11712_v21  ;;  %v11770_v21 = vld [vmem:[#allocation11 + $0x668] ss:$16 sps:$4 sm:$0xff]  }
 0x399   :  { %6770 = vmatpush1.bf16.msra.mxu0 %v11707_v2  ;;  %v11775_v2 = vld [vmem:[#allocation11 + $0xa84] ss:$16 sps:$4 sm:$0xff]  }
 0x39a   :  { %6811 = vmatpush1.bf16.msra.mxu1 %v11710_v29  ;;  %6771 = vmatprep.subr.bf16.mxu0 %v11715_v31  ;;  %v11778_v29 = vld [vmem:[#allocation11 + $0x68c] ss:$16 sps:$4 sm:$0xff]   ;;  %v11773_v31 = vld [vmem:[#allocation11 + $0xa80] ss:$16 sps:$4 sm:$0xff]  }
 0x39b   :  { %6812 = vmatprep.subr.bf16.mxu1 %v11718_v35  ;;  %v11781_v35 = vld [vmem:[#allocation11 + $0xaa4] ss:$16 sps:$4 sm:$0xff]  }
 0x39d   :  { %6772 = vmatpush1.bf16.msra.mxu0 %v11713_v39  ;;  %v11784_v39 = vld [vmem:[#allocation11 + $0x6ac] ss:$16 sps:$4 sm:$0xff]  }
 0x39e   :  { %6813 = vmatpush1.bf16.msra.mxu1 %v11716_v40  ;;  %6773 = vmatprep.subr.bf16.mxu0 %v11721_v53  ;;  %v11779_v40 = vld [vmem:[#allocation11 + $0xaa0] ss:$16 sps:$4 sm:$0xff]   ;;  %v11782_v53 = vld [vmem:[#allocation11 + $0x6a8] ss:$16 sps:$4 sm:$0xff]  }
 0x39f   :  { %6814 = vmatprep.subr.bf16.mxu1 %v11724_v41  ;;  %v11787_v41 = vld [vmem:[#allocation11 + $0xac4] ss:$16 sps:$4 sm:$0xff]  }
 0x3a1   :  { %6774 = vmatpush1.bf16.msra.mxu0 %v11719_v60  ;;  %v11790_v60 = vld [vmem:[#allocation11 + $0x6cc] ss:$16 sps:$4 sm:$0xff]  }
 0x3a2   :  { %6815 = vmatpush1.bf16.msra.mxu1 %v11722_v42  ;;  %6775 = vmatprep.subr.bf16.mxu0 %v11727_v22 }
 0x3a3   :  { %6816 = vmatprep.subr.bf16.mxu1 %v11730_v3 }
 0x3a5   :  { %6776 = vmatpush1.bf16.msra.mxu0 %v11725_v45 }
 0x3a6   :  { %6817 = vmatpush1.bf16.msra.mxu1 %v11728_v8  ;;  %6777 = vmatprep.subr.bf16.mxu0 %v11733_v46 }
 0x3a7   :  { %6818 = vmatprep.subr.bf16.mxu1 %v11736_v48 }
 0x3a9   :  { %6778 = vmatpush1.bf16.msra.mxu0 %v11731_v57 }
 0x3aa   :  { %6819 = vmatpush1.bf16.msra.mxu1 %v11734_v62  ;;  %6779 = vmatprep.subr.bf16.mxu0 %v11739_v58  ;;  %v11785_v62 = vld [vmem:[#allocation11 + $0xac0] ss:$16 sps:$4 sm:$0xff]   ;;  %v11788_v58 = vld [vmem:[#allocation11 + $0x6c8] ss:$16 sps:$4 sm:$0xff]  }
 0x3ab   :  { %6820 = vmatprep.subr.bf16.mxu1 %v11742_v50 }
 0x3ad   :  { %6780 = vmatpush1.bf16.msra.mxu0 %v11737_v38 }
 0x3ae   :  { %6821 = vmatpush1.bf16.msra.mxu1 %v11740_v52  ;;  %6781 = vmatprep.subr.bf16.mxu0 %v11745_v54  ;;  %v11793_v54 = vld [vmem:[#allocation11 + $0xae4] ss:$16 sps:$4 sm:$0xff]  }
 0x3af   :  { %6822 = vmatprep.subr.bf16.mxu1 %v11748_v16  ;;  %v11796_v16 = vld [vmem:[#allocation11 + $0x6ec] ss:$16 sps:$4 sm:$0xff]  }
 0x3b1   :  { %6782 = vmatpush1.bf16.msra.mxu0 %v11743_v61 }
 0x3b2   :  { %6823 = vmatpush1.bf16.msra.mxu1 %v11746_v1  ;;  %6833 = vmatprep.subr.bf16.mxu0 %v11751_v32  ;;  %v11794_v32 = vld [vmem:[#allocation11 + $0x6e8] ss:$16 sps:$4 sm:$0xff]  }
 0x3b3   :  { %6874 = vmatprep.subr.bf16.mxu1 %v11754_v9  ;;  %v11799_v9 = vld [vmem:[#allocation11 + $0xb04] ss:$16 sps:$4 sm:$0xff]  }
 0x3b4   :  { %6784 = vmatmul.mubr.bf16.vlgmr.msra.gmra.mrb[44].mxu0 %v13015_v56 }
 0x3b5   :  { %6825 = vmatmul.mubr.bf16.vlgmr.msra.gmra.mrb[44].mxu1 %v13019_v27  ;;  %6834 = vmatpush1.bf16.msra.mxu0 %v11749_v37  ;;  %v11802_v37 = vld [vmem:[#allocation11 + $0x70c] ss:$16 sps:$4 sm:$0xff]  }
 0x3b6   :  { %6875 = vmatpush1.bf16.msra.mxu1 %v11752_v10  ;;  %6835 = vmatprep.subr.bf16.mxu0 %v11757_v36  ;;  %v11797_v10 = vld [vmem:[#allocation11 + $0xb00] ss:$16 sps:$4 sm:$0xff]   ;;  %v11800_v36 = vld [vmem:[#allocation11 + $0x708] ss:$16 sps:$4 sm:$0xff]  }
 0x3b7   :  { %6876 = vmatprep.subr.bf16.mxu1 %v11760_v23  ;;  %6865 = vmatprep.mubr.bf16.mxu0 %v13023_v59  ;;  %v11805_v23 = vld [vmem:[#allocation11 + $0xb24] ss:$16 sps:$4 sm:$0xff]  }
 0x3b8   :  { %6906 = vmatprep.mubr.bf16.mxu1 %v12995_v24  ;;  %v11776_v24 = vld [vmem:[#allocation11 + $0x688] ss:$16 sps:$4 sm:$0xff]  }
 0x3b9   :  { %6836 = vmatpush1.bf16.msra.mxu0 %v11755_v11  ;;  %v11806_v11 = vld [vmem:[#allocation11 + $0x728] ss:$16 sps:$4 sm:$0xff]  }
 0x3ba   :  { %6877 = vmatpush1.bf16.msra.mxu1 %v11758_v13  ;;  %6837 = vmatprep.subr.bf16.mxu0 %v11763_v43  ;;  %v11811_v13 = vld [vmem:[#allocation11 + $0xb44] ss:$16 sps:$4 sm:$0xff]   ;;  %v11814_v43 = vld [vmem:[#allocation11 + $0x74c] ss:$16 sps:$4 sm:$0xff]  }
 0x3bb   :  { %6878 = vmatprep.subr.bf16.mxu1 %v11766_v12  ;;  %v11809_v12 = vld [vmem:[#allocation11 + $0xb40] ss:$16 sps:$4 sm:$0xff]  }
 0x3bd   :  { %6838 = vmatpush1.bf16.msra.mxu0 %v11761_v15  ;;  %v11812_v15 = vld [vmem:[#allocation11 + $0x748] ss:$16 sps:$4 sm:$0xff]  }
 0x3be   :  { %6879 = vmatpush1.bf16.msra.mxu1 %v11764_v28  ;;  %6839 = vmatprep.subr.bf16.mxu0 %v11769_v19  ;;  %v11817_v28 = vld [vmem:[#allocation11 + $0xb64] ss:$16 sps:$4 sm:$0xff]   ;;  %v11820_v19 = vld [vmem:[#allocation11 + $0x76c] ss:$16 sps:$4 sm:$0xff]  }
 0x3bf   :  { %6880 = vmatprep.subr.bf16.mxu1 %v11772_v17  ;;  %v11815_v17 = vld [vmem:[#allocation11 + $0xb60] ss:$16 sps:$4 sm:$0xff]  }
 0x3c1   :  { %6840 = vmatpush1.bf16.msra.mxu0 %v11767_v18  ;;  %v11818_v18 = vld [vmem:[#allocation11 + $0x768] ss:$16 sps:$4 sm:$0xff]  }
 0x3c2   :  { %6881 = vmatpush1.bf16.msra.mxu1 %v11770_v21  ;;  %6841 = vmatprep.subr.bf16.mxu0 %v11775_v2  ;;  %v11823_v21 = vld [vmem:[#allocation11 + $0xb84] ss:$16 sps:$4 sm:$0xff]   ;;  %v11826_v2 = vld [vmem:[#allocation11 + $0x78c] ss:$16 sps:$4 sm:$0xff]  }
 0x3c3   :  { %6882 = vmatprep.subr.bf16.mxu1 %v11778_v29  ;;  %v11821_v29 = vld [vmem:[#allocation11 + $0xb80] ss:$16 sps:$4 sm:$0xff]  }
 0x3c5   :  { %6842 = vmatpush1.bf16.msra.mxu0 %v11773_v31  ;;  %v11824_v31 = vld [vmem:[#allocation11 + $0x788] ss:$16 sps:$4 sm:$0xff]  }
 0x3c6   :  { %6883 = vmatpush1.bf16.msra.mxu1 %v11776_v24  ;;  %6843 = vmatprep.subr.bf16.mxu0 %v11781_v35  ;;  %v11829_v24 = vld [vmem:[#allocation11 + $0xba4] ss:$16 sps:$4 sm:$0xff]   ;;  %v11832_v35 = vld [vmem:[#allocation11 + $0x7ac] ss:$16 sps:$4 sm:$0xff]  }
 0x3c7   :  { %6884 = vmatprep.subr.bf16.mxu1 %v11784_v39  ;;  %v4379_v42 = vpop.f32.mrb[32].mxu0  ;;  %v11827_v39 = vld [vmem:[#allocation11 + $0xba0] ss:$16 sps:$4 sm:$0xff]  }
 0x3c8   :  { %v4420_v22 = vpop.f32.mrb[32].mxu1  ;;  %v4380_v3 = vadd.f32 %v4379_v42, %v13097_v55  ;;  %v4381_v45 = vpop.f32.mrb[33].mxu0  ;;  %v11836_v42 = vld [vmem:[#allocation11 + $0x7c8] ss:$16 sps:$4 sm:$0xff]  }
 0x3c9   :  { %v4422_v8 = vpop.f32.mrb[33].mxu1  ;;  %v4382_v46 = vadd.f32 %v4381_v45, %v13100_v0  ;;  %v4383_v48 = vpop.f32.mrb[34].mxu0  ;;  %6844 = vmatpush1.bf16.msra.mxu0 %v11779_v40  ;;  %v11791_v0 = vld [vmem:[#allocation11 + $0xae0] ss:$16 sps:$4 sm:$0xff]   ;;  %v11830_v40 = vld [vmem:[#allocation11 + $0x7a8] ss:$16 sps:$4 sm:$0xff]  }
 0x3ca   :  { %v4424_v57 = vpop.f32.mrb[34].mxu1  ;;  %6885 = vmatpush1.bf16.msra.mxu1 %v11782_v53  ;;  %v4421_v50 = vadd.f32 %v4420_v22, %v4380_v3  ;;  %v4384_v38 = vpop.f32.mrb[35].mxu0  ;;  %6845 = vmatprep.subr.bf16.mxu0 %v11787_v41  ;;  %v11835_v53 = vld [vmem:[#allocation11 + $0xbc4] ss:$16 sps:$4 sm:$0xff]   ;;  %v11838_v41 = vld [vmem:[#allocation11 + $0x7cc] ss:$16 sps:$4 sm:$0xff]  }
 0x3cb   :  { %v4425_v52 = vpop.f32.mrb[35].mxu1  ;;  %6886 = vmatprep.subr.bf16.mxu1 %v11790_v60  ;;  %v4423_v61 = vadd.f32 %v4422_v8, %v4382_v46  ;;  %v11833_v60 = vld [vmem:[#allocation11 + $0xbc0] ss:$16 sps:$4 sm:$0xff]   ;;  %v11841_v22 = vld [vmem:[#allocation11 + $0xbe4] ss:$16 sps:$4 sm:$0xff]  }
 0x3cc   :  { %v13116_v55 = vadd.f32 %v4421_v50, %v13073_v33  ;;  %v11808_v33 = vld [vmem:[#allocation11 + $0x72c] ss:$16 sps:$4 sm:$0xff]   ;;  %v11839_v45 = vld [vmem:[#allocation11 + $0xbe0] ss:$16 sps:$4 sm:$0xff]   ;;  %v11842_v8 = vld [vmem:[#allocation11 + $0x7e8] ss:$16 sps:$4 sm:$0xff]  }
 0x3cd   :  { %v13119_v1 = vadd.f32 %v4423_v61, %v13075_v49  ;;  %6846 = vmatpush1.bf16.msra.mxu0 %v11785_v62  ;;  %v11803_v49 = vld [vmem:[#allocation11 + $0xb20] ss:$16 sps:$4 sm:$0xff]   ;;  %v11844_v3 = vld [vmem:[#allocation11 + $0x7ec] ss:$16 sps:$4 sm:$0xff]   ;;  %v11845_v57 = vld [vmem:[#allocation11 + $0x808] ss:$16 sps:$4 sm:$0xff]  }
 0x3ce   :  { %6887 = vmatpush1.bf16.msra.mxu1 %v11788_v58  ;;  %6847 = vmatprep.subr.bf16.mxu0 %v11793_v54  ;;  %v11847_v46 = vld [vmem:[#allocation11 + $0x80c] ss:$16 sps:$4 sm:$0xff]   ;;  %v11848_v62 = vld [vmem:[#allocation11 + $0xa08] ss:$16 sps:$4 sm:$0xff]  }
 0x3cf   :  { %6888 = vmatprep.subr.bf16.mxu1 %v11796_v16  ;;  %v11850_v48 = vld [vmem:[#allocation11 + $0xa0c] ss:$16 sps:$4 sm:$0xff]   ;;  %v11851_v38 = vld [vmem:[#allocation11 + $0x828] ss:$16 sps:$4 sm:$0xff]  }
 0x3d0   :  { %v11853_v58 = vld [vmem:[#allocation11 + $0x82c] ss:$16 sps:$4 sm:$0xff]   ;;  %v11854_v52 = vld [vmem:[#allocation11 + $0xa28] ss:$16 sps:$4 sm:$0xff]  }
 0x3d1   :  { %6848 = vmatpush1.bf16.msra.mxu0 %v11791_v0  ;;  %v11856_v50 = vld [vmem:[#allocation11 + $0xa2c] ss:$16 sps:$4 sm:$0xff]   ;;  %v11857_v61 = vld [vmem:[#allocation11 + $0x848] ss:$16 sps:$4 sm:$0xff]  }
 0x3d2   :  { %6889 = vmatpush1.bf16.msra.mxu1 %v11794_v32  ;;  %6849 = vmatprep.subr.bf16.mxu0 %v11799_v9  ;;  %v11859_v54 = vld [vmem:[#allocation11 + $0x84c] ss:$16 sps:$4 sm:$0xff]   ;;  %v11860_v0 = vld [vmem:[#allocation11 + $0xa48] ss:$16 sps:$4 sm:$0xff]  }
 0x3d3   :  { %6890 = vmatprep.subr.bf16.mxu1 %v11802_v37  ;;  %v11862_v16 = vld [vmem:[#allocation11 + $0xa4c] ss:$16 sps:$4 sm:$0xff]   ;;  %v11863_v9 = vld [vmem:[#allocation11 + $0x868] ss:$16 sps:$4 sm:$0xff]  }
 0x3d4   :  { %v11865_v32 = vld [vmem:[#allocation11 + $0x86c] ss:$16 sps:$4 sm:$0xff]   ;;  %v11866_v37 = vld [vmem:[#allocation11 + $0xa68] ss:$16 sps:$4 sm:$0xff]  }
 0x3d5   :  { %6850 = vmatpush1.bf16.msra.mxu0 %v11797_v10  ;;  %v11871_v10 = vld [vmem:[#allocation11 + $0x88c] ss:$16 sps:$4 sm:$0xff]  }
 0x3d6   :  { %6891 = vmatpush1.bf16.msra.mxu1 %v11800_v36  ;;  %6851 = vmatprep.subr.bf16.mxu0 %v11805_v23  ;;  %v11874_v36 = vld [vmem:[#allocation11 + $0xa8c] ss:$16 sps:$4 sm:$0xff]  }
 0x3d7   :  { %6892 = vmatprep.subr.bf16.mxu1 %v11808_v33  ;;  %v11877_v23 = vld [vmem:[#allocation11 + $0x8ac] ss:$16 sps:$4 sm:$0xff]  }
 0x3d8   :  { %v11880_v33 = vld [vmem:[#allocation11 + $0xaac] ss:$16 sps:$4 sm:$0xff]  }
 0x3d9   :  { %6852 = vmatpush1.bf16.msra.mxu0 %v11803_v49  ;;  %v11875_v49 = vld [vmem:[#allocation11 + $0x8a8] ss:$16 sps:$4 sm:$0xff]  }
 0x3da   :  { %6893 = vmatpush1.bf16.msra.mxu1 %v11806_v11  ;;  %6853 = vmatprep.subr.bf16.mxu0 %v11811_v13  ;;  %v11878_v11 = vld [vmem:[#allocation11 + $0xaa8] ss:$16 sps:$4 sm:$0xff]   ;;  %v11883_v13 = vld [vmem:[#allocation11 + $0x8cc] ss:$16 sps:$4 sm:$0xff]  }
 0x3db   :  { %6894 = vmatprep.subr.bf16.mxu1 %v11814_v43  ;;  %v11886_v43 = vld [vmem:[#allocation11 + $0xacc] ss:$16 sps:$4 sm:$0xff]  }
 0x3dd   :  { %6854 = vmatpush1.bf16.msra.mxu0 %v11809_v12 }
 0x3de   :  { %6895 = vmatpush1.bf16.msra.mxu1 %v11812_v15  ;;  %6855 = vmatprep.subr.bf16.mxu0 %v11817_v28 }
 0x3df   :  { %6896 = vmatprep.subr.bf16.mxu1 %v11820_v19 }
 0x3e1   :  { %6856 = vmatpush1.bf16.msra.mxu0 %v11815_v17 }
 0x3e2   :  { %6897 = vmatpush1.bf16.msra.mxu1 %v11818_v18  ;;  %6857 = vmatprep.subr.bf16.mxu0 %v11823_v21 }
 0x3e3   :  { %6898 = vmatprep.subr.bf16.mxu1 %v11826_v2 }
 0x3e5   :  { %6858 = vmatpush1.bf16.msra.mxu0 %v11821_v29  ;;  %v11881_v29 = vld [vmem:[#allocation11 + $0x8c8] ss:$16 sps:$4 sm:$0xff]  }
 0x3e6   :  { %6899 = vmatpush1.bf16.msra.mxu1 %v11824_v31  ;;  %6859 = vmatprep.subr.bf16.mxu0 %v11829_v24  ;;  %v11884_v31 = vld [vmem:[#allocation11 + $0xac8] ss:$16 sps:$4 sm:$0xff]  }
 0x3e7   :  { %6900 = vmatprep.subr.bf16.mxu1 %v11832_v35 }
 0x3e9   :  { %6860 = vmatpush1.bf16.msra.mxu0 %v11827_v39 }
 0x3ea   :  { %6901 = vmatpush1.bf16.msra.mxu1 %v11830_v40  ;;  %6861 = vmatprep.subr.bf16.mxu0 %v11835_v53  ;;  %v11889_v40 = vld [vmem:[#allocation11 + $0x8ec] ss:$16 sps:$4 sm:$0xff]  }
 0x3eb   :  { %6902 = vmatprep.subr.bf16.mxu1 %v11838_v41  ;;  %v11892_v53 = vld [vmem:[#allocation11 + $0xaec] ss:$16 sps:$4 sm:$0xff]  }
 0x3ed   :  { %6862 = vmatpush1.bf16.msra.mxu0 %v11833_v60  ;;  %v11887_v60 = vld [vmem:[#allocation11 + $0x8e8] ss:$16 sps:$4 sm:$0xff]  }
 0x3ee   :  { %6903 = vmatpush1.bf16.msra.mxu1 %v11836_v42  ;;  %6863 = vmatprep.subr.bf16.mxu0 %v11841_v22  ;;  %v11890_v42 = vld [vmem:[#allocation11 + $0xae8] ss:$16 sps:$4 sm:$0xff]   ;;  %v11895_v22 = vld [vmem:[#allocation11 + $0x90c] ss:$16 sps:$4 sm:$0xff]  }
 0x3ef   :  { %6904 = vmatprep.subr.bf16.mxu1 %v11844_v3  ;;  %v11898_v3 = vld [vmem:[#allocation11 + $0xb0c] ss:$16 sps:$4 sm:$0xff]  }
 0x3f1   :  { %6864 = vmatpush1.bf16.msra.mxu0 %v11839_v45  ;;  %v11896_v45 = vld [vmem:[#allocation11 + $0xb08] ss:$16 sps:$4 sm:$0xff]  }
 0x3f2   :  { %6905 = vmatpush1.bf16.msra.mxu1 %v11842_v8  ;;  %6915 = vmatprep.subr.bf16.mxu0 %v11847_v46  ;;  %v11901_v8 = vld [vmem:[#allocation11 + $0x92c] ss:$16 sps:$4 sm:$0xff]  }
 0x3f3   :  { %6956 = vmatprep.subr.bf16.mxu1 %v11850_v48  ;;  %v11904_v46 = vld [vmem:[#allocation11 + $0xb2c] ss:$16 sps:$4 sm:$0xff]   ;;  %v11902_v48 = vld [vmem:[#allocation11 + $0xb28] ss:$16 sps:$4 sm:$0xff]  }
 0x3f4   :  { %6866 = vmatmul.mubr.bf16.vlgmr.msra.gmra.mrb[48].mxu0 %v13037_v20 }
 0x3f5   :  { %6907 = vmatmul.mubr.bf16.vlgmr.msra.gmra.mrb[48].mxu1 %v13015_v56  ;;  %6916 = vmatpush1.bf16.msra.mxu0 %v11845_v57  ;;  %v11868_v56 = vld [vmem:[#allocation11 + $0xa6c] ss:$16 sps:$4 sm:$0xff]  }
 0x3f6   :  { %6957 = vmatpush1.bf16.msra.mxu1 %v11848_v62  ;;  %6917 = vmatprep.subr.bf16.mxu0 %v11853_v58  ;;  %v11907_v57 = vld [vmem:[#allocation11 + $0x94c] ss:$16 sps:$4 sm:$0xff]   ;;  %v11905_v58 = vld [vmem:[#allocation11 + $0x948] ss:$16 sps:$4 sm:$0xff]  }
 0x3f7   :  { %6958 = vmatprep.subr.bf16.mxu1 %v11856_v50  ;;  %6947 = vmatprep.mubr.bf16.mxu0 %v12999_v26  ;;  %v11869_v26 = vld [vmem:[#allocation11 + $0x888] ss:$16 sps:$4 sm:$0xff]   ;;  %v11910_v62 = vld [vmem:[#allocation11 + $0xb4c] ss:$16 sps:$4 sm:$0xff]  }
 0x3f8   :  { %6988 = vmatprep.mubr.bf16.mxu1 %v13023_v59  ;;  %v11872_v59 = vld [vmem:[#allocation11 + $0xa88] ss:$16 sps:$4 sm:$0xff]  }
 0x3f9   :  { %6918 = vmatpush1.bf16.msra.mxu0 %v11851_v38  ;;  %v11908_v50 = vld [vmem:[#allocation11 + $0xb48] ss:$16 sps:$4 sm:$0xff]   ;;  %v11913_v38 = vld [vmem:[#allocation11 + $0x96c] ss:$16 sps:$4 sm:$0xff]  }
 0x3fa   :  { %6959 = vmatpush1.bf16.msra.mxu1 %v11854_v52  ;;  %6919 = vmatprep.subr.bf16.mxu0 %v11859_v54  ;;  %v11916_v52 = vld [vmem:[#allocation11 + $0xb6c] ss:$16 sps:$4 sm:$0xff]   ;;  %v11911_v54 = vld [vmem:[#allocation11 + $0x968] ss:$16 sps:$4 sm:$0xff]  }
 0x3fb   :  { %6960 = vmatprep.subr.bf16.mxu1 %v11862_v16  ;;  %v11914_v16 = vld [vmem:[#allocation11 + $0xb68] ss:$16 sps:$4 sm:$0xff]  }
 0x3fd   :  { %6920 = vmatpush1.bf16.msra.mxu0 %v11857_v61  ;;  %v11919_v61 = vld [vmem:[#allocation11 + $0x98c] ss:$16 sps:$4 sm:$0xff]  }
 0x3fe   :  { %6961 = vmatpush1.bf16.msra.mxu1 %v11860_v0  ;;  %6921 = vmatprep.subr.bf16.mxu0 %v11865_v32  ;;  %v11922_v0 = vld [vmem:[#allocation11 + $0xb8c] ss:$16 sps:$4 sm:$0xff]   ;;  %v11917_v32 = vld [vmem:[#allocation11 + $0x988] ss:$16 sps:$4 sm:$0xff]  }
 0x3ff   :  { %6962 = vmatprep.subr.bf16.mxu1 %v11868_v56  ;;  %v11920_v56 = vld [vmem:[#allocation11 + $0xb88] ss:$16 sps:$4 sm:$0xff]  }
 0x401   :  { %6922 = vmatpush1.bf16.msra.mxu0 %v11863_v9  ;;  %v11925_v9 = vld [vmem:[#allocation11 + $0x9ac] ss:$16 sps:$4 sm:$0xff]  }
 0x402   :  { %6963 = vmatpush1.bf16.msra.mxu1 %v11866_v37  ;;  %6923 = vmatprep.subr.bf16.mxu0 %v11871_v10  ;;  %v11928_v37 = vld [vmem:[#allocation11 + $0xbac] ss:$16 sps:$4 sm:$0xff]   ;;  %v11923_v10 = vld [vmem:[#allocation11 + $0x9a8] ss:$16 sps:$4 sm:$0xff]  }
 0x403   :  { %6964 = vmatprep.subr.bf16.mxu1 %v11874_v36  ;;  %v11926_v36 = vld [vmem:[#allocation11 + $0xba8] ss:$16 sps:$4 sm:$0xff]  }
 0x405   :  { %6924 = vmatpush1.bf16.msra.mxu0 %v11869_v26  ;;  %v11931_v26 = vld [vmem:[#allocation11 + $0x9cc] ss:$16 sps:$4 sm:$0xff]  }
 0x406   :  { %6965 = vmatpush1.bf16.msra.mxu1 %v11872_v59  ;;  %6925 = vmatprep.subr.bf16.mxu0 %v11877_v23  ;;  %v11934_v59 = vld [vmem:[#allocation11 + $0xbcc] ss:$16 sps:$4 sm:$0xff]   ;;  %v11929_v23 = vld [vmem:[#allocation11 + $0x9c8] ss:$16 sps:$4 sm:$0xff]  }
 0x407   :  { %6966 = vmatprep.subr.bf16.mxu1 %v11880_v33  ;;  %v5247_v12 = vpop.f32.mrb[36].mxu0  ;;  %v11932_v33 = vld [vmem:[#allocation11 + $0xbc8] ss:$16 sps:$4 sm:$0xff]  }
 0x408   :  { %v5288_v15 = vpop.f32.mrb[36].mxu1  ;;  %v5249_v19 = vpop.f32.mrb[37].mxu0 }
 0x409   :  { %v5289_v28 = vadd.f32 %v5288_v15, %v5247_v12  ;;  %v5290_v17 = vpop.f32.mrb[37].mxu1  ;;  %v5251_v21 = vpop.f32.mrb[38].mxu0  ;;  %6926 = vmatpush1.bf16.msra.mxu0 %v11875_v49  ;;  %v11937_v49 = vld [vmem:[#allocation11 + $0x9ec] ss:$16 sps:$4 sm:$0xff]   ;;  %v11943_v12 = vld [vmem:[#allocation11 + $0x4] ss:$16 sps:$4 sm:$0xff]  }
 0x40a   :  { %v5291_v18 = vadd.f32 %v5290_v17, %v5249_v19  ;;  %v5292_v2 = vpop.f32.mrb[38].mxu1  ;;  %6967 = vmatpush1.bf16.msra.mxu1 %v11878_v11  ;;  %v5252_v35 = vpop.f32.mrb[39].mxu0  ;;  %6927 = vmatprep.subr.bf16.mxu0 %v11883_v13  ;;  %v11940_v11 = vld [vmem:[#allocation11 + $0xbec] ss:$16 sps:$4 sm:$0xff]   ;;  %v11935_v13 = vld [vmem:[#allocation11 + $0x9e8] ss:$16 sps:$4 sm:$0xff]  }
 0x40b   :  { %v13126_v24 = vadd.f32 %v5289_v28, %v13104_v63  ;;  %v5293_v39 = vpop.f32.mrb[39].mxu1  ;;  %6968 = vmatprep.subr.bf16.mxu1 %v11886_v43  ;;  %v11893_v63 = vld [vmem:[#allocation11 + $0x908] ss:$16 sps:$4 sm:$0xff]   ;;  %v11946_v15 = vld [vmem:[#allocation11 + $0x204] ss:$16 sps:$4 sm:$0xff]  }
 0x40c   :  { %v13129_v41 = vadd.f32 %v5291_v18, %v13107_v4  ;;  %v11899_v4 = vld [vmem:[#allocation11 + $0x928] ss:$16 sps:$4 sm:$0xff]   ;;  %v11941_v28 = vld [vmem:[#allocation11] ss:$16 sps:$4 sm:$0xff]   ;;  %v11949_v17 = vld [vmem:[#allocation11 + $0x24] ss:$16 sps:$4 sm:$0xff]  }
 0x40d   :  { %6928 = vmatpush1.bf16.msra.mxu0 %v11881_v29  ;;  %v11938_v43 = vld [vmem:[#allocation11 + $0xbe8] ss:$16 sps:$4 sm:$0xff]   ;;  %v11944_v19 = vld [vmem:[#allocation11 + $0x200] ss:$16 sps:$4 sm:$0xff]   ;;  %v11952_v18 = vld [vmem:[#allocation11 + $0x224] ss:$16 sps:$4 sm:$0xff]   ;;  %v5383_v29 = vlaneseq }
 0x40e   :  { %6969 = vmatpush1.bf16.msra.mxu1 %v11884_v31  ;;  %6929 = vmatprep.subr.bf16.mxu0 %v11889_v40  ;;  %v11947_v21 = vld [vmem:[#allocation11 + $0x20] ss:$16 sps:$4 sm:$0xff]   ;;  %v11955_v31 = vld [vmem:[#allocation11 + $0x44] ss:$16 sps:$4 sm:$0xff]  }
 0x40f   :  { %6970 = vmatprep.subr.bf16.mxu1 %v11892_v53  ;;  %v11950_v2 = vld [vmem:[#allocation11 + $0x220] ss:$16 sps:$4 sm:$0xff]   ;;  %v11958_v35 = vld [vmem:[#allocation11 + $0x244] ss:$16 sps:$4 sm:$0xff]  }
 0x410   :  { %v11953_v39 = vld [vmem:[#allocation11 + $0x40] ss:$16 sps:$4 sm:$0xff]   ;;  %v11964_v53 = vld [vmem:[#allocation11 + $0x264] ss:$16 sps:$4 sm:$0xff]  }
 0x411   :  { %6930 = vmatpush1.bf16.msra.mxu0 %v11887_v60  ;;  %v11956_v40 = vld [vmem:[#allocation11 + $0x240] ss:$16 sps:$4 sm:$0xff]  }
 0x412   :  { %6971 = vmatpush1.bf16.msra.mxu1 %v11890_v42  ;;  %6931 = vmatprep.subr.bf16.mxu0 %v11895_v22  ;;  %v11959_v60 = vld [vmem:[#allocation11 + $0x60] ss:$16 sps:$4 sm:$0xff]  }
 0x413   :  { %6972 = vmatprep.subr.bf16.mxu1 %v11898_v3  ;;  %v11962_v42 = vld [vmem:[#allocation11 + $0x260] ss:$16 sps:$4 sm:$0xff]  }
 0x415   :  { %6932 = vmatpush1.bf16.msra.mxu0 %v11893_v63  ;;  %v11967_v63 = vld [vmem:[#allocation11 + $0x84] ss:$16 sps:$4 sm:$0xff]  }
 0x416   :  { %6973 = vmatpush1.bf16.msra.mxu1 %v11896_v45  ;;  %6933 = vmatprep.subr.bf16.mxu0 %v11901_v8  ;;  %v11970_v45 = vld [vmem:[#allocation11 + $0x284] ss:$16 sps:$4 sm:$0xff]   ;;  %v5381_v8 = vld [vmem:[#allocation13] sm:$0xf] }
 0x417   :  { %6974 = vmatprep.subr.bf16.mxu1 %v11904_v46  ;;  %v11965_v46 = vld [vmem:[#allocation11 + $0x80] ss:$16 sps:$4 sm:$0xff]  }
 0x419   :  { %6934 = vmatpush1.bf16.msra.mxu0 %v11899_v4  ;;  %v11968_v4 = vld [vmem:[#allocation11 + $0x280] ss:$16 sps:$4 sm:$0xff]  }
 0x41a   :  { %6975 = vmatpush1.bf16.msra.mxu1 %v11902_v48  ;;  %6935 = vmatprep.subr.bf16.mxu0 %v11907_v57 }
 0x41b   :  { %6976 = vmatprep.subr.bf16.mxu1 %v11910_v62  ;;  %v11973_v62 = vld [vmem:[#allocation11 + $0xa4] ss:$16 sps:$4 sm:$0xff]  }
 0x41d   :  { %6936 = vmatpush1.bf16.msra.mxu0 %v11905_v58  ;;  %v11976_v58 = vld [vmem:[#allocation11 + $0x2a4] ss:$16 sps:$4 sm:$0xff]  }
 0x41e   :  { %6977 = vmatpush1.bf16.msra.mxu1 %v11908_v50  ;;  %6937 = vmatprep.subr.bf16.mxu0 %v11913_v38  ;;  %v11971_v38 = vld [vmem:[#allocation11 + $0xa0] ss:$16 sps:$4 sm:$0xff]  }
 0x41f   :  { %6978 = vmatprep.subr.bf16.mxu1 %v11916_v52  ;;  %v11974_v52 = vld [vmem:[#allocation11 + $0x2a0] ss:$16 sps:$4 sm:$0xff]  }
 0x421   :  { %6938 = vmatpush1.bf16.msra.mxu0 %v11911_v54 }
 0x422   :  { %6979 = vmatpush1.bf16.msra.mxu1 %v11914_v16  ;;  %6939 = vmatprep.subr.bf16.mxu0 %v11919_v61 }
 0x423   :  { %6980 = vmatprep.subr.bf16.mxu1 %v11922_v0  ;;  %v11979_v0 = vld [vmem:[#allocation11 + $0xc4] ss:$16 sps:$4 sm:$0xff]  }
 0x425   :  { %6940 = vmatpush1.bf16.msra.mxu0 %v11917_v32  ;;  %v11982_v32 = vld [vmem:[#allocation11 + $0x2c4] ss:$16 sps:$4 sm:$0xff]  }
 0x426   :  { %6981 = vmatpush1.bf16.msra.mxu1 %v11920_v56  ;;  %6941 = vmatprep.subr.bf16.mxu0 %v11925_v9 }
 0x427   :  { %6982 = vmatprep.subr.bf16.mxu1 %v11928_v37 }
 0x429   :  { %6942 = vmatpush1.bf16.msra.mxu0 %v11923_v10 }
 0x42a   :  { %6983 = vmatpush1.bf16.msra.mxu1 %v11926_v36  ;;  %6943 = vmatprep.subr.bf16.mxu0 %v11931_v26 }
 0x42b   :  { %6984 = vmatprep.subr.bf16.mxu1 %v11934_v59 }
 0x42d   :  { %6944 = vmatpush1.bf16.msra.mxu0 %v11929_v23 }
 0x42e   :  { %6985 = vmatpush1.bf16.msra.mxu1 %v11932_v33  ;;  %6945 = vmatprep.subr.bf16.mxu0 %v11937_v49  ;;  %v11980_v49 = vld [vmem:[#allocation11 + $0x2c0] ss:$16 sps:$4 sm:$0xff]  }
 0x42f   :  { %6986 = vmatprep.subr.bf16.mxu1 %v11940_v11 }
 0x431   :  { %6946 = vmatpush1.bf16.msra.mxu0 %v11935_v13 }
 0x432   :  { %6987 = vmatpush1.bf16.msra.mxu1 %v11938_v43  ;;  %7957 = vmatprep.subr.bf16.mxu0 %v11943_v12  ;;  %v11985_v12 = vld [vmem:[#allocation11 + $0xe4] ss:$16 sps:$4 sm:$0xff]  }
 0x433   :  { %7998 = vmatprep.subr.bf16.mxu1 %v11946_v15  ;;  %v11988_v15 = vld [vmem:[#allocation11 + $0x2e4] ss:$16 sps:$4 sm:$0xff]  }
 0x434   :  { %6948 = vmatmul.mubr.bf16.vlgmr.msra.gmra.mrb[52].mxu0 %v13019_v27  ;;  %v5384_v27 = vshrl.u32 %v5383_v29, 7 }
 0x435   :  { %6989 = vmatmul.mubr.bf16.vlgmr.msra.gmra.mrb[52].mxu1 %v13037_v20  ;;  %7958 = vmatpush1.bf16.msra.mxu0 %v11941_v28  ;;  %v11961_v20 = vld [vmem:[#allocation11 + $0x64] ss:$16 sps:$4 sm:$0xff]  }
 0x436   :  { %7999 = vmatpush1.bf16.msra.mxu1 %v11944_v19  ;;  %7959 = vmatprep.subr.bf16.mxu0 %v11949_v17  ;;  %v13135_v22 = vsub.s32 0, %v5384_v27  ;;  %v13137_v3 = vsub.s32 1, %v5384_v27  ;;  %v13141_v50 = vsub.s32 2, %v5384_v27  ;;  %v13143_v54 = vsub.s32 3, %v5384_v27 }
 0x437   :  { %8000 = vmatprep.subr.bf16.mxu1 %v11952_v18  ;;  %7989 = vmatprep.mubr.bf16.mxu0 %v12905_v47 }
 0x438   :  { %8030 = vmatprep.mubr.bf16.mxu1 %v12907_v51  ;;  %v5386_v48 = vrot.slane %v5381_v8, %v13135_v22  ;;  %v5390_v57 = vrot.slane %v5381_v8, %v13137_v3  ;;  %v5394_v10 = vrot.slane %v5381_v8, %v13141_v50 }
 0x439   :  { %7960 = vmatpush1.bf16.msra.mxu0 %v11947_v21 }
 0x43a   :  { %8001 = vmatpush1.bf16.msra.mxu1 %v11950_v2  ;;  %7961 = vmatprep.subr.bf16.mxu0 %v11955_v31  ;;  %v13146_v16 = vadd.f32 %v5386_v48, %v13126_v24  ;;  %v13149_v61 = vadd.f32 %v5390_v57, %v13129_v41  ;;  %v11977_v24 = vld [vmem:[#allocation11 + $0xc0] ss:$16 sps:$4 sm:$0xff]   ;;  %v5398_v41 = vrot.slane %v5381_v8, %v13143_v54  ;;  %v12000_v8 = vld [vmem:[#allocation11 + $0x324] ss:$16 sps:$4 sm:$0xff]  }
 0x43b   :  { %8002 = vmatprep.subr.bf16.mxu1 %v11958_v35  ;;  %v11986_v2 = vld [vmem:[#allocation11 + $0x2e0] ss:$16 sps:$4 sm:$0xff]   ;;  %v11991_v35 = vld [vmem:[#allocation11 + $0x104] ss:$16 sps:$4 sm:$0xff]  }
 0x43c   :  { %v9173_v28 = vmul.f32 %v13146_v16, %v13146_v16  ;;  %v9174_v19 = vmul.f32 %v13149_v61, %v13149_v61  ;;  %v9167_v21 = vadd.f32 %v13149_v61, %v13146_v16  ;;  %v12003_v48 = vld [vmem:[#allocation11 + $0x144] ss:$16 sps:$4 sm:$0xff]  }
 0x43d   :  { %7962 = vmatpush1.bf16.msra.mxu0 %v11953_v39  ;;  %v12006_v57 = vld [vmem:[#allocation11 + $0x344] ss:$16 sps:$4 sm:$0xff]  }
 0x43e   :  { %8003 = vmatpush1.bf16.msra.mxu1 %v11956_v40  ;;  %7963 = vmatprep.subr.bf16.mxu0 %v11961_v20  ;;  %v11994_v40 = vld [vmem:[#allocation11 + $0x304] ss:$16 sps:$4 sm:$0xff]  }
 0x43f   :  { %8004 = vmatprep.subr.bf16.mxu1 %v11964_v53 }
 0x441   :  { %7964 = vmatpush1.bf16.msra.mxu0 %v11959_v60  ;;  %v11989_v60 = vld [vmem:[#allocation11 + $0x100] ss:$16 sps:$4 sm:$0xff]  }
 0x442   :  { %8005 = vmatpush1.bf16.msra.mxu1 %v11962_v42  ;;  %7965 = vmatprep.subr.bf16.mxu0 %v11967_v63  ;;  %v11992_v42 = vld [vmem:[#allocation11 + $0x300] ss:$16 sps:$4 sm:$0xff]  }
 0x443   :  { %8006 = vmatprep.subr.bf16.mxu1 %v11970_v45  ;;  %v11997_v45 = vld [vmem:[#allocation11 + $0x124] ss:$16 sps:$4 sm:$0xff]  }
 0x445   :  { %7966 = vmatpush1.bf16.msra.mxu0 %v11965_v46  ;;  %v11995_v46 = vld [vmem:[#allocation11 + $0x120] ss:$16 sps:$4 sm:$0xff]  }
 0x446   :  { %8007 = vmatpush1.bf16.msra.mxu1 %v11968_v4  ;;  %7967 = vmatprep.subr.bf16.mxu0 %v11973_v62  ;;  %v11998_v4 = vld [vmem:[#allocation11 + $0x320] ss:$16 sps:$4 sm:$0xff]  }
 0x447   :  { %8008 = vmatprep.subr.bf16.mxu1 %v11976_v58  ;;  %v5329_v56 = vpop.f32.mrb[40].mxu0  ;;  %v12001_v62 = vld [vmem:[#allocation11 + $0x140] ss:$16 sps:$4 sm:$0xff]  }
 0x448   :  { %v5370_v9 = vpop.f32.mrb[40].mxu1  ;;  %v5331_v36 = vpop.f32.mrb[41].mxu0  ;;  %v12004_v58 = vld [vmem:[#allocation11 + $0x340] ss:$16 sps:$4 sm:$0xff]  }
 0x449   :  { %v5371_v37 = vadd.f32 %v5370_v9, %v5329_v56  ;;  %v5372_v26 = vpop.f32.mrb[41].mxu1  ;;  %v5333_v23 = vpop.f32.mrb[42].mxu0  ;;  %7968 = vmatpush1.bf16.msra.mxu0 %v11971_v38  ;;  %v12009_v38 = vld [vmem:[#allocation11 + $0x164] ss:$16 sps:$4 sm:$0xff]  }
 0x44a   :  { %v5373_v59 = vadd.f32 %v5372_v26, %v5331_v36  ;;  %v5374_v33 = vpop.f32.mrb[42].mxu1  ;;  %8009 = vmatpush1.bf16.msra.mxu1 %v11974_v52  ;;  %v5334_v13 = vpop.f32.mrb[43].mxu0  ;;  %7969 = vmatprep.subr.bf16.mxu0 %v11979_v0  ;;  %v12012_v52 = vld [vmem:[#allocation11 + $0x364] ss:$16 sps:$4 sm:$0xff]   ;;  %v12007_v0 = vld [vmem:[#allocation11 + $0x160] ss:$16 sps:$4 sm:$0xff]  }
 0x44b   :  { %v5379_v11 = vadd.f32 %v5371_v37, %v13116_v55  ;;  %v5375_v43 = vpop.f32.mrb[43].mxu1  ;;  %8010 = vmatprep.subr.bf16.mxu1 %v11982_v32  ;;  %v11983_v55 = vld [vmem:[#allocation11 + $0xe0] ss:$16 sps:$4 sm:$0xff]   ;;  %v12015_v56 = vld [vmem:[#allocation11 + $0x184] ss:$16 sps:$4 sm:$0xff]  }
 0x44c   :  { %v5380_v17 = vadd.f32 %v5373_v59, %v13119_v1  ;;  %v9177_v1 = vadd.f32 %v9174_v19, %v9173_v28  ;;  %v12010_v32 = vld [vmem:[#allocation11 + $0x360] ss:$16 sps:$4 sm:$0xff]   ;;  %v12018_v9 = vld [vmem:[#allocation11 + $0x384] ss:$16 sps:$4 sm:$0xff]   ;;  %v12042_v28 = vld [vmem:[#allocation11 + $0xc] ss:$16 sps:$4 sm:$0xff]  }
 0x44d   :  { %v13159_v18 = vadd.f32 %v5394_v10, %v5379_v11  ;;  %7970 = vmatpush1.bf16.msra.mxu0 %v11977_v24  ;;  %v12013_v37 = vld [vmem:[#allocation11 + $0x180] ss:$16 sps:$4 sm:$0xff]   ;;  %v12021_v36 = vld [vmem:[#allocation11 + $0x1a4] ss:$16 sps:$4 sm:$0xff]  }
 0x44e   :  { %8011 = vmatpush1.bf16.msra.mxu1 %v11980_v49  ;;  %v13163_v29 = vadd.f32 %v5398_v41, %v5380_v17  ;;  %7971 = vmatprep.subr.bf16.mxu0 %v11985_v12  ;;  %v12016_v10 = vld [vmem:[#allocation11 + $0x380] ss:$16 sps:$4 sm:$0xff]   ;;  %v12024_v26 = vld [vmem:[#allocation11 + $0x3a4] ss:$16 sps:$4 sm:$0xff]   ;;  %v12040_v17 = vld [vmem:[#allocation11 + $0x8] ss:$16 sps:$4 sm:$0xff]  }
 0x44f   :  { %8012 = vmatprep.subr.bf16.mxu1 %v11988_v15  ;;  %v9168_v31 = vadd.f32 %v9167_v21, %v13159_v18  ;;  %v9175_v39 = vmul.f32 %v13159_v18, %v13159_v18  ;;  %v12019_v59 = vld [vmem:[#allocation11 + $0x1a0] ss:$16 sps:$4 sm:$0xff]   ;;  %v12027_v33 = vld [vmem:[#allocation11 + $0x1c4] ss:$16 sps:$4 sm:$0xff]  }
 0x450   :  { %v9176_v27 = vmul.f32 %v13163_v29, %v13163_v29  ;;  %v12022_v23 = vld [vmem:[#allocation11 + $0x3a0] ss:$16 sps:$4 sm:$0xff]   ;;  %v12030_v24 = vld [vmem:[#allocation11 + $0x3c4] ss:$16 sps:$4 sm:$0xff]  }
 0x451   :  { %v9169_v20 = vadd.f32 %v9168_v31, %v13163_v29  ;;  %v9178_v53 = vadd.f32 %v9177_v1, %v9175_v39  ;;  %7972 = vmatpush1.bf16.msra.mxu0 %v11983_v55  ;;  %v12025_v49 = vld [vmem:[#allocation11 + $0x1c0] ss:$16 sps:$4 sm:$0xff]   ;;  %v12033_v11 = vld [vmem:[#allocation11 + $0x1e4] ss:$16 sps:$4 sm:$0xff]   ;;  %v12048_v55 = vld [vmem:[#allocation11 + $0x2c] ss:$16 sps:$4 sm:$0xff]  }
 0x452   :  { %8013 = vmatpush1.bf16.msra.mxu1 %v11986_v2  ;;  %7973 = vmatprep.subr.bf16.mxu0 %v11991_v35  ;;  %v12028_v41 = vld [vmem:[#allocation11 + $0x3c0] ss:$16 sps:$4 sm:$0xff]   ;;  %v12036_v13 = vld [vmem:[#allocation11 + $0x3e4] ss:$16 sps:$4 sm:$0xff]   ;;  %v12046_v31 = vld [vmem:[#allocation11 + $0x28] ss:$16 sps:$4 sm:$0xff]  }
 0x453   :  { %9170 = vadd.xlane.f32.xlu0 %v9169_v20  ;;  %v9179_v63 = vadd.f32 %v9178_v53, %v9176_v27  ;;  %8014 = vmatprep.subr.bf16.mxu1 %v11994_v40  ;;  %v12031_v43 = vld [vmem:[#allocation11 + $0x1e0] ss:$16 sps:$4 sm:$0xff]   ;;  %v12039_v15 = vld [vmem:[#allocation11 + $0x404] ss:$16 sps:$4 sm:$0xff]   ;;  %v12054_v39 = vld [vmem:[#allocation11 + $0x4c] ss:$16 sps:$4 sm:$0xff]  }
 0x454   :  { %v12034_v12 = vld [vmem:[#allocation11 + $0x3e0] ss:$16 sps:$4 sm:$0xff]   ;;  %v12045_v21 = vld [vmem:[#allocation11 + $0x424] ss:$16 sps:$4 sm:$0xff]   ;;  %v12052_v40 = vld [vmem:[#allocation11 + $0x48] ss:$16 sps:$4 sm:$0xff]  }
 0x455   :  { %9180 = vadd.xlane.f32.xlu1 %v9179_v63  ;;  %7974 = vmatpush1.bf16.msra.mxu0 %v11989_v60  ;;  %v12037_v19 = vld [vmem:[#allocation11 + $0x400] ss:$16 sps:$4 sm:$0xff]   ;;  %v12051_v35 = vld [vmem:[#allocation11 + $0x444] ss:$16 sps:$4 sm:$0xff]   ;;  %v12060_v20 = vld [vmem:[#allocation11 + $0x6c] ss:$16 sps:$4 sm:$0xff]  }
 0x456   :  { %8015 = vmatpush1.bf16.msra.mxu1 %v11992_v42  ;;  %7975 = vmatprep.subr.bf16.mxu0 %v11997_v45  ;;  %v12043_v2 = vld [vmem:[#allocation11 + $0x420] ss:$16 sps:$4 sm:$0xff]   ;;  %v12057_v27 = vld [vmem:[#allocation11 + $0x464] ss:$16 sps:$4 sm:$0xff]   ;;  %v12058_v60 = vld [vmem:[#allocation11 + $0x68] ss:$16 sps:$4 sm:$0xff]  }
 0x457   :  { %8016 = vmatprep.subr.bf16.mxu1 %v12000_v8  ;;  %v12049_v1 = vld [vmem:[#allocation11 + $0x440] ss:$16 sps:$4 sm:$0xff]   ;;  %v12063_v42 = vld [vmem:[#allocation11 + $0x484] ss:$16 sps:$4 sm:$0xff]   ;;  %v12066_v63 = vld [vmem:[#allocation11 + $0x8c] ss:$16 sps:$4 sm:$0xff]  }
 0x458   :  { %v12055_v53 = vld [vmem:[#allocation11 + $0x460] ss:$16 sps:$4 sm:$0xff]   ;;  %v12069_v8 = vld [vmem:[#allocation11 + $0x4a4] ss:$16 sps:$4 sm:$0xff]  }
 0x459   :  { %7976 = vmatpush1.bf16.msra.mxu0 %v11995_v46  ;;  %v12061_v45 = vld [vmem:[#allocation11 + $0x480] ss:$16 sps:$4 sm:$0xff]   ;;  %v12072_v46 = vld [vmem:[#allocation11 + $0xac] ss:$16 sps:$4 sm:$0xff]  }
 0x45a   :  { %8017 = vmatpush1.bf16.msra.mxu1 %v11998_v4  ;;  %7977 = vmatprep.subr.bf16.mxu0 %v12003_v48  ;;  %v12067_v4 = vld [vmem:[#allocation11 + $0x4a0] ss:$16 sps:$4 sm:$0xff]   ;;  %v12070_v48 = vld [vmem:[#allocation11 + $0xa8] ss:$16 sps:$4 sm:$0xff]  }
 0x45b   :  { %8018 = vmatprep.subr.bf16.mxu1 %v12006_v57  ;;  %v12075_v57 = vld [vmem:[#allocation11 + $0x4c4] ss:$16 sps:$4 sm:$0xff]  }
 0x45d   :  { %7978 = vmatpush1.bf16.msra.mxu0 %v12001_v62  ;;  %v12078_v62 = vld [vmem:[#allocation11 + $0xcc] ss:$16 sps:$4 sm:$0xff]  }
 0x45e   :  { %8019 = vmatpush1.bf16.msra.mxu1 %v12004_v58  ;;  %7979 = vmatprep.subr.bf16.mxu0 %v12009_v38 }
 0x45f   :  { %8020 = vmatprep.subr.bf16.mxu1 %v12012_v52 }
 0x461   :  { %7980 = vmatpush1.bf16.msra.mxu0 %v12007_v0 }
 0x462   :  { %8021 = vmatpush1.bf16.msra.mxu1 %v12010_v32  ;;  %7981 = vmatprep.subr.bf16.mxu0 %v12015_v56 }
 0x463   :  { %8022 = vmatprep.subr.bf16.mxu1 %v12018_v9 }
 0x465   :  { %7982 = vmatpush1.bf16.msra.mxu0 %v12013_v37 }
 0x466   :  { %8023 = vmatpush1.bf16.msra.mxu1 %v12016_v10  ;;  %7983 = vmatprep.subr.bf16.mxu0 %v12021_v36  ;;  %v12073_v10 = vld [vmem:[#allocation11 + $0x4c0] ss:$16 sps:$4 sm:$0xff]   ;;  %v12076_v36 = vld [vmem:[#allocation11 + $0xc8] ss:$16 sps:$4 sm:$0xff]  }
 0x467   :  { %8024 = vmatprep.subr.bf16.mxu1 %v12024_v26 }
 0x469   :  { %7984 = vmatpush1.bf16.msra.mxu0 %v12019_v59 }
 0x46a   :  { %8025 = vmatpush1.bf16.msra.mxu1 %v12022_v23  ;;  %7985 = vmatprep.subr.bf16.mxu0 %v12027_v33  ;;  %v12081_v23 = vld [vmem:[#allocation11 + $0x4e4] ss:$16 sps:$4 sm:$0xff]   ;;  %v12084_v33 = vld [vmem:[#allocation11 + $0xec] ss:$16 sps:$4 sm:$0xff]  }
 0x46b   :  { %8026 = vmatprep.subr.bf16.mxu1 %v12030_v24  ;;  %v12079_v24 = vld [vmem:[#allocation11 + $0x4e0] ss:$16 sps:$4 sm:$0xff]  }
 0x46d   :  { %7986 = vmatpush1.bf16.msra.mxu0 %v12025_v49  ;;  %v12082_v49 = vld [vmem:[#allocation11 + $0xe8] ss:$16 sps:$4 sm:$0xff]  }
 0x46e   :  { %8027 = vmatpush1.bf16.msra.mxu1 %v12028_v41  ;;  %7987 = vmatprep.subr.bf16.mxu0 %v12033_v11  ;;  %v12087_v41 = vld [vmem:[#allocation11 + $0x504] ss:$16 sps:$4 sm:$0xff]   ;;  %v12090_v11 = vld [vmem:[#allocation11 + $0x10c] ss:$16 sps:$4 sm:$0xff]  }
 0x46f   :  { %8028 = vmatprep.subr.bf16.mxu1 %v12036_v13  ;;  %v12085_v13 = vld [vmem:[#allocation11 + $0x500] ss:$16 sps:$4 sm:$0xff]  }
 0x471   :  { %7988 = vmatpush1.bf16.msra.mxu0 %v12031_v43  ;;  %v12088_v43 = vld [vmem:[#allocation11 + $0x108] ss:$16 sps:$4 sm:$0xff]  }
 0x472   :  { %8029 = vmatpush1.bf16.msra.mxu1 %v12034_v12  ;;  %8039 = vmatprep.subr.bf16.mxu0 %v12039_v15  ;;  %v12093_v12 = vld [vmem:[#allocation11 + $0x524] ss:$16 sps:$4 sm:$0xff]   ;;  %v12096_v15 = vld [vmem:[#allocation11 + $0x12c] ss:$16 sps:$4 sm:$0xff]  }
 0x473   :  { %8080 = vmatprep.subr.bf16.mxu1 %v12042_v28  ;;  %v12091_v28 = vld [vmem:[#allocation11 + $0x520] ss:$16 sps:$4 sm:$0xff]  }
 0x474   :  { %7990 = vmatmul.mubr.bf16.vlgmr.msra.gmra.mrb[56].mxu0 %v12911_v6 }
 0x475   :  { %8031 = vmatmul.mubr.bf16.vlgmr.msra.gmra.mrb[56].mxu1 %v12913_v7  ;;  %8040 = vmatpush1.bf16.msra.mxu0 %v12037_v19  ;;  %v12094_v19 = vld [vmem:[#allocation11 + $0x128] ss:$16 sps:$4 sm:$0xff]  }
 0x476   :  { %8081 = vmatpush1.bf16.msra.mxu1 %v12040_v17  ;;  %8041 = vmatprep.subr.bf16.mxu0 %v12045_v21  ;;  %v12099_v17 = vld [vmem:[#allocation11 + $0x544] ss:$16 sps:$4 sm:$0xff]   ;;  %v12102_v21 = vld [vmem:[#allocation11 + $0x14c] ss:$16 sps:$4 sm:$0xff]  }
 0x477   :  { %8082 = vmatprep.subr.bf16.mxu1 %v12048_v55  ;;  %8071 = vmatprep.mubr.bf16.mxu0 %v12922_v34  ;;  %v12097_v55 = vld [vmem:[#allocation11 + $0x540] ss:$16 sps:$4 sm:$0xff]  }
 0x478   :  { %8112 = vmatprep.mubr.bf16.mxu1 %v12905_v47  ;;  %v12064_v47 = vld [vmem:[#allocation11 + $0x88] ss:$16 sps:$4 sm:$0xff]  }
 0x479   :  { %8042 = vmatpush1.bf16.msra.mxu0 %v12043_v2  ;;  %v12100_v2 = vld [vmem:[#allocation11 + $0x148] ss:$16 sps:$4 sm:$0xff]  }
 0x47a   :  { %8083 = vmatpush1.bf16.msra.mxu1 %v12046_v31  ;;  %8043 = vmatprep.subr.bf16.mxu0 %v12051_v35  ;;  %v12105_v31 = vld [vmem:[#allocation11 + $0x564] ss:$16 sps:$4 sm:$0xff]   ;;  %v12108_v35 = vld [vmem:[#allocation11 + $0x16c] ss:$16 sps:$4 sm:$0xff]  }
 0x47b   :  { %8084 = vmatprep.subr.bf16.mxu1 %v12054_v39  ;;  %v12103_v39 = vld [vmem:[#allocation11 + $0x560] ss:$16 sps:$4 sm:$0xff]  }
 0x47d   :  { %8044 = vmatpush1.bf16.msra.mxu0 %v12049_v1  ;;  %v12106_v1 = vld [vmem:[#allocation11 + $0x168] ss:$16 sps:$4 sm:$0xff]  }
 0x47e   :  { %8085 = vmatpush1.bf16.msra.mxu1 %v12052_v40  ;;  %8045 = vmatprep.subr.bf16.mxu0 %v12057_v27  ;;  %v12111_v40 = vld [vmem:[#allocation11 + $0x584] ss:$16 sps:$4 sm:$0xff]   ;;  %v12114_v27 = vld [vmem:[#allocation11 + $0x18c] ss:$16 sps:$4 sm:$0xff]  }
 0x47f   :  { %8086 = vmatprep.subr.bf16.mxu1 %v12060_v20  ;;  %v12109_v20 = vld [vmem:[#allocation11 + $0x580] ss:$16 sps:$4 sm:$0xff]  }
 0x481   :  { %8046 = vmatpush1.bf16.msra.mxu0 %v12055_v53  ;;  %v12112_v53 = vld [vmem:[#allocation11 + $0x188] ss:$16 sps:$4 sm:$0xff]  }
 0x482   :  { %8087 = vmatpush1.bf16.msra.mxu1 %v12058_v60  ;;  %8047 = vmatprep.subr.bf16.mxu0 %v12063_v42  ;;  %v12117_v60 = vld [vmem:[#allocation11 + $0x5a4] ss:$16 sps:$4 sm:$0xff]   ;;  %v12120_v42 = vld [vmem:[#allocation11 + $0x1ac] ss:$16 sps:$4 sm:$0xff]  }
 0x483   :  { %8088 = vmatprep.subr.bf16.mxu1 %v12066_v63  ;;  %v12115_v63 = vld [vmem:[#allocation11 + $0x5a0] ss:$16 sps:$4 sm:$0xff]  }
 0x485   :  { %8048 = vmatpush1.bf16.msra.mxu0 %v12061_v45  ;;  %v12118_v45 = vld [vmem:[#allocation11 + $0x1a8] ss:$16 sps:$4 sm:$0xff]  }
 0x486   :  { %8089 = vmatpush1.bf16.msra.mxu1 %v12064_v47  ;;  %8049 = vmatprep.subr.bf16.mxu0 %v12069_v8  ;;  %v12123_v47 = vld [vmem:[#allocation11 + $0x5c4] ss:$16 sps:$4 sm:$0xff]   ;;  %v12126_v8 = vld [vmem:[#allocation11 + $0x1cc] ss:$16 sps:$4 sm:$0xff]  }
 0x487   :  { %8090 = vmatprep.subr.bf16.mxu1 %v12072_v46  ;;  %v6785_v58 = vpop.f32.mrb[44].mxu0  ;;  %v12121_v46 = vld [vmem:[#allocation11 + $0x5c0] ss:$16 sps:$4 sm:$0xff]  }
 0x488   :  { %v6826_v38 = vpop.f32.mrb[44].mxu1  ;;  %v6787_v0 = vpop.f32.mrb[45].mxu0 }
 0x489   :  { %v13175_v52 = vadd.f32 %v6826_v38, %v6785_v58  ;;  %v6828_v32 = vpop.f32.mrb[45].mxu1  ;;  %v6789_v9 = vpop.f32.mrb[46].mxu0  ;;  %8050 = vmatpush1.bf16.msra.mxu0 %v12067_v4  ;;  %v12124_v4 = vld [vmem:[#allocation11 + $0x1c8] ss:$16 sps:$4 sm:$0xff]   ;;  %v12135_v38 = vld [vmem:[#allocation11 + $0x20c] ss:$16 sps:$4 sm:$0xff]  }
 0x48a   :  { %v13177_v56 = vadd.f32 %v6828_v32, %v6787_v0  ;;  %v6830_v37 = vpop.f32.mrb[46].mxu1  ;;  %8091 = vmatpush1.bf16.msra.mxu1 %v12070_v48  ;;  %v6790_v26 = vpop.f32.mrb[47].mxu0  ;;  %8051 = vmatprep.subr.bf16.mxu0 %v12075_v57  ;;  %v12129_v48 = vld [vmem:[#allocation11 + $0x5e4] ss:$16 sps:$4 sm:$0xff]   ;;  %v12132_v57 = vld [vmem:[#allocation11 + $0x1ec] ss:$16 sps:$4 sm:$0xff]  }
 0x48b   :  { %v6831_v59 = vpop.f32.mrb[47].mxu1  ;;  %8092 = vmatprep.subr.bf16.mxu1 %v12078_v62  ;;  %v12127_v62 = vld [vmem:[#allocation11 + $0x5e0] ss:$16 sps:$4 sm:$0xff]   ;;  %v12130_v58 = vld [vmem:[#allocation11 + $0x1e8] ss:$16 sps:$4 sm:$0xff]  }
 0x48c   :  { %v12138_v0 = vld [vmem:[#allocation11 + $0x40c] ss:$16 sps:$4 sm:$0xff]   ;;  %v12133_v32 = vld [vmem:[#allocation11 + $0x208] ss:$16 sps:$4 sm:$0xff]  }
 0x48d   :  { %8052 = vmatpush1.bf16.msra.mxu0 %v12073_v10  ;;  %v12136_v9 = vld [vmem:[#allocation11 + $0x408] ss:$16 sps:$4 sm:$0xff]   ;;  %v12141_v37 = vld [vmem:[#allocation11 + $0x22c] ss:$16 sps:$4 sm:$0xff]  }
 0x48e   :  { %8093 = vmatpush1.bf16.msra.mxu1 %v12076_v36  ;;  %8053 = vmatprep.subr.bf16.mxu0 %v12081_v23  ;;  %v12144_v10 = vld [vmem:[#allocation11 + $0x42c] ss:$16 sps:$4 sm:$0xff]   ;;  %v12139_v36 = vld [vmem:[#allocation11 + $0x228] ss:$16 sps:$4 sm:$0xff]  }
 0x48f   :  { %8094 = vmatprep.subr.bf16.mxu1 %v12084_v33  ;;  %v12142_v26 = vld [vmem:[#allocation11 + $0x428] ss:$16 sps:$4 sm:$0xff]   ;;  %v12147_v59 = vld [vmem:[#allocation11 + $0x24c] ss:$16 sps:$4 sm:$0xff]  }
 0x490   :  { %v12150_v23 = vld [vmem:[#allocation11 + $0x44c] ss:$16 sps:$4 sm:$0xff]   ;;  %v12145_v33 = vld [vmem:[#allocation11 + $0x248] ss:$16 sps:$4 sm:$0xff]  }
 0x491   :  { %8054 = vmatpush1.bf16.msra.mxu0 %v12079_v24  ;;  %v12148_v24 = vld [vmem:[#allocation11 + $0x448] ss:$16 sps:$4 sm:$0xff]  }
 0x492   :  { %8095 = vmatpush1.bf16.msra.mxu1 %v12082_v49  ;;  %8055 = vmatprep.subr.bf16.mxu0 %v12087_v41  ;;  %v12153_v49 = vld [vmem:[#allocation11 + $0x26c] ss:$16 sps:$4 sm:$0xff]   ;;  %v12151_v41 = vld [vmem:[#allocation11 + $0x268] ss:$16 sps:$4 sm:$0xff]  }
 0x493   :  { %8096 = vmatprep.subr.bf16.mxu1 %v12090_v11  ;;  %v12154_v11 = vld [vmem:[#allocation11 + $0x468] ss:$16 sps:$4 sm:$0xff]  }
 0x495   :  { %8056 = vmatpush1.bf16.msra.mxu0 %v12085_v13  ;;  %v12159_v13 = vld [vmem:[#allocation11 + $0x28c] ss:$16 sps:$4 sm:$0xff]  }
 0x496   :  { %8097 = vmatpush1.bf16.msra.mxu1 %v12088_v43  ;;  %8057 = vmatprep.subr.bf16.mxu0 %v12093_v12  ;;  %v12162_v43 = vld [vmem:[#allocation11 + $0x48c] ss:$16 sps:$4 sm:$0xff]  }
 0x497   :  { %8098 = vmatprep.subr.bf16.mxu1 %v12096_v15  ;;  %v12165_v12 = vld [vmem:[#allocation11 + $0x2ac] ss:$16 sps:$4 sm:$0xff]  }
 0x498   :  { %v12168_v15 = vld [vmem:[#allocation11 + $0x4ac] ss:$16 sps:$4 sm:$0xff]  }
 0x499   :  { %8058 = vmatpush1.bf16.msra.mxu0 %v12091_v28  ;;  %v12163_v28 = vld [vmem:[#allocation11 + $0x2a8] ss:$16 sps:$4 sm:$0xff]  }
 0x49a   :  { %8099 = vmatpush1.bf16.msra.mxu1 %v12094_v19  ;;  %8059 = vmatprep.subr.bf16.mxu0 %v12099_v17  ;;  %v12166_v19 = vld [vmem:[#allocation11 + $0x4a8] ss:$16 sps:$4 sm:$0xff]   ;;  %v12171_v17 = vld [vmem:[#allocation11 + $0x2cc] ss:$16 sps:$4 sm:$0xff]  }
 0x49b   :  { %8100 = vmatprep.subr.bf16.mxu1 %v12102_v21  ;;  %v12174_v21 = vld [vmem:[#allocation11 + $0x4cc] ss:$16 sps:$4 sm:$0xff]  }
 0x49d   :  { %8060 = vmatpush1.bf16.msra.mxu0 %v12097_v55 }
 0x49e   :  { %8101 = vmatpush1.bf16.msra.mxu1 %v12100_v2  ;;  %8061 = vmatprep.subr.bf16.mxu0 %v12105_v31 }
 0x49f   :  { %8102 = vmatprep.subr.bf16.mxu1 %v12108_v35 }
 0x4a1   :  { %8062 = vmatpush1.bf16.msra.mxu0 %v12103_v39 }
 0x4a2   :  { %8103 = vmatpush1.bf16.msra.mxu1 %v12106_v1  ;;  %8063 = vmatprep.subr.bf16.mxu0 %v12111_v40 }
 0x4a3   :  { %8104 = vmatprep.subr.bf16.mxu1 %v12114_v27 }
 0x4a5   :  { %8064 = vmatpush1.bf16.msra.mxu0 %v12109_v20  ;;  %v12169_v20 = vld [vmem:[#allocation11 + $0x2c8] ss:$16 sps:$4 sm:$0xff]  }
 0x4a6   :  { %8105 = vmatpush1.bf16.msra.mxu1 %v12112_v53  ;;  %8065 = vmatprep.subr.bf16.mxu0 %v12117_v60  ;;  %v12172_v53 = vld [vmem:[#allocation11 + $0x4c8] ss:$16 sps:$4 sm:$0xff]  }
 0x4a7   :  { %8106 = vmatprep.subr.bf16.mxu1 %v12120_v42 }
 0x4a9   :  { %8066 = vmatpush1.bf16.msra.mxu0 %v12115_v63  ;;  %v12177_v63 = vld [vmem:[#allocation11 + $0x2ec] ss:$16 sps:$4 sm:$0xff]  }
 0x4aa   :  { %8107 = vmatpush1.bf16.msra.mxu1 %v12118_v45  ;;  %8067 = vmatprep.subr.bf16.mxu0 %v12123_v47  ;;  %v12180_v45 = vld [vmem:[#allocation11 + $0x4ec] ss:$16 sps:$4 sm:$0xff]   ;;  %v12178_v47 = vld [vmem:[#allocation11 + $0x4e8] ss:$16 sps:$4 sm:$0xff]  }
 0x4ab   :  { %8108 = vmatprep.subr.bf16.mxu1 %v12126_v8  ;;  %v12186_v8 = vld [vmem:[#allocation11 + $0x50c] ss:$16 sps:$4 sm:$0xff]  }
 0x4ad   :  { %8068 = vmatpush1.bf16.msra.mxu0 %v12121_v46  ;;  %v12181_v46 = vld [vmem:[#allocation11 + $0x308] ss:$16 sps:$4 sm:$0xff]  }
 0x4ae   :  { %8109 = vmatpush1.bf16.msra.mxu1 %v12124_v4  ;;  %8069 = vmatprep.subr.bf16.mxu0 %v12129_v48  ;;  %v12184_v4 = vld [vmem:[#allocation11 + $0x508] ss:$16 sps:$4 sm:$0xff]   ;;  %v12189_v48 = vld [vmem:[#allocation11 + $0x32c] ss:$16 sps:$4 sm:$0xff]  }
 0x4af   :  { %8110 = vmatprep.subr.bf16.mxu1 %v12132_v57  ;;  %v12192_v57 = vld [vmem:[#allocation11 + $0x52c] ss:$16 sps:$4 sm:$0xff]  }
 0x4b1   :  { %8070 = vmatpush1.bf16.msra.mxu0 %v12127_v62  ;;  %v12187_v62 = vld [vmem:[#allocation11 + $0x328] ss:$16 sps:$4 sm:$0xff]  }
 0x4b2   :  { %8111 = vmatpush1.bf16.msra.mxu1 %v12130_v58  ;;  %8121 = vmatprep.subr.bf16.mxu0 %v12135_v38  ;;  %v12190_v58 = vld [vmem:[#allocation11 + $0x528] ss:$16 sps:$4 sm:$0xff]   ;;  %v12195_v38 = vld [vmem:[#allocation11 + $0x34c] ss:$16 sps:$4 sm:$0xff]  }
 0x4b3   :  { %8162 = vmatprep.subr.bf16.mxu1 %v12138_v0  ;;  %v12198_v0 = vld [vmem:[#allocation11 + $0x54c] ss:$16 sps:$4 sm:$0xff]  }
 0x4b4   :  { %8072 = vmatmul.mubr.bf16.vlgmr.msra.gmra.mrb[60].mxu0 %v12927_v14 }
 0x4b5   :  { %8113 = vmatmul.mubr.bf16.vlgmr.msra.gmra.mrb[60].mxu1 %v12911_v6  ;;  %8122 = vmatpush1.bf16.msra.mxu0 %v12133_v32  ;;  %v12156_v6 = vld [vmem:[#allocation11 + $0x46c] ss:$16 sps:$4 sm:$0xff]   ;;  %v12193_v32 = vld [vmem:[#allocation11 + $0x348] ss:$16 sps:$4 sm:$0xff]  }
 0x4b6   :  { %8163 = vmatpush1.bf16.msra.mxu1 %v12136_v9  ;;  %8123 = vmatprep.subr.bf16.mxu0 %v12141_v37  ;;  %v12196_v9 = vld [vmem:[#allocation11 + $0x548] ss:$16 sps:$4 sm:$0xff]   ;;  %v12201_v37 = vld [vmem:[#allocation11 + $0x36c] ss:$16 sps:$4 sm:$0xff]  }
 0x4b7   :  { %8164 = vmatprep.subr.bf16.mxu1 %v12144_v10  ;;  %8153 = vmatprep.mubr.bf16.mxu0 %v12907_v51  ;;  %v12157_v51 = vld [vmem:[#allocation11 + $0x288] ss:$16 sps:$4 sm:$0xff]   ;;  %v12204_v10 = vld [vmem:[#allocation11 + $0x56c] ss:$16 sps:$4 sm:$0xff]  }
 0x4b8   :  { %8194 = vmatprep.mubr.bf16.mxu1 %v12922_v34  ;;  %v12160_v34 = vld [vmem:[#allocation11 + $0x488] ss:$16 sps:$4 sm:$0xff]  }
 0x4b9   :  { %8124 = vmatpush1.bf16.msra.mxu0 %v12139_v36  ;;  %v12199_v36 = vld [vmem:[#allocation11 + $0x368] ss:$16 sps:$4 sm:$0xff]  }
 0x4ba   :  { %8165 = vmatpush1.bf16.msra.mxu1 %v12142_v26  ;;  %8125 = vmatprep.subr.bf16.mxu0 %v12147_v59  ;;  %v12202_v26 = vld [vmem:[#allocation11 + $0x568] ss:$16 sps:$4 sm:$0xff]   ;;  %v12207_v59 = vld [vmem:[#allocation11 + $0x38c] ss:$16 sps:$4 sm:$0xff]  }
 0x4bb   :  { %8166 = vmatprep.subr.bf16.mxu1 %v12150_v23 }
 0x4bd   :  { %8126 = vmatpush1.bf16.msra.mxu0 %v12145_v33  ;;  %v12210_v33 = vld [vmem:[#allocation11 + $0x58c] ss:$16 sps:$4 sm:$0xff]  }
 0x4be   :  { %8167 = vmatpush1.bf16.msra.mxu1 %v12148_v24  ;;  %8127 = vmatprep.subr.bf16.mxu0 %v12153_v49 }
 0x4bf   :  { %8168 = vmatprep.subr.bf16.mxu1 %v12156_v6  ;;  %v12205_v6 = vld [vmem:[#allocation11 + $0x388] ss:$16 sps:$4 sm:$0xff]  }
 0x4c1   :  { %8128 = vmatpush1.bf16.msra.mxu0 %v12151_v41  ;;  %v12208_v41 = vld [vmem:[#allocation11 + $0x588] ss:$16 sps:$4 sm:$0xff]  }
 0x4c2   :  { %8169 = vmatpush1.bf16.msra.mxu1 %v12154_v11  ;;  %8129 = vmatprep.subr.bf16.mxu0 %v12159_v13  ;;  %v12213_v11 = vld [vmem:[#allocation11 + $0x3ac] ss:$16 sps:$4 sm:$0xff]  }
 0x4c3   :  { %8170 = vmatprep.subr.bf16.mxu1 %v12162_v43  ;;  %v12216_v13 = vld [vmem:[#allocation11 + $0x5ac] ss:$16 sps:$4 sm:$0xff]  }
 0x4c5   :  { %8130 = vmatpush1.bf16.msra.mxu0 %v12157_v51 }
 0x4c6   :  { %8171 = vmatpush1.bf16.msra.mxu1 %v12160_v34  ;;  %8131 = vmatprep.subr.bf16.mxu0 %v12165_v12  ;;  %v12211_v12 = vld [vmem:[#allocation11 + $0x3a8] ss:$16 sps:$4 sm:$0xff]  }
 0x4c7   :  { %8172 = vmatprep.subr.bf16.mxu1 %v12168_v15  ;;  %v6867_v55 = vpop.f32.mrb[48].mxu0  ;;  %v12214_v15 = vld [vmem:[#allocation11 + $0x5a8] ss:$16 sps:$4 sm:$0xff]  }
 0x4c8   :  { %v13183_v2 = vpop.f32.mrb[48].mxu1  ;;  %v13186_v31 = vadd.f32 %v6867_v55, %v13175_v52  ;;  %v6869_v35 = vpop.f32.mrb[49].mxu0  ;;  %v12175_v52 = vld [vmem:[#allocation11 + $0x2e8] ss:$16 sps:$4 sm:$0xff]  }
 0x4c9   :  { %v13188_v39 = vpop.f32.mrb[49].mxu1  ;;  %v13191_v1 = vadd.f32 %v6869_v35, %v13177_v56  ;;  %v6871_v40 = vpop.f32.mrb[50].mxu0  ;;  %8132 = vmatpush1.bf16.msra.mxu0 %v12163_v28  ;;  %v12183_v56 = vld [vmem:[#allocation11 + $0x30c] ss:$16 sps:$4 sm:$0xff]   ;;  %v12220_v55 = vld [vmem:[#allocation11 + $0x5c8] ss:$16 sps:$4 sm:$0xff]  }
 0x4ca   :  { %v6912_v27 = vpop.f32.mrb[50].mxu1  ;;  %8173 = vmatpush1.bf16.msra.mxu1 %v12166_v19  ;;  %v6872_v60 = vpop.f32.mrb[51].mxu0  ;;  %8133 = vmatprep.subr.bf16.mxu0 %v12171_v17  ;;  %v12219_v28 = vld [vmem:[#allocation11 + $0x3cc] ss:$16 sps:$4 sm:$0xff]  }
 0x4cb   :  { %v6913_v42 = vpop.f32.mrb[51].mxu1  ;;  %8174 = vmatprep.subr.bf16.mxu1 %v12174_v21  ;;  %v12222_v19 = vld [vmem:[#allocation11 + $0x5cc] ss:$16 sps:$4 sm:$0xff]   ;;  %v12217_v21 = vld [vmem:[#allocation11 + $0x3c8] ss:$16 sps:$4 sm:$0xff]  }
 0x4cc   :  { %v12225_v35 = vld [vmem:[#allocation11 + $0x3ec] ss:$16 sps:$4 sm:$0xff]   ;;  %v12223_v27 = vld [vmem:[#allocation11 + $0x3e8] ss:$16 sps:$4 sm:$0xff]   ;;  %v12231_v60 = vld [vmem:[#allocation11 + $0xc04] ss:$16 sps:$4 sm:$0xff]  }
 0x4cd   :  { %8134 = vmatpush1.bf16.msra.mxu0 %v12169_v20  ;;  %v12228_v40 = vld [vmem:[#allocation11 + $0x5ec] ss:$16 sps:$4 sm:$0xff]   ;;  %v12226_v20 = vld [vmem:[#allocation11 + $0x5e8] ss:$16 sps:$4 sm:$0xff]   ;;  %v12234_v42 = vld [vmem:[#allocation11 + $0xe04] ss:$16 sps:$4 sm:$0xff]  }
 0x4ce   :  { %8175 = vmatpush1.bf16.msra.mxu1 %v12172_v53  ;;  %8135 = vmatprep.subr.bf16.mxu0 %v12177_v63  ;;  %v9165_v53 = vld [vmem:[#allocation16] sm:$0xf]  ;;  %v9166_v63 = vld [vmem:[#allocation17] sm:$0xf] }
 0x4cf   :  { %8176 = vmatprep.subr.bf16.mxu1 %v12180_v45  ;;  %v13198_v45 = vrot.slane %v9165_v53, %v13135_v22 }
 0x4d1   :  { %8136 = vmatpush1.bf16.msra.mxu0 %v12175_v52  ;;  %v12229_v52 = vld [vmem:[#allocation11 + $0xc00] ss:$16 sps:$4 sm:$0xff]  }
 0x4d2   :  { %8177 = vmatpush1.bf16.msra.mxu1 %v12178_v47  ;;  %8137 = vmatprep.subr.bf16.mxu0 %v12183_v56  ;;  %v12232_v47 = vld [vmem:[#allocation11 + $0xe00] ss:$16 sps:$4 sm:$0xff]   ;;  %v13201_v56 = vrot.slane %v9165_v53, %v13137_v3 }
 0x4d3   :  { %8178 = vmatprep.subr.bf16.mxu1 %v12186_v8  ;;  %v13204_v8 = vrot.slane %v9165_v53, %v13141_v50 }
 0x4d5   :  { %8138 = vmatpush1.bf16.msra.mxu0 %v12181_v46  ;;  %v13207_v46 = vrot.slane %v9165_v53, %v13143_v54  ;;  %v12270_v53 = vld [vmem:[#allocation11 + $0xec4] ss:$16 sps:$4 sm:$0xff]  }
 0x4d6   :  { %8179 = vmatpush1.bf16.msra.mxu1 %v12184_v4  ;;  %8139 = vmatprep.subr.bf16.mxu0 %v12189_v48 }
 0x4d7   :  { %8180 = vmatprep.subr.bf16.mxu1 %v12192_v57 }
 0x4d9   :  { %8140 = vmatpush1.bf16.msra.mxu0 %v12187_v62  ;;  %v12237_v62 = vld [vmem:[#allocation11 + $0xc24] ss:$16 sps:$4 sm:$0xff]  }
 0x4da   :  { %8181 = vmatpush1.bf16.msra.mxu1 %v12190_v58  ;;  %8141 = vmatprep.subr.bf16.mxu0 %v12195_v38  ;;  %v12240_v58 = vld [vmem:[#allocation11 + $0xe24] ss:$16 sps:$4 sm:$0xff]  }
 0x4db   :  { %8182 = vmatprep.subr.bf16.mxu1 %v12198_v0 }
 0x4dd   :  { %8142 = vmatpush1.bf16.msra.mxu0 %v12193_v32  ;;  %v13218_v32 = vrot.slane %v9166_v63, %v13135_v22 }
 0x4de   :  { %8183 = vmatpush1.bf16.msra.mxu1 %v12196_v9  ;;  %8143 = vmatprep.subr.bf16.mxu0 %v12201_v37  ;;  %v13221_v9 = vrot.slane %v9166_v63, %v13137_v3 }
 0x4df   :  { %8184 = vmatprep.subr.bf16.mxu1 %v12204_v10  ;;  %v12235_v10 = vld [vmem:[#allocation11 + $0xc20] ss:$16 sps:$4 sm:$0xff]  }
 0x4e0   :  { %v9171_v23 = vpop.xlane.xlu0 %9170 }
 0x4e1   :  { %v13193_v24 = vmul.f32 0.001953125, %v9171_v23  ;;  %8144 = vmatpush1.bf16.msra.mxu0 %v12199_v36  ;;  %v12246_v23 = vld [vmem:[#allocation11 + $0xe44] ss:$16 sps:$4 sm:$0xff]  }
 0x4e2   :  { %8185 = vmatpush1.bf16.msra.mxu1 %v12202_v26  ;;  %v9181_v49 = vpop.xlane.xlu1 %9180  ;;  %8145 = vmatprep.subr.bf16.mxu0 %v12207_v59  ;;  %v13229_v26 = vrot.slane %v9166_v63, %v13143_v54  ;;  %v12243_v59 = vld [vmem:[#allocation11 + $0xc44] ss:$16 sps:$4 sm:$0xff]  }
 0x4e3   :  { %v9182_v43 = vmul.f32 0.001953125, %v9181_v49  ;;  %v9183_v51 = vmul.f32 %v13193_v24, %v13193_v24  ;;  %8186 = vmatprep.subr.bf16.mxu1 %v12210_v33  ;;  %v9185_v4 = vsub.f32 %v13146_v16, %v13193_v24  ;;  %v9186_v48 = vsub.f32 %v13149_v61, %v13193_v24 }
 0x4e4   :  { %v9187_v57 = vsub.f32 %v13159_v18, %v13193_v24  ;;  %v9188_v0 = vsub.f32 %v13163_v29, %v13193_v24  ;;  %v13224_v16 = vrot.slane %v9166_v63, %v13141_v50  ;;  %v12238_v29 = vld [vmem:[#allocation11 + $0xe20] ss:$16 sps:$4 sm:$0xff]  }
 0x4e5   :  { %v9184_v34 = vsub.f32 %v9182_v43, %v9183_v51  ;;  %8146 = vmatpush1.bf16.msra.mxu0 %v12205_v6  ;;  %v12249_v51 = vld [vmem:[#allocation11 + $0xc64] ss:$16 sps:$4 sm:$0xff]  }
 0x4e6   :  { %8187 = vmatpush1.bf16.msra.mxu1 %v12208_v41  ;;  %8147 = vmatprep.subr.bf16.mxu0 %v12213_v11  ;;  %v12241_v11 = vld [vmem:[#allocation11 + $0xc40] ss:$16 sps:$4 sm:$0xff]  }
 0x4e7   :  { %8188 = vmatprep.subr.bf16.mxu1 %v12216_v13  ;;  %v9189_v17 = vadd.f32 1e-05, %v9184_v34  ;;  %v12244_v13 = vld [vmem:[#allocation11 + $0xe40] ss:$16 sps:$4 sm:$0xff]   ;;  %v12252_v34 = vld [vmem:[#allocation11 + $0xe64] ss:$16 sps:$4 sm:$0xff]  }
 0x4e9   :  { %12421 = vrsqrt.f32 %v9189_v17  ;;  %8148 = vmatpush1.bf16.msra.mxu0 %v12211_v12  ;;  %v12247_v12 = vld [vmem:[#allocation11 + $0xc60] ss:$16 sps:$4 sm:$0xff]  }
 0x4ea   :  { %8189 = vmatpush1.bf16.msra.mxu1 %v12214_v15  ;;  %8149 = vmatprep.subr.bf16.mxu0 %v12219_v28  ;;  %v12250_v15 = vld [vmem:[#allocation11 + $0xe60] ss:$16 sps:$4 sm:$0xff]   ;;  %v12255_v28 = vld [vmem:[#allocation11 + $0xc84] ss:$16 sps:$4 sm:$0xff]  }
 0x4eb   :  { %8190 = vmatprep.subr.bf16.mxu1 %v12222_v19  ;;  %v12258_v19 = vld [vmem:[#allocation11 + $0xe84] ss:$16 sps:$4 sm:$0xff]   ;;  %v12253_v17 = vld [vmem:[#allocation11 + $0xc80] ss:$16 sps:$4 sm:$0xff]  }
 0x4ed   :  { %8150 = vmatpush1.bf16.msra.mxu0 %v12217_v21  ;;  %v12256_v21 = vld [vmem:[#allocation11 + $0xe80] ss:$16 sps:$4 sm:$0xff]  }
 0x4ee   :  { %8191 = vmatpush1.bf16.msra.mxu1 %v12220_v55  ;;  %8151 = vmatprep.subr.bf16.mxu0 %v12225_v35  ;;  %v12261_v55 = vld [vmem:[#allocation11 + $0xca4] ss:$16 sps:$4 sm:$0xff]  }
 0x4ef   :  { %8192 = vmatprep.subr.bf16.mxu1 %v12228_v40  ;;  %v12264_v35 = vld [vmem:[#allocation11 + $0xea4] ss:$16 sps:$4 sm:$0xff]   ;;  %v12259_v40 = vld [vmem:[#allocation11 + $0xca0] ss:$16 sps:$4 sm:$0xff]  }
 0x4f1   :  { %8152 = vmatpush1.bf16.msra.mxu0 %v12223_v27  ;;  %v12262_v27 = vld [vmem:[#allocation11 + $0xea0] ss:$16 sps:$4 sm:$0xff]  }
 0x4f2   :  { %8193 = vmatpush1.bf16.msra.mxu1 %v12226_v20  ;;  %8971 = vmatprep.subr.bf16.mxu0 %v12231_v60  ;;  %v12267_v20 = vld [vmem:[#allocation11 + $0xcc4] ss:$16 sps:$4 sm:$0xff]  }
 0x4f3   :  { %9012 = vmatprep.subr.bf16.mxu1 %v12234_v42  ;;  %v12422_v38 = vpop.eup %12421 }
 0x4f4   :  { %8154 = vmatmul.mubr.bf16.vlgmr.msra.gmra.mrb[64].mxu0 %v12913_v7  ;;  %v9191_v61 = vmul.f32 %v12422_v38, %v9185_v4  ;;  %v9192_v18 = vmul.f32 %v12422_v38, %v9186_v48  ;;  %v9193_v37 = vmul.f32 %v12422_v38, %v9187_v57  ;;  %v9194_v36 = vmul.f32 %v12422_v38, %v9188_v0 }
 0x4f5   :  { %8195 = vmatmul.mubr.bf16.vlgmr.msra.gmra.mrb[64].mxu1 %v12927_v14  ;;  %8972 = vmatpush1.bf16.msra.mxu0 %v12229_v52 }
 0x4f6   :  { %9013 = vmatpush1.bf16.msra.mxu1 %v12232_v47  ;;  %8973 = vmatprep.subr.bf16.mxu0 %v12237_v62  ;;  %v9216_v33 = vmul.f32 %v13198_v45, %v9191_v61  ;;  %v9217_v7 = vmul.f32 %v13201_v56, %v9192_v18  ;;  %v9218_v14 = vmul.f32 %v13204_v8, %v9193_v37  ;;  %v12265_v62 = vld [vmem:[#allocation11 + $0xcc0] ss:$16 sps:$4 sm:$0xff]   ;;  %v12273_v18 = vld [vmem:[#allocation11 + $0xce4] ss:$16 sps:$4 sm:$0xff]  }
 0x4f7   :  { %9014 = vmatprep.subr.bf16.mxu1 %v12240_v58  ;;  %9003 = vmatprep.mubr.bf16.mxu0 %v13061_v25  ;;  %v9219_v24 = vmul.f32 %v13207_v46, %v9194_v36  ;;  %v12268_v58 = vld [vmem:[#allocation11 + $0xec0] ss:$16 sps:$4 sm:$0xff]   ;;  %v12276_v37 = vld [vmem:[#allocation11 + $0xee4] ss:$16 sps:$4 sm:$0xff]  }
 0x4f8   :  { %9044 = vmatprep.mubr.bf16.mxu1 %v13065_v5  ;;  %v9241_v49 = vadd.f32 %v13218_v32, %v9216_v33  ;;  %v9242_v6 = vadd.f32 %v13221_v9, %v9217_v7  ;;  %v9243_v41 = vadd.f32 %v13224_v16, %v9218_v14  ;;  %v12282_v36 = vld [vmem:[#allocation11 + $0xf04] ss:$16 sps:$4 sm:$0xff]   ;;  %v12283_v14 = vld [vmem:[#allocation11 + $0xd20] ss:$16 sps:$4 sm:$0xff]  }
 0x4f9   :  { %8974 = vmatpush1.bf16.msra.mxu0 %v12235_v10  ;;  %v9244_v43 = vadd.f32 %v13229_v26, %v9219_v24  ;;  %v12285_v33 = vld [vmem:[#allocation11 + $0xd24] ss:$16 sps:$4 sm:$0xff]   ;;  %v12286_v24 = vld [vmem:[#allocation11 + $0xf20] ss:$16 sps:$4 sm:$0xff]  }
 0x4fa   :  { %9015 = vmatpush1.bf16.msra.mxu1 %v12238_v29  ;;  %8975 = vmatprep.subr.bf16.mxu0 %v12243_v59  ;;  %9245 = vst [vmem:[#allocation19] sm:$0xff] %v9241_v49  ;;  %9246 = vst [vmem:[#allocation19 + $0x8] sm:$0xff] %v9242_v6  ;;  %v12279_v29 = vld [vmem:[#allocation11 + $0xd04] ss:$16 sps:$4 sm:$0xff]   ;;  %v12277_v59 = vld [vmem:[#allocation11 + $0xd00] ss:$16 sps:$4 sm:$0xff]  }
 0x4fb   :  { %9016 = vmatprep.subr.bf16.mxu1 %v12246_v23  ;;  %9247 = vst [vmem:[#allocation19 + $0x10] sm:$0xff] %v9243_v41  ;;  %9248 = vst [vmem:[#allocation19 + $0x18] sm:$0xff] %v9244_v43  ;;  %v12280_v23 = vld [vmem:[#allocation11 + $0xf00] ss:$16 sps:$4 sm:$0xff]   ;;  %v12288_v7 = vld [vmem:[#allocation11 + $0xf24] ss:$16 sps:$4 sm:$0xff]  }
 0x4fc   :  { %v12291_v49 = vld [vmem:[#allocation11 + $0xd44] ss:$16 sps:$4 sm:$0xff]   ;;  %v12289_v41 = vld [vmem:[#allocation11 + $0xd40] ss:$16 sps:$4 sm:$0xff]  }
 0x4fd   :  { %8976 = vmatpush1.bf16.msra.mxu0 %v12241_v11  ;;  %v12294_v6 = vld [vmem:[#allocation11 + $0xf44] ss:$16 sps:$4 sm:$0xff]   ;;  %v12292_v11 = vld [vmem:[#allocation11 + $0xf40] ss:$16 sps:$4 sm:$0xff]  }
 0x4fe   :  { %9017 = vmatpush1.bf16.msra.mxu1 %v12244_v13  ;;  %8977 = vmatprep.subr.bf16.mxu0 %v12249_v51  ;;  %v12297_v13 = vld [vmem:[#allocation11 + $0xd64] ss:$16 sps:$4 sm:$0xff]   ;;  %v12295_v51 = vld [vmem:[#allocation11 + $0xd60] ss:$16 sps:$4 sm:$0xff]  }
 0x4ff   :  { %9018 = vmatprep.subr.bf16.mxu1 %v12252_v34  ;;  %v12300_v43 = vld [vmem:[#allocation11 + $0xf64] ss:$16 sps:$4 sm:$0xff]   ;;  %v12298_v34 = vld [vmem:[#allocation11 + $0xf60] ss:$16 sps:$4 sm:$0xff]  }
 0x501   :  { %8978 = vmatpush1.bf16.msra.mxu0 %v12247_v12  ;;  %v12303_v12 = vld [vmem:[#allocation11 + $0xd84] ss:$16 sps:$4 sm:$0xff]  }
 0x502   :  { %9019 = vmatpush1.bf16.msra.mxu1 %v12250_v15  ;;  %8979 = vmatprep.subr.bf16.mxu0 %v12255_v28  ;;  %v12306_v15 = vld [vmem:[#allocation11 + $0xf84] ss:$16 sps:$4 sm:$0xff]   ;;  %v12301_v28 = vld [vmem:[#allocation11 + $0xd80] ss:$16 sps:$4 sm:$0xff]  }
 0x503   :  { %9020 = vmatprep.subr.bf16.mxu1 %v12258_v19  ;;  %v12304_v19 = vld [vmem:[#allocation11 + $0xf80] ss:$16 sps:$4 sm:$0xff]  }
 0x505   :  { %8980 = vmatpush1.bf16.msra.mxu0 %v12253_v17  ;;  %v12309_v17 = vld [vmem:[#allocation11 + $0xda4] ss:$16 sps:$4 sm:$0xff]  }
 0x506   :  { %9021 = vmatpush1.bf16.msra.mxu1 %v12256_v21  ;;  %8981 = vmatprep.subr.bf16.mxu0 %v12261_v55  ;;  %v12312_v21 = vld [vmem:[#allocation11 + $0xfa4] ss:$16 sps:$4 sm:$0xff]   ;;  %v12307_v55 = vld [vmem:[#allocation11 + $0xda0] ss:$16 sps:$4 sm:$0xff]  }
 0x507   :  { %9022 = vmatprep.subr.bf16.mxu1 %v12264_v35  ;;  %v6949_v60 = vpop.f32.mrb[52].mxu0  ;;  %v12310_v35 = vld [vmem:[#allocation11 + $0xfa0] ss:$16 sps:$4 sm:$0xff]  }
 0x508   :  { %v6990_v42 = vpop.f32.mrb[52].mxu1  ;;  %v6950_v63 = vadd.f32 %v6949_v60, %v13183_v2  ;;  %v6951_v52 = vpop.f32.mrb[53].mxu0  ;;  %v12271_v2 = vld [vmem:[#allocation11 + $0xce0] ss:$16 sps:$4 sm:$0xff]   ;;  %v12321_v60 = vld [vmem:[#allocation11 + $0xde4] ss:$16 sps:$4 sm:$0xff]  }
 0x509   :  { %v6992_v47 = vpop.f32.mrb[53].mxu1  ;;  %v6952_v4 = vadd.f32 %v6951_v52, %v13188_v39  ;;  %v6953_v48 = vpop.f32.mrb[54].mxu0  ;;  %8982 = vmatpush1.bf16.msra.mxu0 %v12259_v40  ;;  %v12274_v39 = vld [vmem:[#allocation11 + $0xee0] ss:$16 sps:$4 sm:$0xff]   ;;  %v12315_v40 = vld [vmem:[#allocation11 + $0xdc4] ss:$16 sps:$4 sm:$0xff]  }
 0x50a   :  { %v6994_v57 = vpop.f32.mrb[54].mxu1  ;;  %9023 = vmatpush1.bf16.msra.mxu1 %v12262_v27  ;;  %v13243_v38 = vadd.f32 %v6990_v42, %v6950_v63  ;;  %v6954_v0 = vpop.f32.mrb[55].mxu0  ;;  %8983 = vmatprep.subr.bf16.mxu0 %v12267_v20  ;;  %v12318_v27 = vld [vmem:[#allocation11 + $0xfc4] ss:$16 sps:$4 sm:$0xff]   ;;  %v12313_v20 = vld [vmem:[#allocation11 + $0xdc0] ss:$16 sps:$4 sm:$0xff]  }
 0x50b   :  { %v6995_v61 = vpop.f32.mrb[55].mxu1  ;;  %9024 = vmatprep.subr.bf16.mxu1 %v12270_v53  ;;  %v13245_v10 = vadd.f32 %v6992_v47, %v6952_v4  ;;  %v12316_v53 = vld [vmem:[#allocation11 + $0xfc0] ss:$16 sps:$4 sm:$0xff]   ;;  %v12324_v42 = vld [vmem:[#allocation11 + $0xfe4] ss:$16 sps:$4 sm:$0xff]  }
 0x50c   :  { %v12319_v63 = vld [vmem:[#allocation11 + $0xde0] ss:$16 sps:$4 sm:$0xff]   ;;  %v12327_v47 = vld [vmem:[#allocation11 + $0xc0c] ss:$16 sps:$4 sm:$0xff]   ;;  %v12325_v48 = vld [vmem:[#allocation11 + $0xc08] ss:$16 sps:$4 sm:$0xff]  }
 0x50d   :  { %8984 = vmatpush1.bf16.msra.mxu0 %v12265_v62  ;;  %v12322_v52 = vld [vmem:[#allocation11 + $0xfe0] ss:$16 sps:$4 sm:$0xff]   ;;  %v12330_v4 = vld [vmem:[#allocation11 + $0xe0c] ss:$16 sps:$4 sm:$0xff]   ;;  %v12328_v57 = vld [vmem:[#allocation11 + $0xe08] ss:$16 sps:$4 sm:$0xff]  }
 0x50e   :  { %9025 = vmatpush1.bf16.msra.mxu1 %v12268_v58  ;;  %8985 = vmatprep.subr.bf16.mxu0 %v12273_v18  ;;  %v12333_v62 = vld [vmem:[#allocation11 + $0xc2c] ss:$16 sps:$4 sm:$0xff]   ;;  %v12331_v0 = vld [vmem:[#allocation11 + $0xc28] ss:$16 sps:$4 sm:$0xff]  }
 0x50f   :  { %9026 = vmatprep.subr.bf16.mxu1 %v12276_v37  ;;  %v12336_v58 = vld [vmem:[#allocation11 + $0xe2c] ss:$16 sps:$4 sm:$0xff]   ;;  %v12334_v61 = vld [vmem:[#allocation11 + $0xe28] ss:$16 sps:$4 sm:$0xff]  }
 0x510   :  { %v12339_v18 = vld [vmem:[#allocation11 + $0xc4c] ss:$16 sps:$4 sm:$0xff]  }
 0x511   :  { %8986 = vmatpush1.bf16.msra.mxu0 %v12271_v2  ;;  %v12342_v37 = vld [vmem:[#allocation11 + $0xe4c] ss:$16 sps:$4 sm:$0xff]   ;;  %v12337_v2 = vld [vmem:[#allocation11 + $0xc48] ss:$16 sps:$4 sm:$0xff]  }
 0x512   :  { %9027 = vmatpush1.bf16.msra.mxu1 %v12274_v39  ;;  %8987 = vmatprep.subr.bf16.mxu0 %v12279_v29  ;;  %v12340_v39 = vld [vmem:[#allocation11 + $0xe48] ss:$16 sps:$4 sm:$0xff]   ;;  %v12345_v29 = vld [vmem:[#allocation11 + $0xc6c] ss:$16 sps:$4 sm:$0xff]  }
 0x513   :  { %9028 = vmatprep.subr.bf16.mxu1 %v12282_v36  ;;  %v12348_v36 = vld [vmem:[#allocation11 + $0xe6c] ss:$16 sps:$4 sm:$0xff]  }
 0x515   :  { %8988 = vmatpush1.bf16.msra.mxu0 %v12277_v59  ;;  %v12343_v59 = vld [vmem:[#allocation11 + $0xc68] ss:$16 sps:$4 sm:$0xff]  }
 0x516   :  { %9029 = vmatpush1.bf16.msra.mxu1 %v12280_v23  ;;  %8989 = vmatprep.subr.bf16.mxu0 %v12285_v33  ;;  %v12346_v23 = vld [vmem:[#allocation11 + $0xe68] ss:$16 sps:$4 sm:$0xff]   ;;  %v12351_v33 = vld [vmem:[#allocation11 + $0xc8c] ss:$16 sps:$4 sm:$0xff]  }
 0x517   :  { %9030 = vmatprep.subr.bf16.mxu1 %v12288_v7  ;;  %v12354_v7 = vld [vmem:[#allocation11 + $0xe8c] ss:$16 sps:$4 sm:$0xff]  }
 0x519   :  { %8990 = vmatpush1.bf16.msra.mxu0 %v12283_v14  ;;  %v12357_v14 = vld [vmem:[#allocation11 + $0xcac] ss:$16 sps:$4 sm:$0xff]  }
 0x51a   :  { %9031 = vmatpush1.bf16.msra.mxu1 %v12286_v24  ;;  %8991 = vmatprep.subr.bf16.mxu0 %v12291_v49  ;;  %v12360_v24 = vld [vmem:[#allocation11 + $0xeac] ss:$16 sps:$4 sm:$0xff]   ;;  %v12355_v49 = vld [vmem:[#allocation11 + $0xca8] ss:$16 sps:$4 sm:$0xff]  }
 0x51b   :  { %9032 = vmatprep.subr.bf16.mxu1 %v12294_v6  ;;  %v12358_v6 = vld [vmem:[#allocation11 + $0xea8] ss:$16 sps:$4 sm:$0xff]  }
 0x51d   :  { %8992 = vmatpush1.bf16.msra.mxu0 %v12289_v41  ;;  %v12363_v41 = vld [vmem:[#allocation11 + $0xccc] ss:$16 sps:$4 sm:$0xff]  }
 0x51e   :  { %9033 = vmatpush1.bf16.msra.mxu1 %v12292_v11  ;;  %8993 = vmatprep.subr.bf16.mxu0 %v12297_v13  ;;  %v12366_v11 = vld [vmem:[#allocation11 + $0xecc] ss:$16 sps:$4 sm:$0xff]  }
 0x51f   :  { %9034 = vmatprep.subr.bf16.mxu1 %v12300_v43 }
 0x521   :  { %8994 = vmatpush1.bf16.msra.mxu0 %v12295_v51 }
 0x522   :  { %9035 = vmatpush1.bf16.msra.mxu1 %v12298_v34  ;;  %8995 = vmatprep.subr.bf16.mxu0 %v12303_v12 }
 0x523   :  { %9036 = vmatprep.subr.bf16.mxu1 %v12306_v15 }
 0x525   :  { %8996 = vmatpush1.bf16.msra.mxu0 %v12301_v28 }
 0x526   :  { %9037 = vmatpush1.bf16.msra.mxu1 %v12304_v19  ;;  %8997 = vmatprep.subr.bf16.mxu0 %v12309_v17  ;;  %v12361_v17 = vld [vmem:[#allocation11 + $0xcc8] ss:$16 sps:$4 sm:$0xff]  }
 0x527   :  { %9038 = vmatprep.subr.bf16.mxu1 %v12312_v21  ;;  %v12364_v21 = vld [vmem:[#allocation11 + $0xec8] ss:$16 sps:$4 sm:$0xff]  }
 0x529   :  { %8998 = vmatpush1.bf16.msra.mxu0 %v12307_v55 }
 0x52a   :  { %9039 = vmatpush1.bf16.msra.mxu1 %v12310_v35  ;;  %8999 = vmatprep.subr.bf16.mxu0 %v12315_v40 }
 0x52b   :  { %9040 = vmatprep.subr.bf16.mxu1 %v12318_v27  ;;  %v12369_v27 = vld [vmem:[#allocation11 + $0xcec] ss:$16 sps:$4 sm:$0xff]  }
 0x52d   :  { %9000 = vmatpush1.bf16.msra.mxu0 %v12313_v20  ;;  %v12372_v20 = vld [vmem:[#allocation11 + $0xeec] ss:$16 sps:$4 sm:$0xff]  }
 0x52e   :  { %9041 = vmatpush1.bf16.msra.mxu1 %v12316_v53  ;;  %9001 = vmatprep.subr.bf16.mxu0 %v12321_v60  ;;  %v12375_v60 = vld [vmem:[#allocation11 + $0xd0c] ss:$16 sps:$4 sm:$0xff]  }
 0x52f   :  { %9042 = vmatprep.subr.bf16.mxu1 %v12324_v42  ;;  %v12378_v42 = vld [vmem:[#allocation11 + $0xf0c] ss:$16 sps:$4 sm:$0xff]  }
 0x531   :  { %9002 = vmatpush1.bf16.msra.mxu0 %v12319_v63  ;;  %v12373_v63 = vld [vmem:[#allocation11 + $0xd08] ss:$16 sps:$4 sm:$0xff]  }
 0x532   :  { %9043 = vmatpush1.bf16.msra.mxu1 %v12322_v52  ;;  %9053 = vmatprep.subr.bf16.mxu0 %v12327_v47  ;;  %v12376_v52 = vld [vmem:[#allocation11 + $0xf08] ss:$16 sps:$4 sm:$0xff]   ;;  %v12381_v47 = vld [vmem:[#allocation11 + $0xd2c] ss:$16 sps:$4 sm:$0xff]  }
 0x533   :  { %9094 = vmatprep.subr.bf16.mxu1 %v12330_v4  ;;  %v12384_v4 = vld [vmem:[#allocation11 + $0xf2c] ss:$16 sps:$4 sm:$0xff]  }
 0x534   :  { %9004 = vmatmul.mubr.bf16.vlgmr.msra.gmra.mrb[68].mxu0 %v13079_v30 }
 0x535   :  { %9045 = vmatmul.mubr.bf16.vlgmr.msra.gmra.mrb[68].mxu1 %v13083_v44  ;;  %9054 = vmatpush1.bf16.msra.mxu0 %v12325_v48  ;;  %v12379_v48 = vld [vmem:[#allocation11 + $0xd28] ss:$16 sps:$4 sm:$0xff]  }
 0x536   :  { %9095 = vmatpush1.bf16.msra.mxu1 %v12328_v57  ;;  %9055 = vmatprep.subr.bf16.mxu0 %v12333_v62  ;;  %v12382_v57 = vld [vmem:[#allocation11 + $0xf28] ss:$16 sps:$4 sm:$0xff]   ;;  %v12387_v62 = vld [vmem:[#allocation11 + $0xd4c] ss:$16 sps:$4 sm:$0xff]  }
 0x537   :  { %9096 = vmatprep.subr.bf16.mxu1 %v12336_v58  ;;  %9085 = vmatprep.mubr.bf16.mxu0 %v13061_v25  ;;  %v12349_v25 = vld [vmem:[#allocation11 + $0xc88] ss:$16 sps:$4 sm:$0xff]   ;;  %v12390_v58 = vld [vmem:[#allocation11 + $0xf4c] ss:$16 sps:$4 sm:$0xff]  }
 0x538   :  { %9126 = vmatprep.mubr.bf16.mxu1 %v13065_v5  ;;  %v12352_v5 = vld [vmem:[#allocation11 + $0xe88] ss:$16 sps:$4 sm:$0xff]  }
 0x539   :  { %9056 = vmatpush1.bf16.msra.mxu0 %v12331_v0  ;;  %v12385_v0 = vld [vmem:[#allocation11 + $0xd48] ss:$16 sps:$4 sm:$0xff]  }
 0x53a   :  { %9097 = vmatpush1.bf16.msra.mxu1 %v12334_v61  ;;  %9057 = vmatprep.subr.bf16.mxu0 %v12339_v18  ;;  %v12388_v61 = vld [vmem:[#allocation11 + $0xf48] ss:$16 sps:$4 sm:$0xff]   ;;  %v12393_v18 = vld [vmem:[#allocation11 + $0xd6c] ss:$16 sps:$4 sm:$0xff]  }
 0x53b   :  { %9098 = vmatprep.subr.bf16.mxu1 %v12342_v37  ;;  %v12396_v37 = vld [vmem:[#allocation11 + $0xf6c] ss:$16 sps:$4 sm:$0xff]  }
 0x53d   :  { %9058 = vmatpush1.bf16.msra.mxu0 %v12337_v2  ;;  %v12391_v2 = vld [vmem:[#allocation11 + $0xd68] ss:$16 sps:$4 sm:$0xff]  }
 0x53e   :  { %9099 = vmatpush1.bf16.msra.mxu1 %v12340_v39  ;;  %9059 = vmatprep.subr.bf16.mxu0 %v12345_v29  ;;  %v12394_v39 = vld [vmem:[#allocation11 + $0xf68] ss:$16 sps:$4 sm:$0xff]   ;;  %v12399_v29 = vld [vmem:[#allocation11 + $0xd8c] ss:$16 sps:$4 sm:$0xff]  }
 0x53f   :  { %9100 = vmatprep.subr.bf16.mxu1 %v12348_v36  ;;  %v12402_v36 = vld [vmem:[#allocation11 + $0xf8c] ss:$16 sps:$4 sm:$0xff]  }
 0x541   :  { %9060 = vmatpush1.bf16.msra.mxu0 %v12343_v59  ;;  %v12397_v59 = vld [vmem:[#allocation11 + $0xd88] ss:$16 sps:$4 sm:$0xff]  }
 0x542   :  { %9101 = vmatpush1.bf16.msra.mxu1 %v12346_v23  ;;  %9061 = vmatprep.subr.bf16.mxu0 %v12351_v33  ;;  %v12400_v23 = vld [vmem:[#allocation11 + $0xf88] ss:$16 sps:$4 sm:$0xff]   ;;  %v12405_v33 = vld [vmem:[#allocation11 + $0xdac] ss:$16 sps:$4 sm:$0xff]  }
 0x543   :  { %9102 = vmatprep.subr.bf16.mxu1 %v12354_v7  ;;  %v12408_v7 = vld [vmem:[#allocation11 + $0xfac] ss:$16 sps:$4 sm:$0xff]  }
 0x545   :  { %9062 = vmatpush1.bf16.msra.mxu0 %v12349_v25  ;;  %v12403_v25 = vld [vmem:[#allocation11 + $0xda8] ss:$16 sps:$4 sm:$0xff]  }
 0x546   :  { %9103 = vmatpush1.bf16.msra.mxu1 %v12352_v5  ;;  %9063 = vmatprep.subr.bf16.mxu0 %v12357_v14  ;;  %v12406_v5 = vld [vmem:[#allocation11 + $0xfa8] ss:$16 sps:$4 sm:$0xff]   ;;  %v12411_v14 = vld [vmem:[#allocation11 + $0xdcc] ss:$16 sps:$4 sm:$0xff]  }
 0x547   :  { %9104 = vmatprep.subr.bf16.mxu1 %v12360_v24  ;;  %v7991_v13 = vpop.f32.mrb[56].mxu0  ;;  %v12414_v24 = vld [vmem:[#allocation11 + $0xfcc] ss:$16 sps:$4 sm:$0xff]  }
 0x548   :  { %v8032_v43 = vpop.f32.mrb[56].mxu1  ;;  %v7992_v51 = vadd.f32 %v7991_v13, %v13186_v31  ;;  %v7993_v34 = vpop.f32.mrb[57].mxu0  ;;  %v12367_v31 = vld [vmem:[#allocation11 + $0xce8] ss:$16 sps:$4 sm:$0xff]  }
 0x549   :  { %v8034_v12 = vpop.f32.mrb[57].mxu1  ;;  %v7994_v15 = vadd.f32 %v7993_v34, %v13191_v1  ;;  %v7995_v28 = vpop.f32.mrb[58].mxu0  ;;  %9064 = vmatpush1.bf16.msra.mxu0 %v12355_v49  ;;  %v12370_v1 = vld [vmem:[#allocation11 + $0xee8] ss:$16 sps:$4 sm:$0xff]  }
 0x54a   :  { %v8036_v19 = vpop.f32.mrb[58].mxu1  ;;  %9105 = vmatpush1.bf16.msra.mxu1 %v12358_v6  ;;  %v13253_v55 = vadd.f32 %v8032_v43, %v7992_v51  ;;  %v7996_v35 = vpop.f32.mrb[59].mxu0  ;;  %9065 = vmatprep.subr.bf16.mxu0 %v12363_v41  ;;  %v12409_v49 = vld [vmem:[#allocation11 + $0xdc8] ss:$16 sps:$4 sm:$0xff]   ;;  %v12417_v41 = vld [vmem:[#allocation11 + $0xdec] ss:$16 sps:$4 sm:$0xff]  }
 0x54b   :  { %v8037_v40 = vpop.f32.mrb[59].mxu1  ;;  %9106 = vmatprep.subr.bf16.mxu1 %v12366_v11  ;;  %v13255_v53 = vadd.f32 %v8034_v12, %v7994_v15  ;;  %v12412_v6 = vld [vmem:[#allocation11 + $0xfc8] ss:$16 sps:$4 sm:$0xff]   ;;  %v12420_v11 = vld [vmem:[#allocation11 + $0xfec] ss:$16 sps:$4 sm:$0xff]  }
 0x54c   :  { %v12415_v13 = vld [vmem:[#allocation11 + $0xde8] ss:$16 sps:$4 sm:$0xff]  }
 0x54d   :  { %9066 = vmatpush1.bf16.msra.mxu0 %v12361_v17  ;;  %v12418_v43 = vld [vmem:[#allocation11 + $0xfe8] ss:$16 sps:$4 sm:$0xff]  }
 0x54e   :  { %9107 = vmatpush1.bf16.msra.mxu1 %v12364_v21  ;;  %9067 = vmatprep.subr.bf16.mxu0 %v12369_v27 }
 0x54f   :  { %9108 = vmatprep.subr.bf16.mxu1 %v12372_v20 }
 0x551   :  { %9068 = vmatpush1.bf16.msra.mxu0 %v12367_v31 }
 0x552   :  { %9109 = vmatpush1.bf16.msra.mxu1 %v12370_v1  ;;  %9069 = vmatprep.subr.bf16.mxu0 %v12375_v60 }
 0x553   :  { %9110 = vmatprep.subr.bf16.mxu1 %v12378_v42 }
 0x555   :  { %9070 = vmatpush1.bf16.msra.mxu0 %v12373_v63 }
 0x556   :  { %9111 = vmatpush1.bf16.msra.mxu1 %v12376_v52  ;;  %9071 = vmatprep.subr.bf16.mxu0 %v12381_v47 }
 0x557   :  { %9112 = vmatprep.subr.bf16.mxu1 %v12384_v4 }
 0x559   :  { %9072 = vmatpush1.bf16.msra.mxu0 %v12379_v48 }
 0x55a   :  { %9113 = vmatpush1.bf16.msra.mxu1 %v12382_v57  ;;  %9073 = vmatprep.subr.bf16.mxu0 %v12387_v62 }
 0x55b   :  { %9114 = vmatprep.subr.bf16.mxu1 %v12390_v58 }
 0x55d   :  { %9074 = vmatpush1.bf16.msra.mxu0 %v12385_v0 }
 0x55e   :  { %9115 = vmatpush1.bf16.msra.mxu1 %v12388_v61  ;;  %9075 = vmatprep.subr.bf16.mxu0 %v12393_v18 }
 0x55f   :  { %9116 = vmatprep.subr.bf16.mxu1 %v12396_v37 }
 0x561   :  { %9076 = vmatpush1.bf16.msra.mxu0 %v12391_v2 }
 0x562   :  { %9117 = vmatpush1.bf16.msra.mxu1 %v12394_v39  ;;  %9077 = vmatprep.subr.bf16.mxu0 %v12399_v29  ;;  %v9139_v29 = vld [vmem:[#allocation14] sm:$0xf] }
 0x563   :  { %9118 = vmatprep.subr.bf16.mxu1 %v12402_v36  ;;  %v9144_v36 = vrot.slane %v9139_v29, %v13135_v22 }
 0x565   :  { %9078 = vmatpush1.bf16.msra.mxu0 %v12397_v59  ;;  %v9148_v59 = vrot.slane %v9139_v29, %v13137_v3 }
 0x566   :  { %9119 = vmatpush1.bf16.msra.mxu1 %v12400_v23  ;;  %9079 = vmatprep.subr.bf16.mxu0 %v12405_v33 }
 0x567   :  { %9120 = vmatprep.subr.bf16.mxu1 %v12408_v7 }
 0x569   :  { %9080 = vmatpush1.bf16.msra.mxu0 %v12403_v25 }
 0x56a   :  { %9121 = vmatpush1.bf16.msra.mxu1 %v12406_v5  ;;  %9081 = vmatprep.subr.bf16.mxu0 %v12411_v14  ;;  %v9152_v14 = vrot.slane %v9139_v29, %v13141_v50 }
 0x56b   :  { %9122 = vmatprep.subr.bf16.mxu1 %v12414_v24 }
 0x56d   :  { %9082 = vmatpush1.bf16.msra.mxu0 %v12409_v49 }
 0x56e   :  { %9123 = vmatpush1.bf16.msra.mxu1 %v12412_v6  ;;  %9083 = vmatprep.subr.bf16.mxu0 %v12417_v41  ;;  %v9156_v41 = vrot.slane %v9139_v29, %v13143_v54 }
 0x56f   :  { %9124 = vmatprep.subr.bf16.mxu1 %v12420_v11 }
 0x571   :  { %9084 = vmatpush1.bf16.msra.mxu0 %v12415_v13 }
 0x572   :  { %9125 = vmatpush1.bf16.msra.mxu1 %v12418_v43 }
 0x574   :  { %9086 = vmatmul.mubr.bf16.vlgmr.msra.gmra.mrb[72].mxu0 %v13079_v30 }
 0x575   :  { %9127 = vmatmul.mubr.bf16.vlgmr.msra.gmra.mrb[72].mxu1 %v13083_v44 }
 0x587   :  { %v8073_v51 = vpop.f32.mrb[60].mxu0 }
 0x588   :  { %v8114_v34 = vpop.f32.mrb[60].mxu1  ;;  %v8074_v12 = vadd.f32 %v8073_v51, %v13253_v55  ;;  %v8075_v28 = vpop.f32.mrb[61].mxu0 }
 0x589   :  { %v8115_v15 = vadd.f32 %v8114_v34, %v13243_v38  ;;  %v8116_v19 = vpop.f32.mrb[61].mxu1  ;;  %v8076_v17 = vadd.f32 %v8075_v28, %v13255_v53  ;;  %v8077_v35 = vpop.f32.mrb[62].mxu0 }
 0x58a   :  { %v8117_v21 = vadd.f32 %v8116_v19, %v13245_v10  ;;  %v8118_v40 = vpop.f32.mrb[62].mxu1  ;;  %v8078_v27 = vpop.f32.mrb[63].mxu0 }
 0x58b   :  { %v8119_v20 = vpop.f32.mrb[63].mxu1 }
 0x5c7   :  { %v8155_v31 = vpop.f32.mrb[64].mxu0 }
 0x5c8   :  { %v8196_v30 = vpop.f32.mrb[64].mxu1  ;;  %v8156_v1 = vadd.f32 %v8155_v31, %v8115_v15  ;;  %v8157_v44 = vpop.f32.mrb[65].mxu0 }
 0x5c9   :  { %v8198_v60 = vpop.f32.mrb[65].mxu1  ;;  %v8158_v42 = vadd.f32 %v8157_v44, %v8117_v21  ;;  %v8159_v63 = vpop.f32.mrb[66].mxu0 }
 0x5ca   :  { %v8200_v55 = vpop.f32.mrb[66].mxu1  ;;  %v8197_v52 = vadd.f32 %v8196_v30, %v8156_v1  ;;  %v8160_v38 = vpop.f32.mrb[67].mxu0 }
 0x5cb   :  { %v8201_v47 = vpop.f32.mrb[67].mxu1  ;;  %v8199_v4 = vadd.f32 %v8198_v60, %v8158_v42 }
 0x607   :  { %v9005_v48 = vpop.f32.mrb[68].mxu0 }
 0x608   :  { %v9046_v53 = vpop.f32.mrb[68].mxu1  ;;  %v9007_v10 = vpop.f32.mrb[69].mxu0 }
 0x609   :  { %v9047_v57 = vadd.f32 %v9046_v53, %v9005_v48  ;;  %v9048_v62 = vpop.f32.mrb[69].mxu1  ;;  %v9009_v0 = vpop.f32.mrb[70].mxu0 }
 0x60a   :  { %v9049_v58 = vadd.f32 %v9048_v62, %v9007_v10  ;;  %v9050_v61 = vpop.f32.mrb[70].mxu1  ;;  %v9010_v37 = vpop.f32.mrb[71].mxu0 }
 0x60b   :  { %v9135_v18 = vadd.f32 %v9047_v57, %v8074_v12  ;;  %v9051_v2 = vpop.f32.mrb[71].mxu1 }
 0x60c   :  { %v9136_v39 = vadd.f32 %v9049_v58, %v8076_v17 }
 0x60d   :  { %v9161_v23 = vadd.f32 %v9144_v36, %v9135_v18 }
 0x60e   :  { %v9162_v33 = vadd.f32 %v9148_v59, %v9136_v39 }
 0x60f   :  { %v9255_v22 = vmul.f32 %v9161_v23, %v9161_v23 }
 0x610   :  { %v9256_v12 = vmul.f32 %v9162_v33, %v9162_v33  ;;  %v9249_v28 = vadd.f32 %v9162_v33, %v9161_v23 }
 0x612   :  { %v9259_v35 = vadd.f32 %v9256_v12, %v9255_v22 }
 0x647   :  { %v9087_v7 = vpop.f32.mrb[72].mxu0 }
 0x648   :  { %v9128_v25 = vpop.f32.mrb[72].mxu1  ;;  %v9089_v24 = vpop.f32.mrb[73].mxu0 }
 0x649   :  { %v9129_v5 = vadd.f32 %v9128_v25, %v9087_v7  ;;  %v9130_v49 = vpop.f32.mrb[73].mxu1  ;;  %v9091_v11 = vpop.f32.mrb[74].mxu0 }
 0x64a   :  { %v9131_v6 = vadd.f32 %v9130_v49, %v9089_v24  ;;  %v9132_v13 = vpop.f32.mrb[74].mxu1  ;;  %v9092_v51 = vpop.f32.mrb[75].mxu0 }
 0x64b   :  { %v9137_v43 = vadd.f32 %v9129_v5, %v8197_v52  ;;  %v9133_v34 = vpop.f32.mrb[75].mxu1 }
 0x64c   :  { %v9138_v3 = vadd.f32 %v9131_v6, %v8199_v4 }
 0x64d   :  { %v9163_v15 = vadd.f32 %v9152_v14, %v9137_v43 }
 0x64e   :  { %v9164_v19 = vadd.f32 %v9156_v41, %v9138_v3 }
 0x64f   :  { %v9250_v17 = vadd.f32 %v9249_v28, %v9163_v15  ;;  %v9257_v21 = vmul.f32 %v9163_v15, %v9163_v15 }
 0x650   :  { %v9258_v50 = vmul.f32 %v9164_v19, %v9164_v19 }
 0x651   :  { %v9251_v40 = vadd.f32 %v9250_v17, %v9164_v19  ;;  %v9260_v27 = vadd.f32 %v9259_v35, %v9257_v21 }
 0x653   :  { %9252 = vadd.xlane.f32.xlu0 %v9251_v40  ;;  %v9261_v20 = vadd.f32 %v9260_v27, %v9258_v50 }
 0x655   :  { %9262 = vadd.xlane.f32.xlu1 %v9261_v20 }
 0x656   :  { %12656 = shalt.err (!%p12653_p0)
}
 0x657   :  { %s12657_s14 = scalar_lea.hbm %s13309_s10, 512 }
 0x658   :  { %p12658_p1 = scmp.ne.s32.totalorder %s13309_s10, %s12657_s14  ;;  %p12661_p2 = scmp.lt.u32.totalorder %s12657_s14, %s13309_s10 }
 0x65a   :  { %p12663_p3 = pnand %p12661_p2, %p12658_p1 }
 0x65c   :  { %12666 = shalt.err (!%p12663_p3)
}
 0x65d   :  { %9298 = dma.vmem_to_hbm [thread:$0]  %s9296_s27, 512, %s13309_s10, [#allocation4]  }
 0x65e   :  { %s12718_s17 = smov [#allocation20]  }
 0x65f   :  { %s9305_s19 = sshll.u32 %s12718_s17, 4  ;;  %s9306_s19 = int_to_ptr.vmem [resolvable:$true] %s9305_s19 }
 0x660   :  { %s12667_s10 = scalar_lea.vmem %s9306_s19, 512  ;;  %p12672_p5 = scmp.lt.s32.totalorder %s9306_s19, %s9306_s19 }
 0x661   :  { %p12668_p4 = scmp.ne.s32.totalorder %s9306_s19, %s12667_s10  ;;  %p12673_p6 = scmp.lt.s32.totalorder %s12667_s10, %s12667_s10 }
 0x663   :  { %p12674_p7 = por %p12673_p6, %p12672_p5 }
 0x665   :  { %p12675_p8 = pnand %p12674_p7, %p12668_p4 }
 0x6e0   :  { %v9253_v54 = vpop.xlane.xlu0 %9252 }
 0x6e1   :  { %v9254_v31 = vmul.f32 0.001953125, %v9253_v54 }
 0x6e2   :  { %v9263_v30 = vpop.xlane.xlu1 %9262 }
 0x6e3   :  { %v9264_v1 = vmul.f32 0.001953125, %v9263_v30  ;;  %v9265_v44 = vmul.f32 %v9254_v31, %v9254_v31  ;;  %v9267_v63 = vsub.f32 %v9161_v23, %v9254_v31  ;;  %v9268_v55 = vsub.f32 %v9162_v33, %v9254_v31 }
 0x6e4   :  { %v9269_v52 = vsub.f32 %v9163_v15, %v9254_v31  ;;  %v9270_v38 = vsub.f32 %v9164_v19, %v9254_v31 }
 0x6e5   :  { %v9266_v60 = vsub.f32 %v9264_v1, %v9265_v44 }
 0x6e7   :  { %v9271_v42 = vadd.f32 1e-05, %v9266_v60 }
 0x6e9   :  { %12423 = vrsqrt.f32 %v9271_v42 }
 0x6f3   :  { %v12424_v47 = vpop.eup %12423 }
 0x6f4   :  { %v9273_v4 = vmul.f32 %v12424_v47, %v9267_v63  ;;  %v9274_v48 = vmul.f32 %v12424_v47, %v9268_v55  ;;  %v9275_v53 = vmul.f32 %v12424_v47, %v9269_v52  ;;  %v9276_v57 = vmul.f32 %v12424_v47, %v9270_v38 }
 0x6f6   :  { %v9277_v10 = vmul.f32 %v9273_v4, %v13198_v45  ;;  %v9278_v62 = vmul.f32 %v9274_v48, %v13201_v56  ;;  %v9279_v58 = vmul.f32 %v9275_v53, %v13204_v8  ;;  %v9280_v0 = vmul.f32 %v9276_v57, %v13207_v46 }
 0x6f8   :  { %v9281_v61 = vadd.f32 %v9277_v10, %v13218_v32  ;;  %v9282_v18 = vadd.f32 %v9278_v62, %v13221_v9  ;;  %v9283_v37 = vadd.f32 %v9279_v58, %v13224_v16  ;;  %v9284_v2 = vadd.f32 %v9280_v0, %v13229_v26 }
 0x6fa   :  { %9285 = vst [vmem:[#allocation20] sm:$0xff] %v9281_v61  ;;  %9286 = vst [vmem:[#allocation20 + $0x8] sm:$0xff] %v9282_v18 }
 0x6fb   :  { %9287 = vst [vmem:[#allocation20 + $0x10] sm:$0xff] %v9283_v37  ;;  %9288 = vst [vmem:[#allocation20 + $0x18] sm:$0xff] %v9284_v2 }
 0x6fc   :  { %12678 = shalt.err (!%p12675_p8)
}
 0x6fd   :  { %s12679_s6 = scalar_lea.hbm %s13310_s11, 512 }
 0x6fe   :  { %p12680_p9 = scmp.ne.s32.totalorder %s13310_s11, %s12679_s6  ;;  %p12683_p10 = scmp.lt.u32.totalorder %s12679_s6, %s13310_s11 }
 0x700   :  { %p12685_p11 = pnand %p12683_p10, %p12680_p9 }
 0x702   :  { %12688 = shalt.err (!%p12685_p11)
}
 0x703   :  { %9308 = dma.vmem_to_hbm [thread:$0]  %s9306_s19, 512, %s13310_s11, [#allocation21]  }
 0x704   :  { %12701 = dma.done.wait [#allocation4], 512  }
 0x705   :  { %12702 = vsyncadd [#allocation4], 4294966784 }
 0x706   :  { %12703 = dma.done.wait [#allocation21], 512  }
 0x707   :  { %12704 = vsyncadd [#allocation21], 4294966784 }
 0x708   :  { %9315 = vsyncpa [#allocation3], 1 }
 0x709   :  { %9316 = vsyncpa [#allocation6], 1 }
 0x70a   :  { %9317 = vsyncpa [#allocation9], 1 }
 0x70b   :  { %9318 = vsyncpa [#allocation12], 1 }
 0x70c   :  { %9319 = vsyncpa [#allocation15], 1 }
 0x70d   :  { %9320 = vsyncpa [#allocation18], 1 }
 0x70e   :  { %9321 = vsyncpa [#allocation4], 1 }
 0x70f   :  { %9322 = vsyncpa [#allocation21], 1 }

</bundles_post_ra>
